<compile_context>
chip_gen: v5e
topology: v5e:2x2
jax: 0.10.0
libtpu: 0.0.40
codegen_flags: <defaults>
</compile_context>

<pallas_src>
import functools

import jax
import jax.numpy as jnp
from jax.experimental import pallas as pl
from jax.experimental.pallas import tpu as pltpu

_LANE = 128


def _channel_dims(num_layers=4, input_channels=100, num_classes=21):
    """Reproduce the channel sizes from FeatureClassifier.__init__."""
    dims = [input_channels, 512]
    for n in range(num_layers):
        dims.append(int(512 / (n + 2) ** 2))
    dims.append(num_classes)
    return dims  # e.g. [100, 512, 128, 56, 32, 20, 21]


def _make_kernel(num_mats):
    def kernel(x_ref, *rest):
        out_ref = rest[-1]
        wb = rest[:-1]  # alternating weight / bias refs (weights bf16, biases f32)

        # x tile: (C_in, tile).  Cast once to bf16 for the MXU (no-op if x is already
        # bf16 -- preferred on v6e/v7x when the producer can emit bf16).
        h_bf16 = x_ref[...]
        if h_bf16.dtype != jnp.bfloat16:
            h_bf16 = h_bf16.astype(jnp.bfloat16)

        h_f32 = None
        for i in range(num_mats):
            w = wb[2 * i][...]        # (C_out, C_in) bf16
            b = wb[2 * i + 1][...]    # (C_out, 1)    f32, broadcasts over lanes
            # bf16 MXU matmul with f32 accumulation; bias add stays in f32.
            h_f32 = jnp.dot(w, h_bf16, preferred_element_type=jnp.float32) + b
            if i < num_mats - 1:
                # LeakyReLU(0.01): max(h, 0.01*h) -- identical for slope < 1, fewer
                # VALU ops than compare+select.
                h_f32 = jnp.maximum(h_f32, 0.01 * h_f32)
                h_bf16 = h_f32.astype(jnp.bfloat16)
        out_ref[...] = h_f32.astype(out_ref.dtype)

    return kernel


def feature_classifier_forward(
    x_nchw, weights, biases, *, tile_hw=2048, vmem_limit_bytes=48 * 1024 * 1024
):
    """x_nchw: (N, C_in, H, W) f32 or bf16; weights[i]: (C_out, C_in); biases[i]: (C_out, 1).

    Returns logits of shape (N, num_classes, H, W) in float32.

    tile_hw: spatial tile (lane axis), rounded to a 128 multiple.  Default 2048 keeps
    the per-tile VMEM footprint (~(512,tile) f32+bf16 intermediates + input blocks +
    weights) around 10-16 MiB -- safe on v7x's 64 MiB physical VMEM and amortizes the
    ~0.35us per-grid-step overhead on all generations.
    """
    N, C_in, H, W = x_nchw.shape
    HW = H * W
    num_mats = len(weights)
    assert num_mats >= 1, "FeatureClassifier always has at least the logit layer"
    num_classes = weights[-1].shape[0]

    # Lane-aligned spatial tile (multiple of 128), capped by the (128-rounded) data size.
    hw_rounded = pl.cdiv(HW, _LANE) * _LANE
    tile = min(max(_LANE, (tile_hw // _LANE) * _LANE), hw_rounded)
    # v7x has 2 TensorCores and shards "parallel" grid axes across them: guarantee at
    # least 2 grid steps when the problem allows it.
    while N * pl.cdiv(HW, tile) < 2 and tile > _LANE:
        tile = max(_LANE, (tile // 2) // _LANE * _LANE)

    grid = (N, pl.cdiv(HW, tile))

    # NCHW -> (N, C_in, H*W): pure reshape, no transpose, no padding copy.  If HW is
    # not a multiple of `tile`, the last block is partial: Pallas masks the writes and
    # the over-run (garbage) lanes never reach HBM.
    x = x_nchw.reshape(N, C_in, HW)

    # Weights are tiny and resident in VMEM (constant index_map) -> cast once to bf16.
    w_bf16 = [w.astype(jnp.bfloat16) for w in weights]

    in_specs = [pl.BlockSpec((None, C_in, tile), lambda n, j: (n, 0, j))]
    args = [x]
    for w, b in zip(w_bf16, biases):
        # Constant index_map: loaded once, stays resident across all grid steps.
        in_specs.append(pl.BlockSpec(w.shape, lambda n, j: (0, 0)))
        in_specs.append(pl.BlockSpec(b.shape, lambda n, j: (0, 0)))
        args.append(w)
        args.append(b)

    out = pl.pallas_call(
        _make_kernel(num_mats),
        out_shape=jax.ShapeDtypeStruct((N, num_classes, HW), jnp.float32),
        grid_spec=pltpu.PrefetchScalarGridSpec(
            num_scalar_prefetch=0,
            grid=grid,
            in_specs=in_specs,
            # Lane-dense output block: last block dim is a 128-multiple.
            out_specs=pl.BlockSpec((None, num_classes, tile), lambda n, j: (n, 0, j)),
        ),
        compiler_params=pltpu.CompilerParams(
            dimension_semantics=("parallel", "parallel"),
            vmem_limit_bytes=vmem_limit_bytes,
        ),
    )(*args)

    return out.reshape(N, num_classes, H, W)  # already NCHW, no transpose / slice


def init_params(key, num_layers=4, input_channels=100, num_classes=21):
    """Deterministic synthetic parameters matching the module's layer shapes."""
    dims = _channel_dims(num_layers, input_channels, num_classes)
    weights, biases = [], []
    for c_in, c_out in zip(dims[:-1], dims[1:]):
        key, kw, kb = jax.random.split(key, 3)
        scale = 1.0 / jnp.sqrt(jnp.float32(c_in))
        # Conv2d 1x1 weight (c_out, c_in, 1, 1) squeezed to (c_out, c_in).
        weights.append(jax.random.normal(kw, (c_out, c_in), jnp.float32) * scale)
        biases.append(jax.random.normal(kb, (c_out, 1), jnp.float32) * 0.01)
    return weights, biases


def reference_forward(x_nchw, weights, biases):
    """Plain-JAX f32 reference of the same forward pass (for a sanity check)."""
    N, C, H, W = x_nchw.shape
    h = x_nchw.reshape(N, C, H * W).astype(jnp.float32)
    for i, (w, b) in enumerate(zip(weights, biases)):
        h = jnp.einsum("oc,ncp->nop", w, h) + b  # (C_out,1) broadcasts over pixels
        if i < len(weights) - 1:
            h = jnp.where(h >= 0, h, 0.01 * h)
    return h.reshape(N, -1, H, W)


if __name__ == "__main__":
    NUM_LAYERS = 4
    INPUT_CHANNELS = 100
    NUM_CLASSES = 21
    BATCH, HEIGHT, WIDTH = 2, 16, 16

    key = jax.random.PRNGKey(0)
    key, kx = jax.random.split(key)
    x = jax.random.normal(kx, (BATCH, INPUT_CHANNELS, HEIGHT, WIDTH), jnp.float32)

    weights, biases = init_params(
        key, num_layers=NUM_LAYERS, input_channels=INPUT_CHANNELS, num_classes=NUM_CLASSES
    )

    fwd = jax.jit(functools.partial(feature_classifier_forward, tile_hw=2048))
    logits = jax.block_until_ready(fwd(x, weights, biases))
    assert logits.shape == (BATCH, NUM_CLASSES, HEIGHT, WIDTH), logits.shape

    ref = jax.block_until_ready(reference_forward(x, weights, biases))
    abs_err = float(jnp.max(jnp.abs(logits - ref)))
    scale = max(float(jnp.max(jnp.abs(ref))), 1.0)
    # bf16 MXU operands (f32 accumulation) -> relaxed tolerance vs the f32 reference.
    assert abs_err <= 5e-2 * scale, f"relative error too large: {abs_err / scale}"

    print("KERNEL_OK")
</pallas_src>

<mosaic_0001>
module attributes {stable_mosaic.version = 11 : i64} {
  func.func @kernel(%arg0: i32, %arg1: i32, %arg2: memref<1x100x256xf32, #tpu.memory_space<vmem>>, %arg3: memref<512x100xbf16, #tpu.memory_space<vmem>>, %arg4: memref<512x1xf32, #tpu.memory_space<vmem>>, %arg5: memref<128x512xbf16, #tpu.memory_space<vmem>>, %arg6: memref<128x1xf32, #tpu.memory_space<vmem>>, %arg7: memref<56x128xbf16, #tpu.memory_space<vmem>>, %arg8: memref<56x1xf32, #tpu.memory_space<vmem>>, %arg9: memref<32x56xbf16, #tpu.memory_space<vmem>>, %arg10: memref<32x1xf32, #tpu.memory_space<vmem>>, %arg11: memref<20x32xbf16, #tpu.memory_space<vmem>>, %arg12: memref<20x1xf32, #tpu.memory_space<vmem>>, %arg13: memref<21x20xbf16, #tpu.memory_space<vmem>>, %arg14: memref<21x1xf32, #tpu.memory_space<vmem>>, %arg15: memref<1x21x256xf32, #tpu.memory_space<vmem>>) attributes {dimension_semantics = [#tpu.dimension_semantics<parallel>, #tpu.dimension_semantics<parallel>], iteration_bounds = array<i64: 2, 1>, scalar_prefetch = 0 : i64, scratch_operands = 0 : i64, tpu.core_type = #tpu.core_type<tc>, window_params = [{transform_indices = @transform_0, window_bounds = array<i64: 1, 100, 256>}, {pipeline_mode = #tpu.pipeline_mode<synchronous>, transform_indices = @transform_1, window_bounds = array<i64: 512, 100>}, {pipeline_mode = #tpu.pipeline_mode<synchronous>, transform_indices = @transform_2, window_bounds = array<i64: 512, 1>}, {pipeline_mode = #tpu.pipeline_mode<synchronous>, transform_indices = @transform_3, window_bounds = array<i64: 128, 512>}, {pipeline_mode = #tpu.pipeline_mode<synchronous>, transform_indices = @transform_4, window_bounds = array<i64: 128, 1>}, {pipeline_mode = #tpu.pipeline_mode<synchronous>, transform_indices = @transform_5, window_bounds = array<i64: 56, 128>}, {pipeline_mode = #tpu.pipeline_mode<synchronous>, transform_indices = @transform_6, window_bounds = array<i64: 56, 1>}, {pipeline_mode = #tpu.pipeline_mode<synchronous>, transform_indices = @transform_7, window_bounds = array<i64: 32, 56>}, {pipeline_mode = #tpu.pipeline_mode<synchronous>, transform_indices = @transform_8, window_bounds = array<i64: 32, 1>}, {pipeline_mode = #tpu.pipeline_mode<synchronous>, transform_indices = @transform_9, window_bounds = array<i64: 20, 32>}, {pipeline_mode = #tpu.pipeline_mode<synchronous>, transform_indices = @transform_10, window_bounds = array<i64: 20, 1>}, {pipeline_mode = #tpu.pipeline_mode<synchronous>, transform_indices = @transform_11, window_bounds = array<i64: 21, 20>}, {pipeline_mode = #tpu.pipeline_mode<synchronous>, transform_indices = @transform_12, window_bounds = array<i64: 21, 1>}, {transform_indices = @transform_13, window_bounds = array<i64: 1, 21, 256>}]} {
    %c0 = arith.constant 0 : index
    %c0_0 = arith.constant 0 : index
    %c0_1 = arith.constant 0 : index
    %0 = vector.load %arg2[%c0, %c0_0, %c0_1] : memref<1x100x256xf32, #tpu.memory_space<vmem>>, vector<1x100x256xf32>
    %1 = vector.shape_cast %0 : vector<1x100x256xf32> to vector<100x256xf32>
    %2 = arith.truncf %1 : vector<100x256xf32> to vector<100x256xbf16>
    %c0_2 = arith.constant 0 : index
    %c0_3 = arith.constant 0 : index
    %3 = vector.load %arg3[%c0_2, %c0_3] : memref<512x100xbf16, #tpu.memory_space<vmem>>, vector<512x100xbf16>
    %c0_4 = arith.constant 0 : index
    %c0_5 = arith.constant 0 : index
    %4 = vector.load %arg4[%c0_4, %c0_5] : memref<512x1xf32, #tpu.memory_space<vmem>>, vector<512x1xf32>
    %cst = arith.constant dense<0.000000e+00> : vector<512x256xf32>
    %5 = tpu.matmul %3, %2, %cst {dimension_numbers = #tpu.dot_dimension_numbers<[1], [0], [0], [1], [0, 0, 1, 1], [], []>} : vector<512x100xbf16>, vector<100x256xbf16>, vector<512x256xf32> -> vector<512x256xf32>
    %6 = vector.broadcast %4 : vector<512x1xf32> to vector<512x256xf32>
    %7 = arith.addf %5, %6 : vector<512x256xf32>
    %cst_6 = arith.constant 0.00999999977 : f32
    %8 = vector.broadcast %cst_6 : f32 to vector<512x256xf32>
    %9 = arith.mulf %8, %7 : vector<512x256xf32>
    %10 = arith.maximumf %7, %9 : vector<512x256xf32>
    %11 = arith.truncf %10 : vector<512x256xf32> to vector<512x256xbf16>
    %c0_7 = arith.constant 0 : index
    %c0_8 = arith.constant 0 : index
    %12 = vector.load %arg5[%c0_7, %c0_8] : memref<128x512xbf16, #tpu.memory_space<vmem>>, vector<128x512xbf16>
    %c0_9 = arith.constant 0 : index
    %c0_10 = arith.constant 0 : index
    %13 = vector.load %arg6[%c0_9, %c0_10] : memref<128x1xf32, #tpu.memory_space<vmem>>, vector<128x1xf32>
    %cst_11 = arith.constant dense<0.000000e+00> : vector<128x256xf32>
    %14 = tpu.matmul %12, %11, %cst_11 {dimension_numbers = #tpu.dot_dimension_numbers<[1], [0], [0], [1], [0, 0, 1, 1], [], []>} : vector<128x512xbf16>, vector<512x256xbf16>, vector<128x256xf32> -> vector<128x256xf32>
    %15 = vector.broadcast %13 : vector<128x1xf32> to vector<128x256xf32>
    %16 = arith.addf %14, %15 : vector<128x256xf32>
    %cst_12 = arith.constant 0.00999999977 : f32
    %17 = vector.broadcast %cst_12 : f32 to vector<128x256xf32>
    %18 = arith.mulf %17, %16 : vector<128x256xf32>
    %19 = arith.maximumf %16, %18 : vector<128x256xf32>
    %20 = arith.truncf %19 : vector<128x256xf32> to vector<128x256xbf16>
    %c0_13 = arith.constant 0 : index
    %c0_14 = arith.constant 0 : index
    %21 = vector.load %arg7[%c0_13, %c0_14] : memref<56x128xbf16, #tpu.memory_space<vmem>>, vector<56x128xbf16>
    %c0_15 = arith.constant 0 : index
    %c0_16 = arith.constant 0 : index
    %22 = vector.load %arg8[%c0_15, %c0_16] : memref<56x1xf32, #tpu.memory_space<vmem>>, vector<56x1xf32>
    %cst_17 = arith.constant dense<0.000000e+00> : vector<56x256xf32>
    %23 = tpu.matmul %21, %20, %cst_17 {dimension_numbers = #tpu.dot_dimension_numbers<[1], [0], [0], [1], [0, 0, 1, 1], [], []>} : vector<56x128xbf16>, vector<128x256xbf16>, vector<56x256xf32> -> vector<56x256xf32>
    %24 = vector.broadcast %22 : vector<56x1xf32> to vector<56x256xf32>
    %25 = arith.addf %23, %24 : vector<56x256xf32>
    %cst_18 = arith.constant 0.00999999977 : f32
    %26 = vector.broadcast %cst_18 : f32 to vector<56x256xf32>
    %27 = arith.mulf %26, %25 : vector<56x256xf32>
    %28 = arith.maximumf %25, %27 : vector<56x256xf32>
    %29 = arith.truncf %28 : vector<56x256xf32> to vector<56x256xbf16>
    %c0_19 = arith.constant 0 : index
    %c0_20 = arith.constant 0 : index
    %30 = vector.load %arg9[%c0_19, %c0_20] : memref<32x56xbf16, #tpu.memory_space<vmem>>, vector<32x56xbf16>
    %c0_21 = arith.constant 0 : index
    %c0_22 = arith.constant 0 : index
    %31 = vector.load %arg10[%c0_21, %c0_22] : memref<32x1xf32, #tpu.memory_space<vmem>>, vector<32x1xf32>
    %cst_23 = arith.constant dense<0.000000e+00> : vector<32x256xf32>
    %32 = tpu.matmul %30, %29, %cst_23 {dimension_numbers = #tpu.dot_dimension_numbers<[1], [0], [0], [1], [0, 0, 1, 1], [], []>} : vector<32x56xbf16>, vector<56x256xbf16>, vector<32x256xf32> -> vector<32x256xf32>
    %33 = vector.broadcast %31 : vector<32x1xf32> to vector<32x256xf32>
    %34 = arith.addf %32, %33 : vector<32x256xf32>
    %cst_24 = arith.constant 0.00999999977 : f32
    %35 = vector.broadcast %cst_24 : f32 to vector<32x256xf32>
    %36 = arith.mulf %35, %34 : vector<32x256xf32>
    %37 = arith.maximumf %34, %36 : vector<32x256xf32>
    %38 = arith.truncf %37 : vector<32x256xf32> to vector<32x256xbf16>
    %c0_25 = arith.constant 0 : index
    %c0_26 = arith.constant 0 : index
    %39 = vector.load %arg11[%c0_25, %c0_26] : memref<20x32xbf16, #tpu.memory_space<vmem>>, vector<20x32xbf16>
    %c0_27 = arith.constant 0 : index
    %c0_28 = arith.constant 0 : index
    %40 = vector.load %arg12[%c0_27, %c0_28] : memref<20x1xf32, #tpu.memory_space<vmem>>, vector<20x1xf32>
    %cst_29 = arith.constant dense<0.000000e+00> : vector<20x256xf32>
    %41 = tpu.matmul %39, %38, %cst_29 {dimension_numbers = #tpu.dot_dimension_numbers<[1], [0], [0], [1], [0, 0, 1, 1], [], []>} : vector<20x32xbf16>, vector<32x256xbf16>, vector<20x256xf32> -> vector<20x256xf32>
    %42 = vector.broadcast %40 : vector<20x1xf32> to vector<20x256xf32>
    %43 = arith.addf %41, %42 : vector<20x256xf32>
    %cst_30 = arith.constant 0.00999999977 : f32
    %44 = vector.broadcast %cst_30 : f32 to vector<20x256xf32>
    %45 = arith.mulf %44, %43 : vector<20x256xf32>
    %46 = arith.maximumf %43, %45 : vector<20x256xf32>
    %47 = arith.truncf %46 : vector<20x256xf32> to vector<20x256xbf16>
    %c0_31 = arith.constant 0 : index
    %c0_32 = arith.constant 0 : index
    %48 = vector.load %arg13[%c0_31, %c0_32] : memref<21x20xbf16, #tpu.memory_space<vmem>>, vector<21x20xbf16>
    %c0_33 = arith.constant 0 : index
    %c0_34 = arith.constant 0 : index
    %49 = vector.load %arg14[%c0_33, %c0_34] : memref<21x1xf32, #tpu.memory_space<vmem>>, vector<21x1xf32>
    %cst_35 = arith.constant dense<0.000000e+00> : vector<21x256xf32>
    %50 = tpu.matmul %48, %47, %cst_35 {dimension_numbers = #tpu.dot_dimension_numbers<[1], [0], [0], [1], [0, 0, 1, 1], [], []>} : vector<21x20xbf16>, vector<20x256xbf16>, vector<21x256xf32> -> vector<21x256xf32>
    %51 = vector.broadcast %49 : vector<21x1xf32> to vector<21x256xf32>
    %52 = arith.addf %50, %51 : vector<21x256xf32>
    %c0_36 = arith.constant 0 : index
    %c0_37 = arith.constant 0 : index
    %c0_38 = arith.constant 0 : index
    %53 = vector.load %arg15[%c0_36, %c0_37, %c0_38] : memref<1x21x256xf32, #tpu.memory_space<vmem>>, vector<1x21x256xf32>
    %54 = vector.shape_cast %53 : vector<1x21x256xf32> to vector<21x256xf32>
    %55 = vector.shape_cast %52 : vector<21x256xf32> to vector<1x21x256xf32>
    tpu.vector_store %arg15[%c0_36, %c0_37, %c0_38], %55 {strides = array<i32>} : memref<1x21x256xf32, #tpu.memory_space<vmem>>, vector<1x21x256xf32>,
    return
  }
  func.func @transform_0(%arg0: i32, %arg1: i32) -> (i32, i32, i32) {
    %c0_i32 = arith.constant 0 : i32
    %c0_i32_0 = arith.constant 0 : i32
    return %arg0, %c0_i32, %arg1 : i32, i32, i32
  }
  func.func @transform_1(%arg0: i32, %arg1: i32) -> (i32, i32) {
    %c0_i32 = arith.constant 0 : i32
    %c0_i32_0 = arith.constant 0 : i32
    %c0_i32_1 = arith.constant 0 : i32
    return %c0_i32, %c0_i32_0 : i32, i32
  }
  func.func @transform_2(%arg0: i32, %arg1: i32) -> (i32, i32) {
    %c0_i32 = arith.constant 0 : i32
    %c0_i32_0 = arith.constant 0 : i32
    %c0_i32_1 = arith.constant 0 : i32
    return %c0_i32, %c0_i32_0 : i32, i32
  }
  func.func @transform_3(%arg0: i32, %arg1: i32) -> (i32, i32) {
    %c0_i32 = arith.constant 0 : i32
    %c0_i32_0 = arith.constant 0 : i32
    %c0_i32_1 = arith.constant 0 : i32
    return %c0_i32, %c0_i32_0 : i32, i32
  }
  func.func @transform_4(%arg0: i32, %arg1: i32) -> (i32, i32) {
    %c0_i32 = arith.constant 0 : i32
    %c0_i32_0 = arith.constant 0 : i32
    %c0_i32_1 = arith.constant 0 : i32
    return %c0_i32, %c0_i32_0 : i32, i32
  }
  func.func @transform_5(%arg0: i32, %arg1: i32) -> (i32, i32) {
    %c0_i32 = arith.constant 0 : i32
    %c0_i32_0 = arith.constant 0 : i32
    %c0_i32_1 = arith.constant 0 : i32
    return %c0_i32, %c0_i32_0 : i32, i32
  }
  func.func @transform_6(%arg0: i32, %arg1: i32) -> (i32, i32) {
    %c0_i32 = arith.constant 0 : i32
    %c0_i32_0 = arith.constant 0 : i32
    %c0_i32_1 = arith.constant 0 : i32
    return %c0_i32, %c0_i32_0 : i32, i32
  }
  func.func @transform_7(%arg0: i32, %arg1: i32) -> (i32, i32) {
    %c0_i32 = arith.constant 0 : i32
    %c0_i32_0 = arith.constant 0 : i32
    %c0_i32_1 = arith.constant 0 : i32
    return %c0_i32, %c0_i32_0 : i32, i32
  }
  func.func @transform_8(%arg0: i32, %arg1: i32) -> (i32, i32) {
    %c0_i32 = arith.constant 0 : i32
    %c0_i32_0 = arith.constant 0 : i32
    %c0_i32_1 = arith.constant 0 : i32
    return %c0_i32, %c0_i32_0 : i32, i32
  }
  func.func @transform_9(%arg0: i32, %arg1: i32) -> (i32, i32) {
    %c0_i32 = arith.constant 0 : i32
    %c0_i32_0 = arith.constant 0 : i32
    %c0_i32_1 = arith.constant 0 : i32
    return %c0_i32, %c0_i32_0 : i32, i32
  }
  func.func @transform_10(%arg0: i32, %arg1: i32) -> (i32, i32) {
    %c0_i32 = arith.constant 0 : i32
    %c0_i32_0 = arith.constant 0 : i32
    %c0_i32_1 = arith.constant 0 : i32
    return %c0_i32, %c0_i32_0 : i32, i32
  }
  func.func @transform_11(%arg0: i32, %arg1: i32) -> (i32, i32) {
    %c0_i32 = arith.constant 0 : i32
    %c0_i32_0 = arith.constant 0 : i32
    %c0_i32_1 = arith.constant 0 : i32
    return %c0_i32, %c0_i32_0 : i32, i32
  }
  func.func @transform_12(%arg0: i32, %arg1: i32) -> (i32, i32) {
    %c0_i32 = arith.constant 0 : i32
    %c0_i32_0 = arith.constant 0 : i32
    %c0_i32_1 = arith.constant 0 : i32
    return %c0_i32, %c0_i32_0 : i32, i32
  }
  func.func @transform_13(%arg0: i32, %arg1: i32) -> (i32, i32, i32) {
    %c0_i32 = arith.constant 0 : i32
    %c0_i32_0 = arith.constant 0 : i32
    return %arg0, %c0_i32, %arg1 : i32, i32, i32
  }
}

</mosaic_0001>

<bundles_post_ra>
// kernel: feature_classifier_forward.1
= control target key start
LH: loop header
LB: loop body
LE: loop exit
PB: predicated region body
PF: predicated region fallthrough
CT: control target
= control target key end

     0   :  { %s3752_s25 = smov 0   ;;  %s3754_s26 = smov 0   ;;  %s5694_s0 = inlined_call_operand.vmem [shape: f32[2,100,256], index: 0, kind: input, shape index: {}]   ;;  %s5695_s1 = inlined_call_operand.vmem [shape: bf16[512,100], index: 1, kind: input, shape index: {}]   ;;  %s5696_s2 = inlined_call_operand.vmem [shape: f32[512,1], index: 2, kind: input, shape index: {}]   ;;  %s5697_s3 = inlined_call_operand.vmem [shape: bf16[128,512], index: 3, kind: input, shape index: {}]   ;;  %s5698_s4 = inlined_call_operand.vmem [shape: f32[128,1], index: 4, kind: input, shape index: {}]   ;;  %s5699_s5 = inlined_call_operand.vmem [shape: bf16[56,128], index: 5, kind: input, shape index: {}]   ;;  %s5700_s6 = inlined_call_operand.vmem [shape: f32[56,1], index: 6, kind: input, shape index: {}]   ;;  %s5701_s7 = inlined_call_operand.vmem [shape: bf16[32,56], index: 7, kind: input, shape index: {}]   ;;  %s5702_s8 = inlined_call_operand.vmem [shape: f32[32,1], index: 8, kind: input, shape index: {}]   ;;  %s5703_s9 = inlined_call_operand.vmem [shape: bf16[20,32], index: 9, kind: input, shape index: {}]   ;;  %s5704_s10 = inlined_call_operand.vmem [shape: f32[20,1], index: 10, kind: input, shape index: {}]   ;;  %s5705_s11 = inlined_call_operand.vmem [shape: bf16[21,20], index: 11, kind: input, shape index: {}]   ;;  %s5706_s12 = inlined_call_operand.vmem [shape: f32[21,1], index: 12, kind: input, shape index: {}]   ;;  %s5707_s13 = inlined_call_operand.vmem [shape: f32[2,21,256], index: 13, kind: output, shape index: {}]  }
   0x1   :  { %s3756_s27 = smov 0  }
   0x2 LB: > { %s35_s28 = sadd.s32 1, %s3675_s26  ;;  %p3187_p0 = scmp.ge.s32.totalorder %s3679_s27, 1  ;;  %s3679_s27 = sphi %s3756_s27, %s23_s27   ;;  %s3675_s26 = sphi %s3754_s26, %s5954_s26   ;;  %s3671_s25 = sphi %s3752_s25, %s5953_s25  }
   0x3   : > { %p37_p1 = scmp.ge.s32.totalorder %s35_s28, 2  ;;  %p408_p2 = scmp.lt.s32.totalorder %s3679_s27, 3 }
   0x5   : > { %s5956_s28 = smov (%p37_p1, %s35_s28), 0  ;;  %p409_p3 = pnand %p3187_p0, %p408_p2 }
   0x7   : > { %412 = sbr.rel (%p409_p3) target bundleno = 1939 (0x793), region = 72 }
   0xc   : > { %v615_v0 = vld [vmem:[%s5696_s2 + $0xf0] sm:$0xff]  ;;  %p461_p4 = scmp.lt.s32.totalorder %s3671_s25, 1  ;;  %v3681_v2 = vmov 0   ;;  %v597_v3 = vld [vmem:[%s5696_s2 + $0x60] sm:$0xff]  ;;  %v616_v4 = vld [vmem:[%s5696_s2 + $0xf8] sm:$0xff]  ;;  %vm1226_vm0 = vcmask 1041408  }
   0xd   : > { %v599_v1 = vld [vmem:[%s5696_s2 + $0x70] sm:$0xff]  ;;  %3655 = vset.pattern.permute.xlu1 %v3681_v2  ;;  %3654 = vset.pattern.permute.xlu0 %v3681_v2  ;;  %v600_v5 = vld [vmem:[%s5696_s2 + $0x78] sm:$0xff]  ;;  %v598_v14 = vld [vmem:[%s5696_s2 + $0x68] sm:$0xff]  ;;  %vm1129_vm1 = vcmask 818176   ;;  %vm2859_vm2 = vcmask 1043456   ;;  %vm2852_vm3 = vcmask 457728  }
   0xe   : > { %801 = vperm.xlu1 %3655, %v615_v0   ;;  %721 = vperm.xlu0 %3654, %v599_v1   ;;  %s5958_s25 = smov (!%p461_p4, %s3671_s25), 1  ;;  %v614_v23 = vld [vmem:[%s5696_s2 + $0xe8] sm:$0xff]  ;;  %v613_v24 = vld [vmem:[%s5696_s2 + $0xe0] sm:$0xff]  ;;  %v595_v31 = vld [vmem:[%s5696_s2 + $0x50] sm:$0xff]  ;;  %vm2953_vm4 = vcmask 261120   ;;  %vm3041_vm5 = vcmask 162816  }
   0xf   : > { %3656 = vset.pattern.permute.xlu2 %v3681_v2  ;;  %s3627_s18 = smul.u32 208, %s5958_s25  ;;  %v611_v38 = vld [vmem:[%s5696_s2 + $0xd0] sm:$0xff]  ;;  %v596_v39 = vld [vmem:[%s5696_s2 + $0x58] sm:$0xff]  ;;  %v594_v53 = vld [vmem:[%s5696_s2 + $0x48] sm:$0xff] }
  0x10   : > { %711 = vperm.xlu2 %3656, %v597_v3   ;;  %v612_v46 = vld [vmem:[%s5696_s2 + $0xd8] sm:$0xff]  ;;  %v593_v54 = vld [vmem:[%s5696_s2 + $0x40] sm:$0xff]  ;;  %v610_v59 = vld [vmem:[%s5696_s2 + $0xc8] sm:$0xff]  ;;  %s3628_s20 = smul.u32 48, %s5958_s25 }
  0x11   : > { %s3791_s29 = scalar_lea.vmem %s5694_s0, %s3627_s18  ;;  %v609_v57 = vld [vmem:[%s5696_s2 + $0xc0] sm:$0xff]  ;;  %v591_v60 = vld [vmem:[%s5696_s2 + $0x30] sm:$0xff]  ;;  %v592_v61 = vld [vmem:[%s5696_s2 + $0x38] sm:$0xff] }
  0x12   : > { %v505_v6 = vld [vmem:[%s3791_s29 + $0xc0] sm:$0xf]  ;;  %v506_v7 = vld [vmem:[%s3791_s29 + $0xc8] sm:$0xf]  ;;  %v503_v11 = vld [vmem:[%s3791_s29 + $0xb0] sm:$0xff]  ;;  %s5669_s22 = scalar_lea.vmem %s5707_s13, %s3628_s20 }
  0x13   : > { %v501_v8 = vld [vmem:[%s3791_s29 + $0xa0] sm:$0xff]  ;;  %v519_v9 = vpack.c.bf16 %v505_v6, %v505_v6  ;;  %v520_v10 = vpack.c.bf16 %v506_v7, %v506_v7  ;;  %v502_v12 = vld [vmem:[%s3791_s29 + $0xa8] sm:$0xff]  ;;  %v504_v13 = vld [vmem:[%s3791_s29 + $0xb8] sm:$0xff] }
  0x14   : > { %v517_v17 = vpack.c.bf16 %v503_v11, %v501_v8  ;;  %v518_v18 = vpack.c.bf16 %v504_v13, %v502_v12  ;;  %v497_v19 = vld [vmem:[%s3791_s29 + $0x80] sm:$0xff]  ;;  %v499_v20 = vld [vmem:[%s3791_s29 + $0x90] sm:$0xff]  ;;  %v498_v21 = vld [vmem:[%s3791_s29 + $0x88] sm:$0xff] }
  0x15   : > { %v1228_v15 = vsel %vm1226_vm0, %v519_v9, 0  ;;  %v1231_v16 = vsel %vm1226_vm0, %v520_v10, 0  ;;  %v500_v22 = vld [vmem:[%s3791_s29 + $0x98] sm:$0xff]  ;;  %v515_v25 = vpack.c.bf16 %v499_v20, %v497_v19  ;;  %v493_v27 = vld [vmem:[%s3791_s29 + $0x60] sm:$0xff]  ;;  %v495_v28 = vld [vmem:[%s3791_s29 + $0x70] sm:$0xff] }
  0x16   : > { %806 = vperm.xlu1 %3655, %v616_v4   ;;  %726 = vperm.xlu0 %3654, %v600_v5   ;;  %v516_v26 = vpack.c.bf16 %v500_v22, %v498_v21  ;;  %v494_v29 = vld [vmem:[%s3791_s29 + $0x68] sm:$0xff]  ;;  %v496_v30 = vld [vmem:[%s3791_s29 + $0x78] sm:$0xff]  ;;  %v513_v32 = vpack.c.bf16 %v495_v28, %v493_v27  ;;  %v489_v34 = vld [vmem:[%s3791_s29 + $0x40] sm:$0xff] }
  0x17   : > { %1234 = vmatpush.bf16.msra.mxu0 %v1228_v15  ;;  %1403 = vmatpush.bf16.msra.mxu1 %v1231_v16  ;;  %v514_v33 = vpack.c.bf16 %v496_v30, %v494_v29  ;;  %v491_v35 = vld [vmem:[%s3791_s29 + $0x50] sm:$0xff]  ;;  %v490_v36 = vld [vmem:[%s3791_s29 + $0x48] sm:$0xff]  ;;  %v492_v37 = vld [vmem:[%s3791_s29 + $0x58] sm:$0xff] }
  0x18   : > { %716 = vperm.xlu2 %3656, %v598_v14   ;;  %v511_v40 = vpack.c.bf16 %v491_v35, %v489_v34  ;;  %v512_v41 = vpack.c.bf16 %v492_v37, %v490_v36  ;;  %v485_v42 = vld [vmem:[%s3791_s29 + $0x20] sm:$0xff]  ;;  %v487_v43 = vld [vmem:[%s3791_s29 + $0x30] sm:$0xff]  ;;  %v486_v44 = vld [vmem:[%s3791_s29 + $0x28] sm:$0xff] }
  0x19   : > { %v488_v45 = vld [vmem:[%s3791_s29 + $0x38] sm:$0xff]  ;;  %v509_v47 = vpack.c.bf16 %v487_v43, %v485_v42  ;;  %v481_v49 = vld [vmem:[%s3791_s29] sm:$0xff]  ;;  %v483_v50 = vld [vmem:[%s3791_s29 + $0x10] sm:$0xff] }
  0x1a   : > { %v510_v48 = vpack.c.bf16 %v488_v45, %v486_v44  ;;  %v482_v51 = vld [vmem:[%s3791_s29 + $0x8] sm:$0xff]  ;;  %v484_v52 = vld [vmem:[%s3791_s29 + $0x18] sm:$0xff]  ;;  %v507_v55 = vpack.c.bf16 %v483_v50, %v481_v49  ;;  %v3552_v58 = vld [vmem:[%s5695_s1] sm:$0xff] }
  0x1b   : > { %1235 = vmatpush.bf16.msra.mxu0 %v517_v17  ;;  %1404 = vmatpush.bf16.msra.mxu1 %v518_v18  ;;  %v508_v56 = vpack.c.bf16 %v484_v52, %v482_v51  ;;  %v607_v62 = vld [vmem:[%s5696_s2 + $0xb0] sm:$0xff]  ;;  %v608_v63 = vld [vmem:[%s5696_s2 + $0xb8] sm:$0xff]  ;;  %v589_v0 = vld [vmem:[%s5696_s2 + $0x20] sm:$0xff] }
  0x1c   : > { %v3553_v1 = vld [vmem:[%s5695_s1 + $0x8] sm:$0xff]  ;;  %v605_v2 = vld [vmem:[%s5696_s2 + $0xa0] sm:$0xff]  ;;  %v588_v5 = vld [vmem:[%s5696_s2 + $0x18] sm:$0xff] }
  0x1d   : > { %v590_v3 = vld [vmem:[%s5696_s2 + $0x28] sm:$0xff]  ;;  %v587_v6 = vld [vmem:[%s5696_s2 + $0x10] sm:$0xff]  ;;  %v585_v9 = vld [vmem:[%s5696_s2] sm:$0xff] }
  0x1e   : > { %796 = vperm.xlu1 %3655, %v614_v23   ;;  %791 = vperm.xlu0 %3654, %v613_v24   ;;  %v606_v4 = vld [vmem:[%s5696_s2 + $0xa8] sm:$0xff]  ;;  %v603_v7 = vld [vmem:[%s5696_s2 + $0x90] sm:$0xff]  ;;  %v3555_v11 = vld [vmem:[%s5695_s1 + $0x18] sm:$0xff] }
  0x1f   : > { %1236 = vmatpush.bf16.msra.mxu0 %v515_v25  ;;  %1405 = vmatpush.bf16.msra.mxu1 %v516_v26  ;;  %v3554_v8 = vld [vmem:[%s5695_s1 + $0x10] sm:$0xff]  ;;  %v586_v10 = vld [vmem:[%s5696_s2 + $0x8] sm:$0xff]  ;;  %v3556_v13 = vld [vmem:[%s5695_s1 + $0x20] sm:$0xff] }
  0x20   : > { %701 = vperm.xlu2 %3656, %v595_v31   ;;  %v3557_v16 = vld [vmem:[%s5695_s1 + $0x28] sm:$0xff]  ;;  %v3558_v23 = vld [vmem:[%s5695_s1 + $0x30] sm:$0xff]  ;;  %v604_v26 = vld [vmem:[%s5696_s2 + $0x98] sm:$0xff] }
  0x21   : > { %v601_v30 = vld [vmem:[%s5696_s2 + $0x80] sm:$0xff]  ;;  %v3559_v31 = vld [vmem:[%s5695_s1 + $0x38] sm:$0xff]  ;;  %v602_v35 = vld [vmem:[%s5696_s2 + $0x88] sm:$0xff] }
  0x22   : > { %v632_v49 = vld [vmem:[%s5696_s2 + $0x178] sm:$0xff]  ;;  %v3561_v50 = vld [vmem:[%s5695_s1 + $0x48] sm:$0xff] }
  0x23   : > { %1237 = vmatpush.bf16.msra.mxu0 %v513_v32  ;;  %1406 = vmatpush.bf16.msra.mxu1 %v514_v33 }
  0x26   : > { %781 = vperm.xlu1 %3655, %v611_v38   ;;  %706 = vperm.xlu0 %3654, %v596_v39   ;;  %v3560_v39 = vld [vmem:[%s5695_s1 + $0x40] sm:$0xff] }
  0x27   : > { %1238 = vmatpush.bf16.msra.mxu0 %v511_v40  ;;  %1407 = vmatpush.bf16.msra.mxu1 %v512_v41 }
  0x28   : > { %786 = vperm.xlu2 %3656, %v612_v46  }
  0x2b   : > { %1239 = vmatpush.bf16.msra.mxu0 %v509_v47  ;;  %1408 = vmatpush.bf16.msra.mxu1 %v510_v48 }
  0x2e   : > { %696 = vperm.xlu1 %3655, %v594_v53   ;;  %691 = vperm.xlu0 %3654, %v593_v54   ;;  %v629_v54 = vld [vmem:[%s5696_s2 + $0x160] sm:$0xff] }
  0x2f   : > { %1240 = vmatpush.bf16.msra.mxu0 %v507_v55  ;;  %1409 = vmatpush.bf16.msra.mxu1 %v508_v56  ;;  %v647_v55 = vld [vmem:[%s5696_s2 + $0x1f0] sm:$0xff] }
  0x30   : > { %771 = vperm.xlu2 %3656, %v609_v57  }
  0x32   : > { %3318 = vmatmul.msk.bf16.vlgmr.msra.gmra.mxu0 %vm1129_vm1, %v3552_v58  ;;  %3350 = vmatmul.msk.bf16.vlgmr.msra.gmra.mxu1 %vm1129_vm1, %v3552_v58 }
  0x36   : > { %776 = vperm.xlu0 %3654, %v610_v59   ;;  %681 = vperm.xlu1 %3655, %v591_v60  }
  0x38   : > { %686 = vperm.xlu2 %3656, %v592_v61  }
  0x3e   : > { %761 = vperm.xlu0 %3654, %v607_v62   ;;  %766 = vperm.xlu1 %3655, %v608_v63  }
  0x40   : > { %671 = vperm.xlu2 %3656, %v589_v0  }
  0x42   : > { %3319 = vmatmul.msk.bf16.gmra.mxu0 %vm1129_vm1, %v3553_v1  ;;  %3351 = vmatmul.msk.bf16.gmra.mxu1 %vm1129_vm1, %v3553_v1 }
  0x46   : > { %751 = vperm.xlu1 %3655, %v605_v2   ;;  %676 = vperm.xlu0 %3654, %v590_v3   ;;  %v646_v2 = vld [vmem:[%s5696_s2 + $0x1e8] sm:$0xff] }
  0x47   : > { %v630_v3 = vld [vmem:[%s5696_s2 + $0x168] sm:$0xff] }
  0x48   : > { %756 = vperm.xlu2 %3656, %v606_v4  }
  0x4e   : > { %666 = vperm.xlu1 %3655, %v588_v5   ;;  %661 = vperm.xlu0 %3654, %v587_v6  }
  0x50   : > { %741 = vperm.xlu2 %3656, %v603_v7  }
  0x52   : > { %3320 = vmatmul.msk.bf16.gmra.mxu0 %vm1129_vm1, %v3554_v8  ;;  %3352 = vmatmul.msk.bf16.gmra.mxu1 %vm1129_vm1, %v3554_v8 }
  0x56   : > { %651 = vperm.xlu1 %3655, %v585_v9   ;;  %746 = vperm.xlu0 %3654, %v604_v26  }
  0x58   : > { %656 = vperm.xlu2 %3656, %v586_v10  }
  0x5e   : > { %731 = vperm.xlu0 %3654, %v601_v30   ;;  %736 = vperm.xlu1 %3655, %v602_v35   ;;  %v643_v35 = vld [vmem:[%s5696_s2 + $0x1d0] sm:$0xff] }
  0x62   : > { %3321 = vmatmul.msk.bf16.gmra.mxu0 %vm1129_vm1, %v3555_v11  ;;  %3353 = vmatmul.msk.bf16.gmra.mxu1 %vm1129_vm1, %v3555_v11 }
  0x66   : > { %886 = vperm.xlu0 %3654, %v632_v49   ;;  %961 = vperm.xlu1 %3655, %v647_v55   ;;  %v626_v55 = vld [vmem:[%s5696_s2 + $0x148] sm:$0xff] }
  0x6a   : > { %v3913_v12 = vpop.permute.xlu2 %711 }
  0x6b   : > { %5773 = vst [vmem:[#allocation2_spill] sm:$0xff] %v3913_v12 }
  0x6e   : > { %871 = vperm.xlu0 %3654, %v629_v54   ;;  %876 = vperm.xlu1 %3655, %v630_v3  }
  0x72   : > { %3322 = vmatmul.msk.bf16.gmra.mxu0 %vm1129_vm1, %v3556_v13  ;;  %3354 = vmatmul.msk.bf16.gmra.mxu1 %vm1129_vm1, %v3556_v13  ;;  %v3920_v14 = vpop.permute.xlu2 %716  ;;  %v3562_v13 = vld [vmem:[%s5695_s1 + $0x50] sm:$0xff] }
  0x73   : > { %5774 = vst [vmem:[#allocation3_spill] sm:$0xff] %v3920_v14 }
  0x76   : > { %956 = vperm.xlu0 %3654, %v646_v2  }
  0x7a   : > { %v3922_v15 = vpop.permute.xlu2 %701 }
  0x7e   : > { %941 = vperm.xlu0 %3654, %v643_v35   ;;  %v628_v35 = vld [vmem:[%s5696_s2 + $0x158] sm:$0xff] }
  0x80   : > { %v3927_v17 = vpop.permute.xlu1 %801  ;;  %v3929_v18 = vpop.permute.xlu0 %721 }
  0x82   : > { %3323 = vmatmul.msk.bf16.gmra.mxu0 %vm1129_vm1, %v3557_v16  ;;  %3355 = vmatmul.msk.bf16.gmra.mxu1 %vm1129_vm1, %v3557_v16  ;;  %v3933_v19 = vpop.permute.xlu2 %786 }
  0x86   : > { %856 = vperm.xlu0 %3654, %v626_v55   ;;  %v625_v55 = vld [vmem:[%s5696_s2 + $0x140] sm:$0xff] }
  0x88   : > { %v3935_v20 = vpop.permute.xlu1 %806  ;;  %v3937_v21 = vpop.permute.xlu0 %726 }
  0x8a   : > { %v3939_v22 = vpop.permute.xlu2 %771 }
  0x90   : > { %v3944_v24 = vpop.permute.xlu1 %796  ;;  %v3946_v25 = vpop.permute.xlu0 %791 }
  0x91   : > { %5775 = vst [vmem:[#allocation4_spill] sm:$0xff] %v3944_v24 }
  0x92   : > { %3324 = vmatmul.msk.bf16.gmra.mxu0 %vm1129_vm1, %v3558_v23  ;;  %3356 = vmatmul.msk.bf16.gmra.mxu1 %vm1129_vm1, %v3558_v23  ;;  %v3953_v27 = vpop.permute.xlu2 %686 }
  0x98   : > { %v3955_v28 = vpop.permute.xlu1 %781  ;;  %v3957_v29 = vpop.permute.xlu0 %706 }
  0x9a   : > { %v3969_v34 = vpop.permute.xlu2 %671 }
  0xa0   : > { %v3965_v32 = vpop.permute.xlu1 %696  ;;  %v3967_v33 = vpop.permute.xlu0 %691 }
  0xa2   : > { %3325 = vmatmul.msk.bf16.gmra.mxu0 %vm1129_vm1, %v3559_v31  ;;  %3357 = vmatmul.msk.bf16.gmra.mxu1 %vm1129_vm1, %v3559_v31  ;;  %v3980_v38 = vpop.permute.xlu2 %756 }
  0xa3   : > { %5776 = vst [vmem:[#allocation5_spill] sm:$0xff] %v3980_v38 }
  0xa8   : > { %v3976_v36 = vpop.permute.xlu0 %776  ;;  %v3978_v37 = vpop.permute.xlu1 %681 }
  0xaa   : > { %v3993_v44 = vpop.permute.xlu2 %741 }
  0xaf   : > { %v1242_v40 = vpop.f32.mrf.mxu0  ;;  %v3985_v41 = vpop.f32.mrf.mxu1 }
  0xb0   : > { %v3987_v42 = vpop.permute.xlu0 %761  ;;  %v3989_v43 = vpop.permute.xlu1 %766 }
  0xb1   : > { %5777 = vst [vmem:[#allocation6_spill] sm:$0xff] %v3987_v42 }
  0xb2   : > { %5778 = vst [vmem:[#allocation7_spill] sm:$0xff] %v3989_v43  ;;  %3326 = vmatmul.msk.bf16.gmra.mxu0 %vm1129_vm1, %v3560_v39  ;;  %3358 = vmatmul.msk.bf16.gmra.mxu1 %vm1129_vm1, %v3560_v39  ;;  %v4015_v57 = vpop.permute.xlu2 %656  ;;  %v627_v39 = vld [vmem:[%s5696_s2 + $0x150] sm:$0xff] }
  0xb3   : > { %861 = vperm.xlu1 %3655, %v627_v39  }
  0xb7   : > { %v1244_v45 = vpop.f32.mrf.mxu0  ;;  %v3995_v46 = vpop.f32.mrf.mxu1 }
  0xb8   : > { %v3997_v47 = vpop.permute.xlu1 %751  ;;  %v677_v48 = vpop.permute.xlu0 %676  ;;  %v1245_v59 = vadd.f32 %v1244_v45, %v4015_v57  ;;  %v631_v45 = vld [vmem:[%s5696_s2 + $0x170] sm:$0xff] }
  0xb9   : > { %881 = vperm.xlu2 %3656, %v631_v45  }
  0xba   : > { %v1573_v4 = vmul.f32 0.01, %v1245_v59 }
  0xbc   : > { %v1701_v11 = vmax.f32 %v1245_v59, %v1573_v4  ;;  %v623_v4 = vld [vmem:[%s5696_s2 + $0x130] sm:$0xff] }
  0xbd   : > { %841 = vperm.xlu0 %3654, %v623_v4   ;;  %v617_v4 = vld [vmem:[%s5696_s2 + $0x100] sm:$0xff] }
  0xbf   : > { %v1247_v51 = vpop.f32.mrf.mxu0  ;;  %v4005_v52 = vpop.f32.mrf.mxu1 }
  0xc0   : > { %v667_v53 = vpop.permute.xlu1 %666  ;;  %v4013_v56 = vpop.permute.xlu0 %661 }
  0xc1   : > { %v1248_v58 = vadd.f32 %v1247_v51, %v4013_v56 }
  0xc2   : > { %3327 = vmatmul.msk.bf16.gmra.mxu0 %vm1129_vm1, %v3561_v50  ;;  %3359 = vmatmul.msk.bf16.gmra.mxu1 %vm1129_vm1, %v3561_v50 }
  0xc3   : > { %v1575_v62 = vmul.f32 0.01, %v1248_v58 }
  0xc5   : > { %v1703_v8 = vmax.f32 %v1248_v58, %v1575_v62  ;;  %v644_v58 = vld [vmem:[%s5696_s2 + $0x1d8] sm:$0xff] }
  0xc6   : > { %946 = vperm.xlu1 %3655, %v644_v58  }
  0xc7   : > { %v1249_v60 = vpop.f32.mrf.mxu0  ;;  %v1418_v61 = vpop.f32.mrf.mxu1 }
  0xc8   : > { %v1250_v63 = vadd.f32 %v1249_v60, %v667_v53  ;;  %v4021_v0 = vadd.f32 %v1418_v61, %v667_v53  ;;  %v4023_v1 = vpop.permute.xlu1 %651  ;;  %v648_v60 = vld [vmem:[%s5696_s2 + $0x1f8] sm:$0xff] }
  0xc9   : > { %v1243_v5 = vadd.f32 %v1242_v40, %v4023_v1  ;;  %966 = vperm.xlu2 %3656, %v648_v60   ;;  %v638_v60 = vld [vmem:[%s5696_s2 + $0x1a8] sm:$0xff] }
  0xca   : > { %v1577_v6 = vmul.f32 0.01, %v1250_v63 }
  0xcb   : > { %v1571_v7 = vmul.f32 0.01, %v1243_v5 }
  0xcc   : > { %v1705_v9 = vmax.f32 %v1250_v63, %v1577_v6 }
  0xcd   : > { %v1699_v10 = vmax.f32 %v1243_v5, %v1571_v7  ;;  %v641_v5 = vld [vmem:[%s5696_s2 + $0x1c0] sm:$0xff] }
  0xce   : > { %v4035_v16 = vpack.c.bf16 %v1705_v9, %v1703_v8  ;;  %931 = vperm.xlu1 %3655, %v641_v5   ;;  %v645_v7 = vld [vmem:[%s5696_s2 + $0x1e0] sm:$0xff]  ;;  %v635_v5 = vld [vmem:[%s5696_s2 + $0x190] sm:$0xff] }
  0xcf   : > { %v1252_v23 = vpop.f32.mrf.mxu0  ;;  %v1421_v26 = vpop.f32.mrf.mxu1  ;;  %v4037_v30 = vpack.c.bf16 %v1701_v11, %v1699_v10 }
  0xd0   : > { %v4040_v31 = vadd.f32 %v1421_v26, %v3969_v34  ;;  %v1253_v40 = vadd.f32 %v1252_v23, %v3969_v34  ;;  %v624_v23 = vld [vmem:[%s5696_s2 + $0x138] sm:$0xff] }
  0xd1   : > { %951 = vperm.xlu2 %3656, %v645_v7  }
  0xd2   : > { %3328 = vmatmul.msk.bf16.gmra.mxu0 %vm1129_vm1, %v3562_v13  ;;  %3360 = vmatmul.msk.bf16.gmra.mxu1 %vm1129_vm1, %v3562_v13  ;;  %v1579_v51 = vmul.f32 0.01, %v1253_v40  ;;  %v640_v13 = vld [vmem:[%s5696_s2 + $0x1b8] sm:$0xff] }
  0xd3   : > { %926 = vperm.xlu0 %3654, %v640_v13   ;;  %v3566_v13 = vld [vmem:[%s5695_s1 + $0x70] sm:$0xff] }
  0xd4   : > { %v1707_v59 = vmax.f32 %v1253_v40, %v1579_v51  ;;  %v3564_v40 = vld [vmem:[%s5695_s1 + $0x60] sm:$0xff] }
  0xd5   : > { %v637_v51 = vld [vmem:[%s5696_s2 + $0x1a0] sm:$0xff] }
  0xd6   : > { %846 = vperm.xlu1 %3655, %v624_v23   ;;  %v622_v23 = vld [vmem:[%s5696_s2 + $0x128] sm:$0xff] }
  0xd7   : > { %v1254_v49 = vpop.f32.mrf.mxu0  ;;  %v1423_v50 = vpop.f32.mrf.mxu1 }
  0xd8   : > { %v1255_v53 = vadd.f32 %v1254_v49, %v677_v48  ;;  %v4054_v54 = vadd.f32 %v1423_v50, %v677_v48  ;;  %v3563_v48 = vld [vmem:[%s5695_s1 + $0x58] sm:$0xff] }
  0xd9   : > { %866 = vperm.xlu2 %3656, %v628_v35   ;;  %v1935_v35 = vld [vmem:[%s5698_s4 + $0x60] sm:$0xff] }
  0xda   : > { %v1581_v34 = vmul.f32 0.01, %v1255_v53 }
  0xdb   : > { %911 = vperm.xlu0 %3654, %v637_v51  }
  0xdc   : > { %v1709_v61 = vmax.f32 %v1255_v53, %v1581_v34  ;;  %v621_v53 = vld [vmem:[%s5696_s2 + $0x120] sm:$0xff] }
  0xde   : > { %v4068_v62 = vpack.c.bf16 %v1709_v61, %v1707_v59  ;;  %831 = vperm.xlu1 %3655, %v621_v53   ;;  %v620_v59 = vld [vmem:[%s5696_s2 + $0x118] sm:$0xff]  ;;  %v642_v61 = vld [vmem:[%s5696_s2 + $0x1c8] sm:$0xff] }
  0xdf   : > { %v1257_v63 = vpop.f32.mrf.mxu0  ;;  %v1426_v2 = vpop.f32.mrf.mxu1 }
  0xe0   : > { %v4071_v3 = vadd.f32 %v1426_v2, %v3978_v37  ;;  %v1258_v6 = vadd.f32 %v1257_v63, %v3978_v37 }
  0xe1   : > { %851 = vperm.xlu2 %3656, %v625_v55   ;;  %v1934_v55 = vld [vmem:[%s5698_s4 + $0x58] sm:$0xff] }
  0xe2   : > { %3329 = vmatmul.msk.bf16.gmra.mxu0 %vm1129_vm1, %v3563_v48  ;;  %3361 = vmatmul.msk.bf16.gmra.mxu1 %vm1129_vm1, %v3563_v48  ;;  %v1583_v10 = vmul.f32 0.01, %v1258_v6  ;;  %v3565_v48 = vld [vmem:[%s5695_s1 + $0x68] sm:$0xff] }
  0xe3   : > { %826 = vperm.xlu0 %3654, %v620_v59   ;;  %v1936_v59 = vld [vmem:[%s5698_s4 + $0x68] sm:$0xff] }
  0xe4   : > { %v1711_v26 = vmax.f32 %v1258_v6, %v1583_v10  ;;  %v639_v6 = vld [vmem:[%s5696_s2 + $0x1b0] sm:$0xff]  ;;  %v634_v10 = vld [vmem:[%s5696_s2 + $0x188] sm:$0xff] }
  0xe6   : > { %916 = vperm.xlu1 %3655, %v638_v60   ;;  %v636_v60 = vld [vmem:[%s5696_s2 + $0x198] sm:$0xff] }
  0xe7   : > { %v1259_v8 = vpop.f32.mrf.mxu0  ;;  %v4085_v9 = vpop.f32.mrf.mxu1 }
  0xe8   : > { %v1260_v11 = vadd.f32 %v1259_v8, %v3953_v27 }
  0xe9   : > { %936 = vperm.xlu2 %3656, %v642_v61   ;;  %v3567_v61 = vld [vmem:[%s5695_s1 + $0x78] sm:$0xff] }
  0xea   : > { %v1585_v37 = vmul.f32 0.01, %v1260_v11 }
  0xeb   : > { %811 = vperm.xlu0 %3654, %v617_v4  }
  0xec   : > { %v1713_v39 = vmax.f32 %v1260_v11, %v1585_v37  ;;  %v618_v11 = vld [vmem:[%s5696_s2 + $0x108] sm:$0xff] }
  0xee   : > { %v4100_v45 = vpack.c.bf16 %v1713_v39, %v1711_v26  ;;  %901 = vperm.xlu1 %3655, %v635_v5   ;;  %v1937_v39 = vld [vmem:[%s5698_s4 + $0x70] sm:$0xff] }
  0xef   : > { %v4102_v49 = vpop.f32.mrf.mxu0  ;;  %v4104_v50 = vpop.f32.mrf.mxu1  ;;  %v1929_v5 = vld [vmem:[%s5698_s4 + $0x30] sm:$0xff] }
  0xf1   : > { %921 = vperm.xlu2 %3656, %v639_v6   ;;  %v1931_v6 = vld [vmem:[%s5698_s4 + $0x40] sm:$0xff] }
  0xf2   : > { %3330 = vmatmul.msk.bf16.gmra.mxu0 %vm1129_vm1, %v3564_v40  ;;  %3362 = vmatmul.msk.bf16.gmra.mxu1 %vm1129_vm1, %v3564_v40  ;;  %v619_v40 = vld [vmem:[%s5696_s2 + $0x110] sm:$0xff] }
  0xf3   : > { %896 = vperm.xlu0 %3654, %v634_v10  }
  0xf6   : > { %816 = vperm.xlu1 %3655, %v618_v11  }
  0xf7   : > { %v4117_v58 = vpop.f32.mrf.mxu0  ;;  %v4119_v34 = vpop.f32.mrf.mxu1 }
  0xf9   : > { %836 = vperm.xlu2 %3656, %v622_v23   ;;  %v633_v23 = vld [vmem:[%s5696_s2 + $0x180] sm:$0xff] }
  0xfb   : > { %2001 = vperm.xlu0 %3654, %v1935_v35  }
  0xfe   : > { %2011 = vperm.xlu1 %3655, %v1937_v39  }
  0xff   : > { %v4133_v63 = vpop.f32.mrf.mxu0  ;;  %v4135_v2 = vpop.f32.mrf.mxu1 }
 0x101   : > { %821 = vperm.xlu2 %3656, %v619_v40  }
 0x102   : > { %3331 = vmatmul.msk.bf16.gmra.mxu0 %vm1129_vm1, %v3565_v48  ;;  %3363 = vmatmul.msk.bf16.gmra.mxu1 %vm1129_vm1, %v3565_v48 }
 0x103   : > { %1996 = vperm.xlu0 %3654, %v1934_v55  }
 0x106   : > { %2006 = vperm.xlu1 %3655, %v1936_v59  }
 0x107   : > { %v1269_v7 = vpop.f32.mrf.mxu0  ;;  %v4148_v8 = vpop.f32.mrf.mxu1 }
 0x109   : > { %906 = vperm.xlu2 %3656, %v636_v60  }
 0x10b   : > { %1971 = vperm.xlu0 %3654, %v1929_v5  }
 0x10e   : > { %1981 = vperm.xlu1 %3655, %v1931_v6  }
 0x10f   : > { %v1272_v37 = vpop.f32.mrf.mxu0  ;;  %v4162_v26 = vpop.f32.mrf.mxu1 }
 0x110   : > { %5779 = vst [vmem:[#allocation8_spill] sm:$0xff] %v4162_v26  ;;  %v1273_v59 = vadd.f32 %v1272_v37, %v3913_v12  ;;  %v1938_v26 = vld [vmem:[%s5698_s4 + $0x78] sm:$0xff] }
 0x111   : > { %891 = vperm.xlu2 %3656, %v633_v23  }
 0x112   : > { %3332 = vmatmul.msk.bf16.gmra.mxu0 %vm1129_vm1, %v3566_v13  ;;  %3364 = vmatmul.msk.bf16.gmra.mxu1 %vm1129_vm1, %v3566_v13  ;;  %v4199_v13 = vpop.permute.xlu0 %746 }
 0x117   : > { %v1274_v51 = vpop.f32.mrf.mxu0  ;;  %v4175_v53 = vpop.f32.mrf.mxu1 }
 0x118   : > { %5780 = vst [vmem:[#allocation9_spill] sm:$0xff] %v4175_v53  ;;  %v1275_v35 = vadd.f32 %v1274_v51, %v3920_v14  ;;  %v1270_v51 = vadd.f32 %v1269_v7, %v3957_v29  ;;  %v1265_v7 = vadd.f32 %v4117_v58, %v3965_v32  ;;  %v1925_v58 = vld [vmem:[%s5698_s4 + $0x10] sm:$0xff] }
 0x119   : > { %2016 = vperm.xlu2 %3656, %v1938_v26  }
 0x11a   : > { %v1597_v5 = vmul.f32 0.01, %v1275_v35 }
 0x11c   : > { %v1725_v12 = vmax.f32 %v1275_v35, %v1597_v5 }
 0x11f   : > { %v1277_v48 = vpop.f32.mrf.mxu0  ;;  %v1446_v4 = vpop.f32.mrf.mxu1 }
 0x120   : > { %v1447_v10 = vadd.f32 %v1446_v4, %v3929_v18  ;;  %v1278_v11 = vadd.f32 %v1277_v48, %v3929_v18  ;;  %v1928_v18 = vld [vmem:[%s5698_s4 + $0x28] sm:$0xff]  ;;  %v1930_v48 = vld [vmem:[%s5698_s4 + $0x38] sm:$0xff] }
 0x121   : > { %1966 = vperm.xlu0 %3654, %v1928_v18   ;;  %1976 = vperm.xlu1 %3655, %v1930_v48   ;;  %v1593_v18 = vmul.f32 0.01, %v1270_v51 }
 0x122   : > { %3333 = vmatmul.msk.bf16.gmra.mxu0 %vm1129_vm1, %v3567_v61  ;;  %3365 = vmatmul.msk.bf16.gmra.mxu1 %vm1129_vm1, %v3567_v61  ;;  %v1600_v39 = vmul.f32 0.01, %v1447_v10  ;;  %v1599_v60 = vmul.f32 0.01, %v1278_v11 }
 0x123   : > { %v1721_v26 = vmax.f32 %v1270_v51, %v1593_v18  ;;  %v1924_v51 = vld [vmem:[%s5698_s4 + $0x8] sm:$0xff] }
 0x124   : > { %v1728_v6 = vmax.f32 %v1447_v10, %v1600_v39  ;;  %v1727_v53 = vmax.f32 %v1278_v11, %v1599_v60  ;;  %v732_v10 = vpop.permute.xlu0 %731  ;;  %v1263_v60 = vadd.f32 %v4102_v49, %v3967_v33 }
 0x126   : > { %v1587_v35 = vmul.f32 0.01, %v1263_v60 }
 0x127   : > { %v1279_v40 = vpop.f32.mrf.mxu0  ;;  %v1448_v55 = vpop.f32.mrf.mxu1 }
 0x128   : > { %v1280_v4 = vadd.f32 %v1279_v40, %v3937_v21  ;;  %v1449_v61 = vadd.f32 %v1448_v55, %v3937_v21  ;;  %v1268_v40 = vadd.f32 %v4133_v63, %v3922_v15  ;;  %v1595_v21 = vmul.f32 0.01, %v1273_v59  ;;  %v3568_v63 = vld [vmem:[%s5695_s1 + $0x80] sm:$0xff] }
 0x129   : > { %1951 = vperm.xlu1 %3655, %v1925_v58   ;;  %v1715_v58 = vmax.f32 %v1263_v60, %v1587_v35  ;;  %v3569_v60 = vld [vmem:[%s5695_s1 + $0x88] sm:$0xff] }
 0x12a   : > { %v1601_v37 = vmul.f32 0.01, %v1280_v4  ;;  %v1602_v23 = vmul.f32 0.01, %v1449_v61 }
 0x12c   : > { %v1730_v55 = vmax.f32 %v1449_v61, %v1602_v23  ;;  %v1729_v14 = vmax.f32 %v1280_v4, %v1601_v37  ;;  %v1591_v4 = vmul.f32 0.01, %v1268_v40  ;;  %v1723_v37 = vmax.f32 %v1273_v59, %v1595_v21  ;;  %v737_v21 = vpop.permute.xlu1 %736 }
 0x12e   : > { %v4222_v48 = vpack.c.bf16 %v1730_v55, %v1728_v6  ;;  %v1841_v39 = vpack.c.bf16 %v1729_v14, %v1727_v53  ;;  %v1923_v14 = vld [vmem:[%s5698_s4] sm:$0xff]  ;;  %v1589_v53 = vmul.f32 0.01, %v1265_v7  ;;  %v1839_v49 = vpack.c.bf16 %v1725_v12, %v1723_v37  ;;  %v1933_v6 = vld [vmem:[%s5698_s4 + $0x50] sm:$0xff] }
 0x12f   : > { %v1282_v61 = vpop.f32.mrf.mxu0  ;;  %v1451_v11 = vpop.f32.mrf.mxu1  ;;  %1941 = vperm.xlu0 %3654, %v1923_v14   ;;  %v1719_v59 = vmax.f32 %v1268_v40, %v1591_v4  ;;  %1991 = vperm.xlu2 %3656, %v1933_v6   ;;  %v2662_v12 = vld [vmem:[%s5700_s6 + $0x20] sm:$0xff] }
 0x130   : > { %5781 = vst [vmem:[#allocation10_spill] sm:$0xff] %v4222_v48  ;;  %v4229_v23 = vadd.f32 %v1451_v11, %v732_v10  ;;  %2179 = vmatpush.bf16.msra.mxu2 %v1841_v39  ;;  %v1283_v5 = vadd.f32 %v1282_v61, %v732_v10  ;;  %v1717_v39 = vmax.f32 %v1265_v7, %v1589_v53  ;;  %v1932_v10 = vld [vmem:[%s5698_s4 + $0x48] sm:$0xff] }
 0x131   : > { %v1837_v55 = vpack.c.bf16 %v1721_v26, %v1719_v59  ;;  %1946 = vperm.xlu1 %3655, %v1924_v51   ;;  %v3384_v59 = vld [vmem:[%s5697_s3] sm:$0xf] }
 0x132   : > { %5782 = vst [vmem:[#allocation11_spill] sm:$0xff] %v4229_v23  ;;  %3334 = vmatmul.msk.bf16.gmra.mxu0 %vm1129_vm1, %v3568_v63  ;;  %3366 = vmatmul.msk.bf16.gmra.mxu1 %vm1129_vm1, %v3568_v63  ;;  %v1603_v48 = vmul.f32 0.01, %v1283_v5  ;;  %v1835_v7 = vpack.c.bf16 %v1717_v39, %v1715_v58  ;;  %v2658_v39 = vld [vmem:[%s5700_s6] sm:$0xff] }
 0x134   : > { %2180 = vmatpush.bf16.msra.mxu2 %v1839_v49  ;;  %v1731_v18 = vmax.f32 %v1283_v5, %v1603_v48  ;;  %v2661_v48 = vld [vmem:[%s5700_s6 + $0x18] sm:$0xff] }
 0x137   : > { %v1284_v11 = vpop.f32.mrf.mxu0  ;;  %v1453_v14 = vpop.f32.mrf.mxu1  ;;  %2687 = vperm.xlu0 %3654, %v2662_v12   ;;  %1986 = vperm.xlu2 %3656, %v1932_v10   ;;  %v3570_v12 = vld [vmem:[%s5695_s1 + $0x90] sm:$0xff] }
 0x138   : > { %v1285_v23 = vadd.f32 %v1284_v11, %v737_v21  ;;  %v4242_v63 = vadd.f32 %v1453_v14, %v737_v21  ;;  %2181 = vmatpush.bf16.msra.mxu2 %v1837_v55  ;;  %v2820_v55 = vld [vmem:[%s5702_s8 + $0x10] sm:$0xff] }
 0x13a   : > { %v1605_v40 = vmul.f32 0.01, %v1285_v23 }
 0x13c   : > { %2182 = vmatpush.bf16.msra.mxu2 %v1835_v7  ;;  %v1733_v61 = vmax.f32 %v1285_v23, %v1605_v40  ;;  %v2663_v23 = vld [vmem:[%s5700_s6 + $0x28] sm:$0xff] }
 0x13d   : > { %2692 = vperm.xlu1 %3655, %v2663_v23   ;;  %v3590_v23 = vld [vmem:[%s5697_s3 + $0x2c] sm:$0xf0] }
 0x13e   : > { %v4256_v4 = vpack.c.bf16 %v1733_v61, %v1731_v18  ;;  %v2821_v18 = vld [vmem:[%s5702_s8 + $0x18] sm:$0xff]  ;;  %v2664_v61 = vld [vmem:[%s5700_s6 + $0x30] sm:$0xff] }
 0x13f   : > { %v1287_v37 = vpop.f32.mrf.mxu0  ;;  %v4258_v53 = vpop.f32.mrf.mxu1  ;;  %2682 = vperm.xlu0 %3654, %v2661_v48   ;;  %v3400_v48 = vld [vmem:[%s5697_s3 + $0x20] sm:$0xf] }
 0x140   : > { %2183 = vmatpush.bf16.msra.mxu2 %v4100_v45  ;;  %v1288_v49 = vadd.f32 %v1287_v37, %v3993_v44  ;;  %v1927_v45 = vld [vmem:[%s5698_s4 + $0x20] sm:$0xff] }
 0x141   : > { %1961 = vperm.xlu2 %3656, %v1927_v45  }
 0x142   : > { %3335 = vmatmul.msk.bf16.gmra.mxu0 %vm1129_vm1, %v3569_v60  ;;  %3367 = vmatmul.msk.bf16.gmra.mxu1 %vm1129_vm1, %v3569_v60  ;;  %v1607_v5 = vmul.f32 0.01, %v1288_v49 }
 0x144   : > { %2184 = vmatpush.bf16.msra.mxu2 %v4068_v62  ;;  %v3586_v62 = vld [vmem:[%s5697_s3 + $0xc] sm:$0xf0] }
 0x145   : > { %2667 = vperm.xlu1 %3655, %v2658_v39   ;;  %v4291_v14 = vor.u32 %v3586_v62, %v3384_v59  ;;  %v2929_v59 = vld [vmem:[%s5704_s10 + $0x10] sm:$0xf] }
 0x146   : > { %v2660_v39 = vld [vmem:[%s5700_s6 + $0x10] sm:$0xff] }
 0x147   : > { %v1289_v26 = vpop.f32.mrf.mxu0  ;;  %v1458_v35 = vpop.f32.mrf.mxu1  ;;  %2834 = vperm.xlu0 %3654, %v2820_v55   ;;  %5783 = vst [vmem:[#allocation12_spill] sm:$0xff] %v4291_v14 }
 0x148   : > { %v1290_v6 = vadd.f32 %v1289_v26, %v4199_v13  ;;  %v4279_v21 = vadd.f32 %v1458_v35, %v4199_v13  ;;  %2185 = vmatpush.bf16.msra.mxu2 %v4035_v16  ;;  %v1735_v13 = vmax.f32 %v1288_v49, %v1607_v5  ;;  %v1926_v16 = vld [vmem:[%s5698_s4 + $0x18] sm:$0xff]  ;;  %v4325_v49 = vpop.permute.xlu0 %886  ;;  %v2928_v35 = vld [vmem:[%s5704_s10 + $0x8] sm:$0xff]  ;;  %v4336_v55 = vpop.permute.xlu1 %961 }
 0x149   : > { %1956 = vperm.xlu2 %3656, %v1926_v16   ;;  %5785 = vst [vmem:[#allocation14_spill] sm:$0xff] %v4325_v49 }
 0x14a   : > { %v1609_v11 = vmul.f32 0.01, %v1290_v6  ;;  %5787 = vst [vmem:[#allocation16_spill] sm:$0xff] %v4336_v55  ;;  %v1414_v55 = vadd.f32 %v3995_v46, %v4015_v57 }
 0x14c   : > { %2186 = vmatpush.bf16.msra.mxu2 %v4037_v30  ;;  %v1737_v58 = vmax.f32 %v1290_v6, %v1609_v11  ;;  %v2819_v30 = vld [vmem:[%s5702_s8 + $0x8] sm:$0xff]  ;;  %v4334_v6 = vor.u32 %v3590_v23, %v3400_v48 }
 0x14d   : > { %2839 = vperm.xlu1 %3655, %v2821_v18  }
 0x14e   : > { %v4300_v51 = vpack.c.bf16 %v1737_v58, %v1735_v13  ;;  %5786 = vst [vmem:[#allocation15_spill] sm:$0xff] %v4334_v6  ;;  %v3571_v13 = vld [vmem:[%s5695_s1 + $0x98] sm:$0xff] }
 0x14f   : > { %v1292_v40 = vpop.f32.mrf.mxu0  ;;  %v4302_v7 = vpop.f32.mrf.mxu1  ;;  %2187 = vmatmul.bf16.vlgmr.msra.gmra.mxu2 %v4291_v14  ;;  %2829 = vperm.xlu0 %3654, %v2819_v30   ;;  %v3015_v30 = vld [vmem:[%s5706_s12] sm:$0xff] }
 0x150   : > { %v1293_v10 = vadd.f32 %v1292_v40, %v3997_v47  ;;  %v3017_v40 = vld [vmem:[%s5706_s12 + $0x10] sm:$0x1f]  ;;  %v4355_v18 = vpop.permute.xlu0 %871 }
 0x151   : > { %2697 = vperm.xlu2 %3656, %v2664_v61   ;;  %5789 = vst [vmem:[#allocation18_spill] sm:$0xff] %v4355_v18  ;;  %v2659_v61 = vld [vmem:[%s5700_s6 + $0x8] sm:$0xff] }
 0x152   : > { %3336 = vmatmul.msk.bf16.gmra.mxu0 %vm1129_vm1, %v3570_v12  ;;  %3368 = vmatmul.msk.bf16.gmra.mxu1 %vm1129_vm1, %v3570_v12  ;;  %v1611_v45 = vmul.f32 0.01, %v1293_v10 }
 0x154   : > { %v1739_v62 = vmax.f32 %v1293_v10, %v1611_v45 }
 0x155   : > { %2942 = vperm.xlu1 %3655, %v2929_v59   ;;  %v3594_v59 = vld [vmem:[%s5697_s3 + $0x4c] sm:$0xf0] }
 0x157   : > { %v1294_v60 = vpop.f32.mrf.mxu0  ;;  %v4317_v37 = vpop.f32.mrf.mxu1  ;;  %2937 = vperm.xlu0 %3654, %v2928_v35   ;;  %v3416_v35 = vld [vmem:[%s5697_s3 + $0x40] sm:$0xf] }
 0x158   : > { %5784 = vst [vmem:[#allocation13_spill] sm:$0xff] %v4317_v37  ;;  %v1295_v26 = vadd.f32 %v1294_v60, %v3980_v38  ;;  %v4363_v60 = vpop.permute.xlu1 %876 }
 0x159   : > { %2677 = vperm.xlu2 %3656, %v2660_v39   ;;  %5790 = vst [vmem:[#allocation19_spill] sm:$0xff] %v4363_v60  ;;  %v4376_v39 = vpop.permute.xlu0 %956 }
 0x15a   : > { %v1613_v5 = vmul.f32 0.01, %v1295_v26  ;;  %5793 = vst [vmem:[#allocation22_spill] sm:$0xff] %v4376_v39 }
 0x15c   : > { %v1741_v11 = vmax.f32 %v1295_v26, %v1613_v5 }
 0x15d   : > { %3020 = vperm.xlu1 %3655, %v3015_v30  }
 0x15e   : > { %v4344_v16 = vpack.c.bf16 %v1741_v11, %v1739_v62  ;;  %v4374_v62 = vor.u32 %v3594_v59, %v3416_v35 }
 0x15f   : > { %v1297_v58 = vpop.f32.mrf.mxu0  ;;  %v4346_v12 = vpop.f32.mrf.mxu1  ;;  %2192 = vmatmul.bf16.gmra.mxu2 %v4334_v6  ;;  %3030 = vperm.xlu0 %3654, %v3017_v40   ;;  %v3572_v40 = vld [vmem:[%s5695_s1 + $0xa0] sm:$0xff]  ;;  %v3016_v6 = vld [vmem:[%s5706_s12 + $0x8] sm:$0xff] }
 0x160   : > { %5788 = vst [vmem:[#allocation17_spill] sm:$0xff] %v4346_v12  ;;  %v1298_v10 = vadd.f32 %v1297_v58, %v3987_v42  ;;  %v4391_v35 = vpop.permute.xlu1 %861 }
 0x161   : > { %2672 = vperm.xlu2 %3656, %v2659_v61   ;;  %5792 = vst [vmem:[#allocation21_spill] sm:$0xff] %v4374_v62 }
 0x162   : > { %3337 = vmatmul.msk.bf16.gmra.mxu0 %vm1129_vm1, %v3571_v13  ;;  %3369 = vmatmul.msk.bf16.gmra.mxu1 %vm1129_vm1, %v3571_v13  ;;  %v1615_v45 = vmul.f32 0.01, %v1298_v10  ;;  %v2818_v13 = vld [vmem:[%s5702_s8] sm:$0xff]  ;;  %5794 = vst [vmem:[#allocation23_spill] sm:$0xff] %v4391_v35 }
 0x164   : > { %v1743_v11 = vmax.f32 %v1298_v10, %v1615_v45  ;;  %v4393_v10 = vpop.permute.xlu2 %881  ;;  %v2927_v45 = vld [vmem:[%s5704_s10] sm:$0xff] }
 0x165   : > { %5795 = vst [vmem:[#allocation24_spill] sm:$0xff] %v4393_v10 }
 0x167   : > { %v1299_v48 = vpop.f32.mrf.mxu0  ;;  %v4365_v23 = vpop.f32.mrf.mxu1 }
 0x168   : > { %5791 = vst [vmem:[#allocation20_spill] sm:$0xff] %v4365_v23  ;;  %v1300_v26 = vadd.f32 %v1299_v48, %v3989_v43 }
 0x169   : > { %2824 = vperm.xlu2 %3656, %v2818_v13   ;;  %v3598_v13 = vld [vmem:[%s5697_s3 + $0x6c] sm:$0xf0] }
 0x16a   : > { %v1617_v5 = vmul.f32 0.01, %v1300_v26 }
 0x16c   : > { %v1745_v58 = vmax.f32 %v1300_v26, %v1617_v5  ;;  %v4400_v26 = vpop.permute.xlu0 %941 }
 0x16d   : > { %5796 = vst [vmem:[#allocation25_spill] sm:$0xff] %v4400_v26 }
 0x16e   : > { %v4384_v30 = vpack.c.bf16 %v1745_v58, %v1743_v11  ;;  %v3432_v11 = vld [vmem:[%s5697_s3 + $0x60] sm:$0xf]  ;;  %v4412_v58 = vpop.permute.xlu1 %946 }
 0x16f   : > { %v4386_v61 = vpop.f32.mrf.mxu0  ;;  %v4388_v48 = vpop.f32.mrf.mxu1  ;;  %2197 = vmatmul.bf16.gmra.mxu2 %v4374_v62  ;;  %5797 = vst [vmem:[#allocation26_spill] sm:$0xff] %v4412_v58 }
 0x170   : > { %v4416_v62 = vpop.permute.xlu2 %966 }
 0x171   : > { %2932 = vperm.xlu2 %3656, %v2927_v45   ;;  %5799 = vst [vmem:[#allocation28_spill] sm:$0xff] %v4416_v62  ;;  %v3573_v45 = vld [vmem:[%s5695_s1 + $0xa8] sm:$0xff] }
 0x172   : > { %3338 = vmatmul.msk.bf16.gmra.mxu0 %vm1129_vm1, %v3572_v40  ;;  %3370 = vmatmul.msk.bf16.gmra.mxu1 %vm1129_vm1, %v3572_v40  ;;  %v4414_v40 = vor.u32 %v3598_v13, %v3432_v11 }
 0x174   : > { %5798 = vst [vmem:[#allocation27_spill] sm:$0xff] %v4414_v40  ;;  %v4429_v58 = vpop.permute.xlu0 %856 }
 0x175   : > { %5800 = vst [vmem:[#allocation29_spill] sm:$0xff] %v4429_v58  ;;  %v1574_v58 = vmul.f32 0.01, %v1414_v55 }
 0x176   : > { %v4433_v11 = vpop.permute.xlu1 %931 }
 0x177   : > { %v4402_v59 = vpop.f32.mrf.mxu0  ;;  %v4404_v5 = vpop.f32.mrf.mxu1  ;;  %5801 = vst [vmem:[#allocation30_spill] sm:$0xff] %v4433_v11 }
 0x178   : > { %v4435_v13 = vpop.permute.xlu2 %951 }
 0x179   : > { %3025 = vperm.xlu2 %3656, %v3016_v6   ;;  %5802 = vst [vmem:[#allocation31_spill] sm:$0xff] %v4435_v13  ;;  %v3448_v6 = vld [vmem:[%s5697_s3 + $0x80] sm:$0xf] }
 0x17c   : > { %v4449_v11 = vpop.permute.xlu0 %841 }
 0x17d   : > { %5803 = vst [vmem:[#allocation32_spill] sm:$0xff] %v4449_v11  ;;  %v1417_v11 = vadd.f32 %v4005_v52, %v4013_v56  ;;  %v3575_v52 = vld [vmem:[%s5695_s1 + $0xb8] sm:$0xff] }
 0x17e   : > { %v4453_v49 = vpop.permute.xlu1 %846 }
 0x17f   : > { %v4424_v14 = vpop.f32.mrf.mxu0  ;;  %v4426_v26 = vpop.f32.mrf.mxu1  ;;  %2202 = vmatmul.bf16.gmra.mxu2 %v4414_v40  ;;  %v1412_v40 = vadd.f32 %v3985_v41, %v4023_v1  ;;  %5805 = vst [vmem:[#allocation34_spill] sm:$0xff] %v4453_v49  ;;  %v3574_v41 = vld [vmem:[%s5695_s1 + $0xb0] sm:$0xff]  ;;  %v1702_v1 = vmax.f32 %v1414_v55, %v1574_v58  ;;  %v3464_v55 = vld [vmem:[%s5697_s3 + $0xa0] sm:$0xf] }
 0x180   : > { %v4461_v60 = vpop.permute.xlu2 %866 }
 0x181   : > { %v1572_v35 = vmul.f32 0.01, %v1412_v40  ;;  %5806 = vst [vmem:[#allocation35_spill] sm:$0xff] %v4461_v60 }
 0x182   : > { %3339 = vmatmul.msk.bf16.gmra.mxu0 %vm1129_vm1, %v3573_v45  ;;  %3371 = vmatmul.msk.bf16.gmra.mxu1 %vm1129_vm1, %v3573_v45  ;;  %v3602_v45 = vld [vmem:[%s5697_s3 + $0x8c] sm:$0xf0] }
 0x183   : > { %v4451_v13 = vor.u32 %v3602_v45, %v3448_v6  ;;  %v1700_v18 = vmax.f32 %v1412_v40, %v1572_v35  ;;  %v3606_v35 = vld [vmem:[%s5697_s3 + $0xac] sm:$0xf0]  ;;  %v1576_v40 = vmul.f32 0.01, %v1417_v11 }
 0x184   : > { %v4465_v6 = vpop.permute.xlu0 %926 }
 0x185   : > { %5804 = vst [vmem:[#allocation33_spill] sm:$0xff] %v4451_v13  ;;  %v4467_v45 = vpack.c.bf16 %v1702_v1, %v1700_v18  ;;  %v4483_v18 = vor.u32 %v3606_v35, %v3464_v55 }
 0x186   : > { %5807 = vst [vmem:[#allocation36_spill] sm:$0xff] %v4465_v6  ;;  %v4473_v23 = vpop.permute.xlu1 %831 }
 0x187   : > { %v1309_v62 = vpop.f32.mrf.mxu0  ;;  %v4437_v39 = vpop.f32.mrf.mxu1  ;;  %5808 = vst [vmem:[#allocation37_spill] sm:$0xff] %v4467_v45  ;;  %v1704_v45 = vmax.f32 %v1417_v11, %v1576_v40 }
 0x188   : > { %5810 = vst [vmem:[#allocation39_spill] sm:$0xff] %v4473_v23  ;;  %v4481_v58 = vpop.permute.xlu2 %851 }
 0x189   : > { %5811 = vst [vmem:[#allocation40_spill] sm:$0xff] %v4481_v58 }
 0x18a   : > { %5812 = vst [vmem:[#allocation41_spill] sm:$0xff] %v4483_v18 }
 0x18c   : > { %v4486_v1 = vpop.permute.xlu0 %911 }
 0x18d   : > { %5813 = vst [vmem:[#allocation42_spill] sm:$0xff] %v4486_v1 }
 0x18e   : > { %v4493_v60 = vpop.permute.xlu1 %916 }
 0x18f   : > { %v1312_v46 = vpop.f32.mrf.mxu0  ;;  %v4458_v57 = vpop.f32.mrf.mxu1  ;;  %2207 = vmatmul.bf16.gmra.mxu2 %v4451_v13  ;;  %5814 = vst [vmem:[#allocation43_spill] sm:$0xff] %v4493_v60 }
 0x190   : > { %v4498_v35 = vpop.permute.xlu2 %936 }
 0x191   : > { %5815 = vst [vmem:[#allocation44_spill] sm:$0xff] %v4498_v35 }
 0x192   : > { %3340 = vmatmul.msk.bf16.gmra.mxu0 %vm1129_vm1, %v3574_v41  ;;  %3372 = vmatmul.msk.bf16.gmra.mxu1 %vm1129_vm1, %v3574_v41  ;;  %v1578_v41 = vmul.f32 0.01, %v4021_v0 }
 0x194   : > { %v1706_v6 = vmax.f32 %v4021_v0, %v1578_v41  ;;  %v1313_v0 = vadd.f32 %v1312_v46, %v3946_v25 }
 0x196   : > { %v4501_v58 = vpack.c.bf16 %v1706_v6, %v1704_v45  ;;  %v4514_v6 = vpop.permute.xlu0 %826  ;;  %v1627_v43 = vmul.f32 0.01, %v1313_v0  ;;  %v4522_v12 = vpop.permute.xlu1 %901 }
 0x197   : > { %v1314_v10 = vpop.f32.mrf.mxu0  ;;  %v4469_v49 = vpop.f32.mrf.mxu1  ;;  %5818 = vst [vmem:[#allocation47_spill] sm:$0xff] %v4522_v12 }
 0x198   : > { %5809 = vst [vmem:[#allocation38_spill] sm:$0xff] %v4469_v49  ;;  %v1315_v23 = vadd.f32 %v1314_v10, %v3944_v24  ;;  %v1310_v10 = vadd.f32 %v1309_v62, %v3933_v19 }
 0x199   : > { %5816 = vst [vmem:[#allocation45_spill] sm:$0xff] %v4501_v58 }
 0x19a   : > { %v1629_v45 = vmul.f32 0.01, %v1315_v23  ;;  %v1625_v24 = vmul.f32 0.01, %v1310_v10 }
 0x19f   : > { %v1317_v56 = vpop.f32.mrf.mxu0  ;;  %v1486_v13 = vpop.f32.mrf.mxu1  ;;  %2212 = vmatmul.bf16.gmra.mxu2 %v4483_v18 }
 0x1a0   : > { %v1487_v55 = vadd.f32 %v1486_v13, %v3927_v17  ;;  %v1318_v1 = vadd.f32 %v1317_v56, %v3927_v17  ;;  %v3610_v17 = vld [vmem:[%s5697_s3 + $0xcc] sm:$0xf0] }
 0x1a2   : > { %3341 = vmatmul.msk.bf16.gmra.mxu0 %vm1129_vm1, %v3575_v52  ;;  %3373 = vmatmul.msk.bf16.gmra.mxu1 %vm1129_vm1, %v3575_v52  ;;  %v1632_v18 = vmul.f32 0.01, %v1487_v55  ;;  %v1631_v41 = vmul.f32 0.01, %v1318_v1  ;;  %v3480_v52 = vld [vmem:[%s5697_s3 + $0xc0] sm:$0xf] }
 0x1a3   : > { %v4520_v58 = vor.u32 %v3610_v17, %v3480_v52  ;;  %v1757_v52 = vmax.f32 %v1315_v23, %v1629_v45 }
 0x1a4   : > { %v1760_v56 = vmax.f32 %v1487_v55, %v1632_v18  ;;  %v1759_v62 = vmax.f32 %v1318_v1, %v1631_v41  ;;  %v1305_v18 = vadd.f32 %v4402_v59, %v3976_v36  ;;  %v4526_v55 = vpop.permute.xlu2 %921  ;;  %v1303_v1 = vadd.f32 %v4386_v61, %v3939_v22  ;;  %v4542_v41 = vpop.permute.xlu0 %811 }
 0x1a5   : > { %5817 = vst [vmem:[#allocation46_spill] sm:$0xff] %v4520_v58  ;;  %v4547_v61 = vpop.permute.xlu1 %816 }
 0x1a6   : > { %5819 = vst [vmem:[#allocation48_spill] sm:$0xff] %v4526_v55 }
 0x1a7   : > { %v1319_v11 = vpop.f32.mrf.mxu0  ;;  %v1488_v40 = vpop.f32.mrf.mxu1 }
 0x1a8   : > { %v1320_v13 = vadd.f32 %v1319_v11, %v3935_v20  ;;  %v1489_v60 = vadd.f32 %v1488_v40, %v3935_v20  ;;  %v1580_v11 = vmul.f32 0.01, %v4040_v31  ;;  %v1582_v20 = vmul.f32 0.01, %v4054_v54 }
 0x1a9   : > { %v1308_v40 = vadd.f32 %v4424_v14, %v3955_v28  ;;  %v3576_v14 = vld [vmem:[%s5695_s1 + $0xc0] sm:$0xff] }
 0x1aa   : > { %v1633_v46 = vmul.f32 0.01, %v1320_v13  ;;  %v1634_v35 = vmul.f32 0.01, %v1489_v60  ;;  %v1708_v17 = vmax.f32 %v4040_v31, %v1580_v11  ;;  %v1710_v59 = vmax.f32 %v4054_v54, %v1582_v20 }
 0x1ab   : > { %v1753_v31 = vmax.f32 %v1310_v10, %v1625_v24  ;;  %v1429_v11 = vadd.f32 %v4085_v9, %v3953_v27  ;;  %v1584_v27 = vmul.f32 0.01, %v4071_v3 }
 0x1ac   : > { %v1762_v42 = vmax.f32 %v1489_v60, %v1634_v35  ;;  %v1761_v49 = vmax.f32 %v1320_v13, %v1633_v46  ;;  %v1755_v35 = vmax.f32 %v1313_v0, %v1627_v43  ;;  %v1619_v13 = vmul.f32 0.01, %v1303_v1 }
 0x1ad   : > { %v4545_v54 = vpack.c.bf16 %v1710_v59, %v1708_v17  ;;  %v1586_v9 = vmul.f32 0.01, %v1429_v11 }
 0x1ae   : > { %v4528_v37 = vpack.c.bf16 %v1762_v42, %v1760_v56  ;;  %v1857_v38 = vpack.c.bf16 %v1761_v49, %v1759_v62  ;;  %v1623_v42 = vmul.f32 0.01, %v1308_v40  ;;  %v1621_v49 = vmul.f32 0.01, %v1305_v18  ;;  %v4560_v62 = vpop.permute.xlu2 %836 }
 0x1af   : > { %v1322_v12 = vpop.f32.mrf.mxu0  ;;  %v4534_v60 = vpop.f32.mrf.mxu1  ;;  %2217 = vmatmul.bf16.gmra.mxu2 %v4520_v58  ;;  %v1855_v23 = vpack.c.bf16 %v1757_v52, %v1755_v35  ;;  %v1747_v24 = vmax.f32 %v1303_v1, %v1619_v13  ;;  %v3577_v1 = vld [vmem:[%s5695_s1 + $0xc8] sm:$0xff]  ;;  %v4572_v35 = vadd.f32 %v4104_v50, %v3967_v33  ;;  %v5822_v33 = vld [vmem:[#allocation2_spill] sm:$0xff]  ;;  %v5823_v50 = vld [vmem:[#allocation8_spill] sm:$0xff] }
 0x1b0   : > { %5820 = vst [vmem:[#allocation49_spill] sm:$0xff] %v4528_v37  ;;  %2228 = vmatpush.bf16.msra.mxu3 %v1857_v38  ;;  %v1751_v45 = vmax.f32 %v1308_v40, %v1623_v42  ;;  %v1323_v56 = vadd.f32 %v1322_v12, %v4542_v41  ;;  %v1749_v38 = vmax.f32 %v1305_v18, %v1621_v49  ;;  %v3496_v12 = vld [vmem:[%s5697_s3 + $0xe0] sm:$0xf]  ;;  %v3614_v40 = vld [vmem:[%s5697_s3 + $0xec] sm:$0xf0] }
 0x1b1   : > { %v4562_v52 = vor.u32 %v3614_v40, %v3496_v12  ;;  %v4576_v49 = vadd.f32 %v4119_v34, %v3965_v32  ;;  %v5824_v32 = vld [vmem:[#allocation3_spill] sm:$0xff]  ;;  %v4626_v12 = vadd.f32 %v4302_v7, %v3997_v47  ;;  %v4681_v47 = vadd.f32 %v4458_v57, %v3946_v25 }
 0x1b2   : > { %3342 = vmatmul.msk.bf16.gmra.mxu0 %vm1129_vm1, %v3576_v14  ;;  %3374 = vmatmul.msk.bf16.gmra.mxu1 %vm1129_vm1, %v3576_v14  ;;  %v1853_v43 = vpack.c.bf16 %v1753_v31, %v1751_v45  ;;  %v1635_v10 = vmul.f32 0.01, %v1323_v56  ;;  %v1851_v14 = vpack.c.bf16 %v1749_v38, %v1747_v24  ;;  %v1712_v45 = vmax.f32 %v4071_v3, %v1584_v27 }
 0x1b3   : > { %5821 = vst [vmem:[#allocation50_spill] sm:$0xff] %v4562_v52  ;;  %v4590_v38 = vadd.f32 %v5823_v50, %v5822_v33  ;;  %v4600_v3 = vmul.f32 0.01, %v4572_v35  ;;  %v4658_v33 = vmul.f32 0.01, %v4279_v21  ;;  %v4665_v50 = vadd.f32 %v4388_v48, %v3939_v22 }
 0x1b4   : > { %2229 = vmatpush.bf16.msra.mxu3 %v1855_v23  ;;  %v1763_v17 = vmax.f32 %v1323_v56, %v1635_v10  ;;  %v4580_v23 = vadd.f32 %v4135_v2, %v3922_v15  ;;  %v1714_v56 = vmax.f32 %v1429_v11, %v1586_v9  ;;  %v5825_v15 = vld [vmem:[#allocation9_spill] sm:$0xff]  ;;  %v1492_v25 = vadd.f32 %v4534_v60, %v4542_v41 }
 0x1b5   : > { %v4595_v34 = vadd.f32 %v5825_v15, %v5824_v32  ;;  %v4669_v32 = vadd.f32 %v4404_v5, %v3976_v36  ;;  %v5837_v55 = vmax.f32 %v4572_v35, %v4600_v3 }
 0x1b6   : > { %v4606_v2 = vmul.f32 0.01, %v4580_v23  ;;  %v4615_v24 = vpack.c.bf16 %v1714_v56, %v1712_v45  ;;  %v4652_v45 = vmul.f32 0.01, %v4242_v63 }
 0x1b7   : > { %v1324_v0 = vpop.f32.mrf.mxu0  ;;  %v4549_v46 = vpop.f32.mrf.mxu1  ;;  %v4618_v10 = vmul.f32 0.01, %v4595_v34  ;;  %v1622_v41 = vmul.f32 0.01, %v4669_v32 }
 0x1b8   : > { %v1325_v20 = vadd.f32 %v1324_v0, %v4547_v61  ;;  %2230 = vmatpush.bf16.msra.mxu3 %v1853_v43  ;;  %v4586_v43 = vadd.f32 %v4148_v8, %v3957_v29  ;;  %v4603_v29 = vmul.f32 0.01, %v4576_v49  ;;  %v822_v8 = vpop.permute.xlu2 %821  ;;  %v4612_v0 = vmul.f32 0.01, %v4590_v38 }
 0x1b9   : > { %v1494_v57 = vadd.f32 %v4549_v46, %v4547_v61 }
 0x1ba   : > { %v1637_v18 = vmul.f32 0.01, %v1325_v20 }
 0x1bc   : > { %2231 = vmatpush.bf16.msra.mxu3 %v1851_v14  ;;  %v1765_v59 = vmax.f32 %v1325_v20, %v1637_v18  ;;  %v4622_v20 = vadd.f32 %v4258_v53, %v3993_v44  ;;  %v5826_v14 = vld [vmem:[#allocation11_spill] sm:$0xff]  ;;  %v5830_v18 = vld [vmem:[#allocation4_spill] sm:$0xff] }
 0x1bd   : > { %v4635_v27 = vmul.f32 0.01, %v5826_v14 }
 0x1be   : > { %v4568_v42 = vpack.c.bf16 %v1765_v59, %v1763_v17  ;;  %v3584_v59 = vld [vmem:[%s5697_s3 + $0x4] sm:$0xf]  ;;  %v4655_v56 = vmul.f32 0.01, %v4622_v20 }
 0x1bf   : > { %v1327_v31 = vpop.f32.mrf.mxu0  ;;  %v1496_v13 = vpop.f32.mrf.mxu1  ;;  %2222 = vmatmul.bf16.gmra.mxu2 %v4562_v52  ;;  %v1732_v60 = vmax.f32 %v5826_v14, %v4635_v27  ;;  %v1636_v27 = vmul.f32 0.01, %v1492_v25 }
 0x1c0   : > { %2232 = vmatpush.bf16.msra.mxu3 %v4384_v30  ;;  %v4609_v30 = vmul.f32 0.01, %v4586_v43  ;;  %v1328_v11 = vadd.f32 %v1327_v31, %v822_v8  ;;  %v4677_v31 = vadd.f32 %v4437_v39, %v3933_v19  ;;  %v1497_v48 = vadd.f32 %v1496_v13, %v822_v8  ;;  %v5831_v19 = vld [vmem:[#allocation38_spill] sm:$0xff]  ;;  %v5833_v13 = vld [vmem:[#allocation17_spill] sm:$0xff] }
 0x1c1   : > { %v1484_v39 = vadd.f32 %v5831_v19, %v5830_v18  ;;  %v5836_v19 = vld [vmem:[#allocation39_spill] sm:$0xff]  ;;  %v1736_v35 = vmax.f32 %v4622_v20, %v4655_v56  ;;  %v5839_v20 = vmax.f32 %v4580_v23, %v4606_v2 }
 0x1c2   : > { %3343 = vmatmul.msk.bf16.gmra.mxu0 %vm1129_vm1, %v3577_v1  ;;  %3375 = vmatmul.msk.bf16.gmra.mxu1 %vm1129_vm1, %v3577_v1  ;;  %v1639_v53 = vmul.f32 0.01, %v1328_v11  ;;  %v3386_v1 = vld [vmem:[%s5697_s3 + $0x10] sm:$0xf0]  ;;  %v1626_v46 = vmul.f32 0.01, %v4677_v31 }
 0x1c3   : > { %v4683_v44 = vor.u32 %v3584_v59, %v3386_v1  ;;  %v1628_v1 = vmul.f32 0.01, %v4681_v47  ;;  %v1630_v14 = vmul.f32 0.01, %v1484_v39 }
 0x1c4   : > { %2233 = vmatpush.bf16.msra.mxu3 %v4344_v16  ;;  %v1767_v22 = vmax.f32 %v1328_v11, %v1639_v53  ;;  %v5828_v16 = vld [vmem:[#allocation5_spill] sm:$0xff]  ;;  %v5832_v11 = vld [vmem:[#allocation6_spill] sm:$0xff]  ;;  %v1620_v53 = vmul.f32 0.01, %v4665_v50 }
 0x1c5   : > { %5827 = vst [vmem:[#allocation2_spill] sm:$0xff] %v4683_v44  ;;  %v1467_v8 = vadd.f32 %v5833_v13, %v5832_v11  ;;  %v1638_v11 = vmul.f32 0.01, %v1494_v57 }
 0x1c6   : > { %v1748_v40 = vmax.f32 %v4665_v50, %v1620_v53  ;;  %v5838_v50 = vmax.f32 %v4576_v49, %v4603_v29  ;;  %v1738_v49 = vmax.f32 %v4279_v21, %v4658_v33  ;;  %v5840_v21 = vmax.f32 %v4586_v43, %v4609_v30 }
 0x1c7   : > { %v1329_v9 = vpop.f32.mrf.mxu0  ;;  %v1498_v17 = vpop.f32.mrf.mxu1 }
 0x1c8   : > { %v1330_v7 = vadd.f32 %v1329_v9, %v4514_v6  ;;  %2234 = vmatpush.bf16.msra.mxu3 %v4300_v51  ;;  %v4661_v51 = vmul.f32 0.01, %v4626_v12  ;;  %v4673_v9 = vadd.f32 %v4426_v26, %v3955_v28  ;;  %v1499_v36 = vadd.f32 %v1498_v17, %v4514_v6  ;;  %v5829_v28 = vld [vmem:[#allocation13_spill] sm:$0xff]  ;;  %v5834_v6 = vld [vmem:[#allocation7_spill] sm:$0xff]  ;;  %v5835_v17 = vld [vmem:[#allocation20_spill] sm:$0xff] }
 0x1c9   : > { %v4689_v26 = vadd.f32 %v5829_v28, %v5828_v16  ;;  %v3578_v16 = vld [vmem:[%s5695_s1 + $0xd0] sm:$0xff]  ;;  %v4731_v53 = vpack.c.bf16 %v5838_v50, %v5837_v55  ;;  %v4755_v56 = vpack.c.bf16 %v5840_v21, %v5839_v20  ;;  %v4773_v43 = vpack.c.bf16 %v1738_v49, %v1736_v35  ;;  %v3600_v21 = vld [vmem:[%s5697_s3 + $0x84] sm:$0xf] }
 0x1ca   : > { %v1641_v15 = vmul.f32 0.01, %v1330_v7  ;;  %v1624_v61 = vmul.f32 0.01, %v4673_v9  ;;  %v1642_v28 = vmul.f32 0.01, %v1499_v36 }
 0x1cb   : > { %v1614_v13 = vmul.f32 0.01, %v4689_v26 }
 0x1cc   : > { %2235 = vmatpush.bf16.msra.mxu3 %v4256_v4  ;;  %v1769_v5 = vmax.f32 %v1330_v7, %v1641_v15  ;;  %v1469_v4 = vadd.f32 %v5835_v17, %v5834_v6  ;;  %v1640_v15 = vmul.f32 0.01, %v1497_v48  ;;  %v1616_v6 = vmul.f32 0.01, %v1467_v8 }
 0x1cd   : > { %v1770_v37 = vmax.f32 %v1499_v36, %v1642_v28  ;;  %v5843_v28 = vmax.f32 %v4595_v34, %v4618_v10  ;;  %v5845_v10 = vld [vmem:[#allocation34_spill] sm:$0xff] }
 0x1ce   : > { %v4705_v7 = vpack.c.bf16 %v1769_v5, %v1767_v22  ;;  %v1734_v5 = vmax.f32 %v4242_v63, %v4652_v45  ;;  %v1618_v17 = vmul.f32 0.01, %v1469_v4  ;;  %v1754_v45 = vmax.f32 %v4677_v31, %v1626_v46 }
 0x1cf   : > { %v1332_v18 = vpop.f32.mrf.mxu0  ;;  %v1501_v59 = vpop.f32.mrf.mxu1  ;;  %2236 = vmatmul.bf16.vlgmr.msra.gmra.mxu3 %v4683_v44  ;;  %v1750_v44 = vmax.f32 %v4669_v32, %v1622_v41  ;;  %v1768_v58 = vmax.f32 %v1497_v48, %v1640_v15  ;;  %v1758_v32 = vmax.f32 %v1484_v39, %v1630_v14  ;;  %v1764_v41 = vmax.f32 %v1492_v25, %v1636_v27 }
 0x1d0   : > { %v1502_v22 = vadd.f32 %v1501_v59, %v5836_v19  ;;  %v1752_v59 = vmax.f32 %v4673_v9, %v1624_v61  ;;  %v1333_v52 = vadd.f32 %v1332_v18, %v5836_v19  ;;  %v1766_v9 = vmax.f32 %v1494_v57, %v1638_v11 }
 0x1d1   : > { %v1740_v61 = vmax.f32 %v4626_v12, %v4661_v51  ;;  %v1742_v31 = vmax.f32 %v4689_v26, %v1614_v13  ;;  %v1744_v48 = vmax.f32 %v1467_v8, %v1616_v6  ;;  %v1746_v36 = vmax.f32 %v1469_v4, %v1618_v17  ;;  %v3588_v12 = vld [vmem:[%s5697_s3 + $0x24] sm:$0xf]  ;;  %v3402_v51 = vld [vmem:[%s5697_s3 + $0x30] sm:$0xf0] }
 0x1d2   : > { %3344 = vmatmul.msk.bf16.gmra.mxu0 %vm1129_vm1, %v3578_v16  ;;  %3376 = vmatmul.msk.bf16.gmra.mxu1 %vm1129_vm1, %v3578_v16  ;;  %v1644_v63 = vmul.f32 0.01, %v1502_v22  ;;  %v1756_v16 = vmax.f32 %v4681_v47, %v1628_v1  ;;  %v1643_v55 = vmul.f32 0.01, %v1333_v52  ;;  %v4757_v33 = vpack.c.bf16 %v1770_v37, %v1768_v58  ;;  %v3592_v17 = vld [vmem:[%s5697_s3 + $0x44] sm:$0xf] }
 0x1d3   : > { %v4759_v26 = vpack.c.bf16 %v1766_v9, %v1764_v41  ;;  %v4763_v57 = vpack.c.bf16 %v1754_v45, %v1752_v59  ;;  %v4765_v8 = vpack.c.bf16 %v1750_v44, %v1748_v40  ;;  %v4767_v18 = vpack.c.bf16 %v1746_v36, %v1744_v48  ;;  %v3579_v40 = vld [vmem:[%s5695_s1 + $0xd8] sm:$0xff]  ;;  %v3418_v59 = vld [vmem:[%s5697_s3 + $0x50] sm:$0xf0] }
 0x1d4   : > { %v1772_v3 = vmax.f32 %v1502_v22, %v1644_v63  ;;  %v4769_v23 = vpack.c.bf16 %v1742_v31, %v1740_v61  ;;  %v4771_v2 = vor.u32 %v3588_v12, %v3402_v51  ;;  %v4775_v37 = vpack.c.bf16 %v1734_v5, %v1732_v60  ;;  %v5844_v5 = vld [vmem:[#allocation32_spill] sm:$0xff]  ;;  %v3580_v61 = vld [vmem:[%s5695_s1 + $0xe0] sm:$0xff] }
 0x1d5   : > { %v1771_v58 = vmax.f32 %v1333_v52, %v1643_v55  ;;  %v5842_v15 = vmax.f32 %v4590_v38, %v4612_v0 }
 0x1d6   : > { %5841 = vst [vmem:[#allocation8_spill] sm:$0xff] %v4771_v2 }
 0x1d7   : > { %v1334_v29 = vpop.f32.mrf.mxu0  ;;  %v1503_v47 = vpop.f32.mrf.mxu1  ;;  %v4788_v19 = vpack.c.bf16 %v5843_v28, %v5842_v15  ;;  %v3604_v28 = vld [vmem:[%s5697_s3 + $0xa4] sm:$0xf] }
 0x1d8   : > { %v1335_v39 = vadd.f32 %v1334_v29, %v4560_v62  ;;  %v1504_v25 = vadd.f32 %v1503_v47, %v4560_v62  ;;  %v4761_v62 = vpack.c.bf16 %v1758_v32, %v1756_v16  ;;  %v4805_v16 = vor.u32 %v3592_v17, %v3418_v59  ;;  %v3434_v29 = vld [vmem:[%s5697_s3 + $0x70] sm:$0xf0]  ;;  %v5852_v59 = vld [vmem:[#allocation18_spill] sm:$0xff] }
 0x1da   : > { %v1645_v4 = vmul.f32 0.01, %v1335_v39  ;;  %v1646_v46 = vmul.f32 0.01, %v1504_v25  ;;  %5846 = vst [vmem:[#allocation3_spill] sm:$0xff] %v4805_v16 }
 0x1dc   : > { %v1774_v30 = vmax.f32 %v1504_v25, %v1646_v46  ;;  %v1773_v1 = vmax.f32 %v1335_v39, %v1645_v4  ;;  %v3581_v39 = vld [vmem:[%s5695_s1 + $0xe8] sm:$0xff]  ;;  %v3450_v4 = vld [vmem:[%s5697_s3 + $0x90] sm:$0xf0] }
 0x1dd   : > { %v4847_v46 = vor.u32 %v3600_v21, %v3450_v4  ;;  %v5856_v4 = vld [vmem:[#allocation23_spill] sm:$0xff] }
 0x1de   : > { %v4780_v44 = vpack.c.bf16 %v1773_v1, %v1771_v58  ;;  %v4790_v22 = vpack.c.bf16 %v1774_v30, %v1772_v3  ;;  %v3596_v3 = vld [vmem:[%s5697_s3 + $0x64] sm:$0xf]  ;;  %v3582_v58 = vld [vmem:[%s5695_s1 + $0xf0] sm:$0xff] }
 0x1df   : > { %v1337_v60 = vpop.f32.mrf.mxu0  ;;  %v1506_v52 = vpop.f32.mrf.mxu1  ;;  %2241 = vmatmul.bf16.gmra.mxu3 %v4771_v2  ;;  %v4829_v47 = vor.u32 %v3596_v3, %v3434_v29  ;;  %5848 = vst [vmem:[#allocation11_spill] sm:$0xff] %v4847_v46 }
 0x1e0   : > { %v1507_v14 = vadd.f32 %v1506_v52, %v5844_v5  ;;  %v1338_v27 = vadd.f32 %v1337_v60, %v5844_v5  ;;  %v3466_v60 = vld [vmem:[%s5697_s3 + $0xb0] sm:$0xf0]  ;;  %v4867_v5 = vpop.permute.xlu0 %896  ;;  %v4909_v2 = vpop.permute.xlu1 %2011 }
 0x1e1   : > { %5847 = vst [vmem:[#allocation9_spill] sm:$0xff] %v4829_v47  ;;  %v4865_v52 = vor.u32 %v3604_v28, %v3466_v60  ;;  %v5857_v60 = vld [vmem:[#allocation29_spill] sm:$0xff] }
 0x1e2   : > { %3345 = vmatmul.msk.bf16.gmra.mxu0 %vm1129_vm1, %v3579_v40  ;;  %3377 = vmatmul.msk.bf16.gmra.mxu1 %vm1129_vm1, %v3579_v40  ;;  %v1648_v38 = vmul.f32 0.01, %v1507_v14  ;;  %v1647_v34 = vmul.f32 0.01, %v1338_v27 }
 0x1e3   : > { %5849 = vst [vmem:[#allocation5_spill] sm:$0xff] %v4865_v52 }
 0x1e4   : > { %v1776_v63 = vmax.f32 %v1507_v14, %v1648_v38  ;;  %v1775_v32 = vmax.f32 %v1338_v27, %v1647_v34  ;;  %v3583_v14 = vld [vmem:[%s5695_s1 + $0xf8] sm:$0xff]  ;;  %v5851_v34 = vld [vmem:[#allocation19_spill] sm:$0xff] }
 0x1e7   : > { %v1339_v0 = vpop.f32.mrf.mxu0  ;;  %v1508_v11 = vpop.f32.mrf.mxu1 }
 0x1e8   : > { %v1340_v13 = vadd.f32 %v1339_v0, %v5845_v10  ;;  %v1509_v6 = vadd.f32 %v1508_v11, %v5845_v10  ;;  %v5850_v0 = vld [vmem:[#allocation24_spill] sm:$0xff]  ;;  %v4881_v17 = vpop.permute.xlu0 %2001 }
 0x1ea   : > { %v1649_v45 = vmul.f32 0.01, %v1340_v13  ;;  %v1650_v50 = vmul.f32 0.01, %v1509_v6 }
 0x1ec   : > { %v1778_v41 = vmax.f32 %v1509_v6, %v1650_v50  ;;  %v1777_v9 = vmax.f32 %v1340_v13, %v1649_v45  ;;  %v5853_v50 = vld [vmem:[#allocation14_spill] sm:$0xff] }
 0x1ee   : > { %v4810_v31 = vpack.c.bf16 %v1777_v9, %v1775_v32  ;;  %v4812_v48 = vpack.c.bf16 %v1778_v41, %v1776_v63  ;;  %v3608_v41 = vld [vmem:[%s5697_s3 + $0xc4] sm:$0xf]  ;;  %v3482_v9 = vld [vmem:[%s5697_s3 + $0xd0] sm:$0xf0] }
 0x1ef   : > { %v4814_v36 = vpop.f32.mrf.mxu0  ;;  %v4816_v35 = vpop.f32.mrf.mxu1  ;;  %2246 = vmatmul.bf16.gmra.mxu3 %v4805_v16  ;;  %v4892_v21 = vor.u32 %v3608_v41, %v3482_v9 }
 0x1f1   : > { %5855 = vst [vmem:[#allocation13_spill] sm:$0xff] %v4892_v21 }
 0x1f2   : > { %3346 = vmatmul.msk.bf16.gmra.mxu0 %vm1129_vm1, %v3580_v61  ;;  %3378 = vmatmul.msk.bf16.gmra.mxu1 %vm1129_vm1, %v3580_v61  ;;  %v5854_v61 = vld [vmem:[#allocation35_spill] sm:$0xff] }
 0x1f7   : > { %v1344_v49 = vpop.f32.mrf.mxu0  ;;  %v4821_v55 = vpop.f32.mrf.mxu1 }
 0x1ff   : > { %v1347_v25 = vpop.f32.mrf.mxu0  ;;  %v4834_v12 = vpop.f32.mrf.mxu1  ;;  %2251 = vmatmul.bf16.gmra.mxu3 %v4829_v47 }
 0x202   : > { %3347 = vmatmul.msk.bf16.gmra.mxu0 %vm1129_vm1, %v3581_v39  ;;  %3379 = vmatmul.msk.bf16.gmra.mxu1 %vm1129_vm1, %v3581_v39 }
 0x207   : > { %v1349_v51 = vpop.f32.mrf.mxu0  ;;  %v4839_v20 = vpop.f32.mrf.mxu1 }
 0x208   : > { %v1350_v3 = vadd.f32 %v1349_v51, %v5854_v61  ;;  %v5859_v51 = vld [vmem:[#allocation40_spill] sm:$0xff] }
 0x209   : > { %v1343_v41 = vadd.f32 %v4814_v36, %v5859_v51 }
 0x20f   : > { %v1352_v30 = vpop.f32.mrf.mxu0  ;;  %v4852_v1 = vpop.f32.mrf.mxu1  ;;  %2256 = vmatmul.bf16.gmra.mxu3 %v4847_v46 }
 0x210   : > { %v1353_v63 = vadd.f32 %v1352_v30, %v5852_v59 }
 0x212   : > { %3348 = vmatmul.msk.bf16.gmra.mxu0 %vm1129_vm1, %v3582_v58  ;;  %3380 = vmatmul.msk.bf16.gmra.mxu1 %vm1129_vm1, %v3582_v58  ;;  %v1348_v58 = vadd.f32 %v1347_v25, %v5856_v4  ;;  %v1659_v30 = vmul.f32 0.01, %v1353_v63  ;;  %v4903_v25 = vpop.permute.xlu0 %1996 }
 0x213   : > { %5860 = vst [vmem:[#allocation38_spill] sm:$0xff] %v4903_v25 }
 0x214   : > { %v1655_v9 = vmul.f32 0.01, %v1348_v58  ;;  %v1787_v16 = vmax.f32 %v1353_v63, %v1659_v30  ;;  %v3612_v63 = vld [vmem:[%s5697_s3 + $0xe4] sm:$0xf] }
 0x217   : > { %v1354_v40 = vpop.f32.mrf.mxu0  ;;  %v4857_v15 = vpop.f32.mrf.mxu1 }
 0x218   : > { %v1355_v10 = vadd.f32 %v1354_v40, %v5851_v34 }
 0x21a   : > { %v1661_v29 = vmul.f32 0.01, %v1355_v10 }
 0x21f   : > { %v1357_v27 = vpop.f32.mrf.mxu0  ;;  %v4872_v38 = vpop.f32.mrf.mxu1  ;;  %2261 = vmatmul.bf16.gmra.mxu3 %v4865_v52  ;;  %v1789_v52 = vmax.f32 %v1355_v10, %v1661_v29  ;;  %v1783_v10 = vmax.f32 %v1348_v58, %v1655_v9  ;;  %v5865_v9 = vld [vmem:[#allocation47_spill] sm:$0xff] }
 0x220   : > { %v1358_v11 = vadd.f32 %v1357_v27, %v5850_v0  ;;  %v1657_v27 = vmul.f32 0.01, %v1350_v3  ;;  %v4919_v58 = vpop.permute.xlu0 %1971 }
 0x221   : > { %5862 = vst [vmem:[#allocation17_spill] sm:$0xff] %v4919_v58 }
 0x222   : > { %3349 = vmatmul.msk.bf16.gmra.mxu0 %vm1129_vm1, %v3583_v14  ;;  %3381 = vmatmul.msk.bf16.gmra.mxu1 %vm1129_vm1, %v3583_v14  ;;  %v1663_v45 = vmul.f32 0.01, %v1358_v11  ;;  %v1345_v14 = vadd.f32 %v1344_v49, %v5857_v60  ;;  %v1871_v49 = vpack.c.bf16 %v1789_v52, %v1787_v16  ;;  %v3498_v16 = vld [vmem:[%s5697_s3 + $0xf0] sm:$0xf0] }
 0x224   : > { %v1791_v40 = vmax.f32 %v1358_v11, %v1663_v45  ;;  %v2188_v11 = vpop.f32.mrf.mxu2  ;;  %v1653_v45 = vmul.f32 0.01, %v1345_v14 }
 0x227   : > { %v1359_v13 = vpop.f32.mrf.mxu0  ;;  %v4879_v6 = vpop.f32.mrf.mxu1 }
 0x228   : > { %v1360_v32 = vadd.f32 %v1359_v13, %v5853_v50 }
 0x22a   : > { %v1665_v39 = vmul.f32 0.01, %v1360_v32 }
 0x22c   : > { %v1793_v28 = vmax.f32 %v1360_v32, %v1665_v39  ;;  %v1785_v32 = vmax.f32 %v1350_v3, %v1657_v27  ;;  %v1651_v39 = vmul.f32 0.01, %v1343_v41  ;;  %v4917_v3 = vor.u32 %v3612_v63, %v3498_v16  ;;  %v4921_v30 = vpop.f32.mrf.mxu2 }
 0x22d   : > { %5863 = vst [vmem:[#allocation7_spill] sm:$0xff] %v4921_v30 }
 0x22e   : > { %v1873_v13 = vpack.c.bf16 %v1793_v28, %v1791_v40  ;;  %v1869_v29 = vpack.c.bf16 %v1785_v32, %v1783_v10  ;;  %v1781_v40 = vmax.f32 %v1345_v14, %v1653_v45  ;;  %v1779_v36 = vmax.f32 %v1343_v41, %v1651_v39  ;;  %5861 = vst [vmem:[#allocation6_spill] sm:$0xff] %v4917_v3  ;;  %v907_v14 = vpop.permute.xlu2 %906  ;;  %v4925_v41 = vpop.permute.xlu1 %2006 }
 0x22f   : > { %v4896_v46 = vpop.f32.mrf.mxu0  ;;  %v4898_v47 = vpop.f32.mrf.mxu1  ;;  %2266 = vmatmul.bf16.gmra.mxu3 %v4892_v21  ;;  %5864 = vst [vmem:[#allocation20_spill] sm:$0xff] %v4925_v41 }
 0x230   : > { %5858 = vst [vmem:[#allocation4_spill] sm:$0xff] %v4898_v47  ;;  %2277 = vmatpush.bf16.msrb.mxu2 %v1873_v13  ;;  %v1867_v52 = vpack.c.bf16 %v1781_v40, %v1779_v36  ;;  %v4930_v32 = vpop.permute.xlu0 %1966  ;;  %v3392_v40 = vld [vmem:[%s5697_s3 + $0x8] sm:$0xf] }
 0x231   : > { %5866 = vst [vmem:[#allocation39_spill] sm:$0xff] %v4930_v32 }
 0x234   : > { %2278 = vmatpush.bf16.msrb.mxu2 %v1871_v49  ;;  %v4932_v39 = vpop.f32.mrf.mxu2 }
 0x236   : > { %v4937_v36 = vpop.permute.xlu2 %891 }
 0x237   : > { %v4905_v28 = vpop.f32.mrf.mxu0  ;;  %v4907_v21 = vpop.f32.mrf.mxu1 }
 0x238   : > { %2279 = vmatpush.bf16.msrb.mxu2 %v1869_v29 }
 0x23c   : > { %2280 = vmatpush.bf16.msrb.mxu2 %v1867_v52 }
 0x23f   : > { %v1367_v27 = vpop.f32.mrf.mxu0  ;;  %v1536_v13 = vpop.f32.mrf.mxu1  ;;  %2271 = vmatmul.bf16.gmra.mxu3 %v4917_v3 }
 0x240   : > { %2281 = vmatpush.bf16.msrb.mxu2 %v4810_v31  ;;  %v1368_v45 = vadd.f32 %v1367_v27, %v5865_v9  ;;  %v1537_v49 = vadd.f32 %v1536_v13, %v5865_v9  ;;  %v4945_v3 = vpop.permute.xlu1 %1981 }
 0x241   : > { %5868 = vst [vmem:[#allocation34_spill] sm:$0xff] %v4945_v3 }
 0x242   : > { %v1671_v31 = vmul.f32 0.01, %v1368_v45  ;;  %v1672_v63 = vmul.f32 0.01, %v1537_v49 }
 0x244   : > { %2282 = vmatpush.bf16.msrb.mxu2 %v4780_v44  ;;  %v3587_v44 = vld [vmem:[%s5697_s3 + $0x14] sm:$0xf0]  ;;  %v1799_v41 = vmax.f32 %v1368_v45, %v1671_v31  ;;  %v1800_v25 = vmax.f32 %v1537_v49, %v1672_v63  ;;  %v4960_v49 = vpop.permute.xlu2 %2016 }
 0x245   : > { %v4943_v9 = vor.u32 %v3587_v44, %v3392_v40  ;;  %v4954_v40 = vpop.permute.xlu0 %1941  ;;  %v4956_v44 = vpop.f32.mrf.mxu2  ;;  %5872 = vst [vmem:[#allocation18_spill] sm:$0xff] %v4960_v49 }
 0x246   : > { %5870 = vst [vmem:[#allocation24_spill] sm:$0xff] %v4954_v40  ;;  %v2189_v45 = vadd.f32 %v2188_v11, %v4954_v40  ;;  %v3408_v11 = vld [vmem:[%s5697_s3 + $0x28] sm:$0xf] }
 0x247   : > { %v1369_v10 = vpop.f32.mrf.mxu0  ;;  %v1538_v29 = vpop.f32.mrf.mxu1  ;;  %5867 = vst [vmem:[#allocation32_spill] sm:$0xff] %v4943_v9 }
 0x248   : > { %v1370_v16 = vadd.f32 %v1369_v10, %v907_v14  ;;  %v1539_v52 = vadd.f32 %v1538_v29, %v907_v14  ;;  %2283 = vmatpush.bf16.msrb.mxu2 %v4705_v7  ;;  %v5869_v10 = vld [vmem:[#allocation10_spill] sm:$0xff]  ;;  %5871 = vst [vmem:[#allocation19_spill] sm:$0xff] %v4956_v44 }
 0x24a   : > { %v1673_v27 = vmul.f32 0.01, %v1370_v16  ;;  %v1674_v13 = vmul.f32 0.01, %v1539_v52 }
 0x24c   : > { %v1801_v32 = vmax.f32 %v1370_v16, %v1673_v27  ;;  %v1802_v30 = vmax.f32 %v1539_v52, %v1674_v13  ;;  %2284 = vmatpush.bf16.msrb.mxu2 %v4568_v42  ;;  %v5875_v27 = vld [vmem:[#allocation43_spill] sm:$0xff] }
 0x24e   : > { %v4949_v14 = vpack.c.bf16 %v1801_v32, %v1799_v41  ;;  %v4951_v7 = vpack.c.bf16 %v1802_v30, %v1800_v25  ;;  %v5873_v41 = vld [vmem:[#allocation42_spill] sm:$0xff]  ;;  %v4967_v32 = vpop.permute.xlu1 %1976 }
 0x24f   : > { %v1372_v29 = vpop.f32.mrf.mxu0  ;;  %v1541_v47 = vpop.f32.mrf.mxu1  ;;  %2285 = vmatmul.bf16.vlgmr.msrb.gmra.mxu2 %v4943_v9  ;;  %5874 = vst [vmem:[#allocation14_spill] sm:$0xff] %v4967_v32 }
 0x250   : > { %2375 = vmatpush.bf16.msra.mxu2 %v5869_v10  ;;  %v1373_v25 = vadd.f32 %v1372_v29, %v5873_v41  ;;  %v1542_v30 = vadd.f32 %v1541_v47, %v5873_v41  ;;  %v3591_v47 = vld [vmem:[%s5697_s3 + $0x34] sm:$0xf0]  ;;  %v1529_v41 = vadd.f32 %v4879_v6, %v5853_v50  ;;  %v1524_v6 = vadd.f32 %v4857_v15, %v5851_v34 }
 0x251   : > { %v4984_v40 = vor.u32 %v3591_v47, %v3408_v11  ;;  %v1519_v15 = vadd.f32 %v4839_v20, %v5854_v61  ;;  %v1517_v20 = vadd.f32 %v4834_v12, %v5856_v4  ;;  %v1514_v61 = vadd.f32 %v4821_v55, %v5857_v60  ;;  %v3595_v12 = vld [vmem:[%s5697_s3 + $0x54] sm:$0xf0] }
 0x252   : > { %v2237_v42 = vpop.f32.mrf.mxu3  ;;  %v1676_v52 = vmul.f32 0.01, %v1542_v30  ;;  %v1666_v50 = vmul.f32 0.01, %v1529_v41  ;;  %v1662_v34 = vmul.f32 0.01, %v1524_v6 }
 0x253   : > { %v4962_v31 = vadd.f32 %v2237_v42, %v2189_v45  ;;  %5877 = vst [vmem:[#allocation23_spill] sm:$0xff] %v4984_v40  ;;  %v5885_v60 = vld [vmem:[#allocation37_spill] sm:$0xff] }
 0x254   : > { %2376 = vmatpush.bf16.msra.mxu2 %v4788_v19  ;;  %v1675_v19 = vmul.f32 0.01, %v1373_v25 }
 0x257   : > { %v1374_v63 = vpop.f32.mrf.mxu0  ;;  %v1543_v16 = vpop.f32.mrf.mxu1 }
 0x258   : > { %2377 = vmatpush.bf16.msra.mxu2 %v4755_v56  ;;  %v1375_v13 = vadd.f32 %v1374_v63, %v5875_v27  ;;  %v1544_v10 = vadd.f32 %v1543_v16, %v5875_v27  ;;  %v4978_v56 = vpop.f32.mrf.mxu2  ;;  %v4986_v63 = vpop.permute.xlu2 %1991  ;;  %v1803_v16 = vmax.f32 %v1373_v25, %v1675_v19  ;;  %v1804_v27 = vmax.f32 %v1542_v30, %v1676_v52  ;;  %v5881_v52 = vld [vmem:[#allocation48_spill] sm:$0xff] }
 0x259   : > { %5878 = vst [vmem:[#allocation29_spill] sm:$0xff] %v4986_v63  ;;  %v4998_v25 = vpop.permute.xlu1 %1951 }
 0x25a   : > { %v1677_v29 = vmul.f32 0.01, %v1375_v13  ;;  %v1678_v45 = vmul.f32 0.01, %v1544_v10  ;;  %v4980_v42 = vpop.f32.mrf.mxu3  ;;  %5879 = vst [vmem:[#allocation40_spill] sm:$0xff] %v4998_v25  ;;  %v2194_v30 = vadd.f32 %v4932_v39, %v4998_v25 }
 0x25b   : > { %5876 = vst [vmem:[#allocation35_spill] sm:$0xff] %v4980_v42 }
 0x25c   : > { %2378 = vmatpush.bf16.msra.mxu2 %v4731_v53  ;;  %v1805_v49 = vmax.f32 %v1375_v13, %v1677_v29  ;;  %v1806_v32 = vmax.f32 %v1544_v10, %v1678_v45  ;;  %v1527_v53 = vadd.f32 %v4872_v38, %v5850_v0  ;;  %v1658_v45 = vmul.f32 0.01, %v1519_v15 }
 0x25e   : > { %v4991_v44 = vpack.c.bf16 %v1805_v49, %v1803_v16  ;;  %v4993_v9 = vpack.c.bf16 %v1806_v32, %v1804_v27  ;;  %v1664_v38 = vmul.f32 0.01, %v1527_v53  ;;  %v1794_v49 = vmax.f32 %v1529_v41, %v1666_v50 }
 0x25f   : > { %v1377_v11 = vpop.f32.mrf.mxu0  ;;  %v1546_v47 = vpop.f32.mrf.mxu1  ;;  %2290 = vmatmul.bf16.gmra.mxu2 %v4984_v40  ;;  %v1790_v41 = vmax.f32 %v1524_v6, %v1662_v34  ;;  %v1656_v6 = vmul.f32 0.01, %v1517_v20 }
 0x260   : > { %2379 = vmatpush.bf16.msra.mxu2 %v4615_v24  ;;  %v1522_v24 = vadd.f32 %v4852_v1, %v5852_v59  ;;  %v5009_v19 = vpop.f32.mrf.mxu2  ;;  %v1378_v13 = vadd.f32 %v1377_v11, %v5881_v52  ;;  %v1547_v39 = vadd.f32 %v1546_v47, %v5881_v52  ;;  %v1512_v1 = vadd.f32 %v4816_v35, %v5859_v51  ;;  %v5016_v29 = vpop.permute.xlu2 %1986  ;;  %v3424_v35 = vld [vmem:[%s5697_s3 + $0x48] sm:$0xf]  ;;  %v5884_v11 = vld [vmem:[#allocation36_spill] sm:$0xff] }
 0x261   : > { %5880 = vst [vmem:[#allocation47_spill] sm:$0xff] %v5009_v19  ;;  %v1792_v10 = vmax.f32 %v1527_v53, %v1664_v38  ;;  %v1786_v52 = vmax.f32 %v1519_v15, %v1658_v45 }
 0x262   : > { %v2242_v0 = vpop.f32.mrf.mxu3  ;;  %v1660_v59 = vmul.f32 0.01, %v1522_v24  ;;  %5883 = vst [vmem:[#allocation10_spill] sm:$0xff] %v5016_v29  ;;  %v1679_v51 = vmul.f32 0.01, %v1378_v13  ;;  %v1784_v29 = vmax.f32 %v1517_v20, %v1656_v6 }
 0x263   : > { %v5007_v32 = vadd.f32 %v2242_v0, %v2194_v30  ;;  %v1874_v16 = vpack.c.bf16 %v1794_v49, %v1792_v10  ;;  %v1680_v53 = vmul.f32 0.01, %v1547_v39  ;;  %v1652_v55 = vmul.f32 0.01, %v1512_v1 }
 0x264   : > { %2380 = vmatpush.bf16.msra.mxu2 %v4545_v54  ;;  %v5882_v54 = vld [vmem:[#allocation45_spill] sm:$0xff]  ;;  %v1788_v4 = vmax.f32 %v1522_v24, %v1660_v59  ;;  %v1654_v49 = vmul.f32 0.01, %v1514_v61 }
 0x265   : > { %v1780_v15 = vmax.f32 %v1512_v1, %v1652_v55  ;;  %v3599_v1 = vld [vmem:[%s5697_s3 + $0x74] sm:$0xf0] }
 0x266   : > { %v1872_v10 = vpack.c.bf16 %v1790_v41, %v1788_v4  ;;  %v1782_v45 = vmax.f32 %v1514_v61, %v1654_v49  ;;  %v1870_v41 = vpack.c.bf16 %v1786_v52, %v1784_v29 }
 0x267   : > { %v1379_v27 = vpop.f32.mrf.mxu0  ;;  %v1548_v50 = vpop.f32.mrf.mxu1 }
 0x268   : > { %2381 = vmatpush.bf16.msra.mxu2 %v5882_v54  ;;  %v1380_v47 = vadd.f32 %v1379_v27, %v5884_v11  ;;  %v1549_v30 = vadd.f32 %v1548_v50, %v5884_v11  ;;  %v5033_v54 = vor.u32 %v3595_v12, %v3424_v35  ;;  %v1807_v27 = vmax.f32 %v1378_v13, %v1679_v51  ;;  %v2203_v19 = vpop.f32.mrf.mxu2 }
 0x269   : > { %v1808_v50 = vmax.f32 %v1547_v39, %v1680_v53  ;;  %v1868_v35 = vpack.c.bf16 %v1782_v45, %v1780_v15  ;;  %v3440_v53 = vld [vmem:[%s5697_s3 + $0x68] sm:$0xf] }
 0x26a   : > { %v1681_v38 = vmul.f32 0.01, %v1380_v47  ;;  %v1682_v0 = vmul.f32 0.01, %v1549_v30  ;;  %v5031_v34 = vpop.f32.mrf.mxu3  ;;  %5887 = vst [vmem:[#allocation43_spill] sm:$0xff] %v5033_v54 }
 0x26b   : > { %5886 = vst [vmem:[#allocation42_spill] sm:$0xff] %v5031_v34  ;;  %v5905_v34 = vld [vmem:[#allocation30_spill] sm:$0xff] }
 0x26c   : > { %2382 = vmatpush.bf16.msra.mxu2 %v5885_v60  ;;  %v1809_v11 = vmax.f32 %v1380_v47, %v1681_v38  ;;  %v1810_v25 = vmax.f32 %v1549_v30, %v1682_v0  ;;  %v2204_v47 = vadd.f32 %v2203_v19, %v4919_v58 }
 0x26e   : > { %v5035_v24 = vpack.c.bf16 %v1809_v11, %v1807_v27  ;;  %v5037_v59 = vpack.c.bf16 %v1810_v25, %v1808_v50  ;;  %v3472_v50 = vld [vmem:[%s5697_s3 + $0xa8] sm:$0xf]  ;;  %v3607_v11 = vld [vmem:[%s5697_s3 + $0xb4] sm:$0xf0] }
 0x26f   : > { %v5039_v60 = vpop.f32.mrf.mxu0  ;;  %2295 = vmatmul.bf16.gmra.mxu2 %v5033_v54  ;;  %v5082_v49 = vpop.f32.mrf.mxu1  ;;  %v5094_v45 = vor.u32 %v3607_v11, %v3472_v50 }
 0x270   : > { %2473 = vmatpush.bf16.msrb.mxu2 %v1874_v16  ;;  %v5042_v16 = vpop.permute.xlu2 %1961  ;;  %v5048_v51 = vpop.f32.mrf.mxu2 }
 0x271   : > { %5888 = vst [vmem:[#allocation48_spill] sm:$0xff] %v5042_v16  ;;  %v2199_v13 = vadd.f32 %v4978_v56, %v5042_v16  ;;  %v5059_v56 = vor.u32 %v3599_v1, %v3440_v53  ;;  %v3488_v16 = vld [vmem:[%s5697_s3 + $0xc8] sm:$0xf] }
 0x272   : > { %v2247_v39 = vpop.f32.mrf.mxu3  ;;  %5889 = vst [vmem:[#allocation45_spill] sm:$0xff] %v5048_v51 }
 0x273   : > { %v5046_v20 = vadd.f32 %v2247_v39, %v2199_v13  ;;  %5891 = vst [vmem:[#allocation37_spill] sm:$0xff] %v5059_v56 }
 0x274   : > { %2474 = vmatpush.bf16.msrb.mxu2 %v1872_v10  ;;  %5896 = vst [vmem:[#allocation55_spill] sm:$0xff] %v5094_v45 }
 0x277   : > { %v1384_v25 = vpop.f32.mrf.mxu0 }
 0x278   : > { %2475 = vmatpush.bf16.msrb.mxu2 %v1870_v41  ;;  %v2208_v30 = vpop.f32.mrf.mxu2  ;;  %v5096_v41 = vpop.f32.mrf.mxu1 }
 0x27a   : > { %v5056_v29 = vpop.f32.mrf.mxu3 }
 0x27b   : > { %5890 = vst [vmem:[#allocation36_spill] sm:$0xff] %v5056_v29 }
 0x27c   : > { %2476 = vmatpush.bf16.msrb.mxu2 %v1868_v35 }
 0x27f   : > { %v1387_v61 = vpop.f32.mrf.mxu0  ;;  %2300 = vmatmul.bf16.gmra.mxu2 %v5059_v56 }
 0x280   : > { %2477 = vmatpush.bf16.msrb.mxu2 %v4812_v48  ;;  %v3456_v48 = vld [vmem:[%s5697_s3 + $0x88] sm:$0xf]  ;;  %v5078_v38 = vpop.f32.mrf.mxu2 }
 0x281   : > { %5894 = vst [vmem:[#allocation53_spill] sm:$0xff] %v5078_v38 }
 0x282   : > { %v2252_v12 = vpop.f32.mrf.mxu3 }
 0x283   : > { %v5065_v55 = vadd.f32 %v2252_v12, %v2204_v47  ;;  %v5898_v47 = vld [vmem:[#allocation16_spill] sm:$0xff]  ;;  %v5899_v12 = vld [vmem:[#allocation22_spill] sm:$0xff] }
 0x284   : > { %2478 = vmatpush.bf16.msrb.mxu2 %v4790_v22  ;;  %v3603_v22 = vld [vmem:[%s5697_s3 + $0x94] sm:$0xf0] }
 0x285   : > { %v5076_v19 = vor.u32 %v3603_v22, %v3456_v48  ;;  %v5106_v22 = vpop.f32.mrf.mxu1 }
 0x287   : > { %v1389_v4 = vpop.f32.mrf.mxu0  ;;  %5893 = vst [vmem:[#allocation52_spill] sm:$0xff] %v5076_v19 }
 0x288   : > { %2479 = vmatpush.bf16.msrb.mxu2 %v4757_v33  ;;  %v2213_v10 = vpop.f32.mrf.mxu2 }
 0x289   : > { %v2214_v35 = vadd.f32 %v2213_v10, %v4986_v63  ;;  %v3611_v10 = vld [vmem:[%s5697_s3 + $0xd4] sm:$0xf0] }
 0x28a   : > { %v5074_v6 = vpop.f32.mrf.mxu3 }
 0x28b   : > { %5892 = vst [vmem:[#allocation51_spill] sm:$0xff] %v5074_v6  ;;  %v5904_v6 = vld [vmem:[#allocation44_spill] sm:$0xff] }
 0x28c   : > { %2480 = vmatpush.bf16.msrb.mxu2 %v4759_v26  ;;  %v2209_v26 = vadd.f32 %v2208_v30, %v4945_v3  ;;  %v5901_v3 = vld [vmem:[#allocation28_spill] sm:$0xff]  ;;  %v1385_v51 = vadd.f32 %v1384_v25, %v5904_v6 }
 0x28f   : > { %v1392_v33 = vpop.f32.mrf.mxu0  ;;  %2305 = vmatmul.bf16.gmra.mxu2 %v5076_v19 }
 0x290   : > { %v5099_v39 = vpop.f32.mrf.mxu2 }
 0x291   : > { %5897 = vst [vmem:[#allocation56_spill] sm:$0xff] %v5099_v39 }
 0x292   : > { %v2257_v0 = vpop.f32.mrf.mxu3 }
 0x293   : > { %v5084_v52 = vadd.f32 %v2257_v0, %v2209_v26  ;;  %v5900_v0 = vld [vmem:[#allocation31_spill] sm:$0xff] }
 0x294   : > { %v1393_v50 = vadd.f32 %v1392_v33, %v5900_v0  ;;  %v5903_v33 = vld [vmem:[#allocation25_spill] sm:$0xff] }
 0x297   : > { %v1394_v27 = vpop.f32.mrf.mxu0 }
 0x298   : > { %v1395_v48 = vadd.f32 %v1394_v27, %v5899_v12 }
 0x29a   : > { %v5092_v15 = vpop.f32.mrf.mxu3  ;;  %v1693_v27 = vmul.f32 0.01, %v1395_v48 }
 0x29b   : > { %5895 = vst [vmem:[#allocation54_spill] sm:$0xff] %v5092_v15  ;;  %v1388_v15 = vadd.f32 %v1387_v61, %v5903_v33  ;;  %v1685_v61 = vmul.f32 0.01, %v1385_v51 }
 0x29c   : > { %v1821_v29 = vmax.f32 %v1395_v48, %v1693_v27 }
 0x29d   : > { %v1687_v40 = vmul.f32 0.01, %v1388_v15 }
 0x29f   : > { %v1397_v13 = vpop.f32.mrf.mxu0  ;;  %2310 = vmatmul.bf16.gmra.mxu2 %v5094_v45  ;;  %v5119_v45 = vor.u32 %v3611_v10, %v3488_v16  ;;  %v5127_v10 = vpop.f32.mrf.mxu1 }
 0x2a0   : > { %v1398_v30 = vadd.f32 %v1397_v13, %v5898_v47  ;;  %v5902_v13 = vld [vmem:[#allocation26_spill] sm:$0xff] }
 0x2a2   : > { %v2262_v53 = vpop.f32.mrf.mxu3  ;;  %v1695_v11 = vmul.f32 0.01, %v1398_v30 }
 0x2a3   : > { %v5102_v1 = vadd.f32 %v2262_v53, %v2214_v35  ;;  %v2218_v35 = vpop.f32.mrf.mxu2  ;;  %v1390_v53 = vadd.f32 %v1389_v4, %v5902_v13  ;;  %v1383_v4 = vadd.f32 %v5039_v60, %v5905_v34 }
 0x2a4   : > { %v1823_v38 = vmax.f32 %v1398_v30, %v1695_v11  ;;  %v2219_v16 = vadd.f32 %v2218_v35, %v4881_v17  ;;  %v1813_v11 = vmax.f32 %v1385_v51, %v1685_v61 }
 0x2a5   : > { %v1689_v56 = vmul.f32 0.01, %v1390_v53 }
 0x2a7   : > { %v1399_v26 = vpop.f32.mrf.mxu0  ;;  %v1817_v30 = vmax.f32 %v1390_v53, %v1689_v56  ;;  %v3615_v56 = vld [vmem:[%s5697_s3 + $0xf4] sm:$0xf0] }
 0x2a8   : > { %v1400_v58 = vadd.f32 %v1399_v26, %v5901_v3  ;;  %v1691_v26 = vmul.f32 0.01, %v1393_v50 }
 0x2aa   : > { %v1697_v63 = vmul.f32 0.01, %v1400_v58  ;;  %v5117_v39 = vpop.f32.mrf.mxu3  ;;  %v1819_v42 = vmax.f32 %v1393_v50, %v1691_v26  ;;  %v1561_v50 = vpop.f32.mrf.mxu1 }
 0x2ab   : > { %v5131_v48 = vpop.f32.mrf.mxu2 }
 0x2ac   : > { %v1825_v19 = vmax.f32 %v1400_v58, %v1697_v63  ;;  %v1887_v63 = vpack.c.bf16 %v1821_v29, %v1819_v42 }
 0x2ae   : > { %v1889_v54 = vpack.c.bf16 %v1825_v19, %v1823_v38  ;;  %v1683_v19 = vmul.f32 0.01, %v1383_v4  ;;  %v1815_v38 = vmax.f32 %v1388_v15, %v1687_v40  ;;  %v1365_v40 = vadd.f32 %v4905_v28, %v4867_v5 }
 0x2af   : > { %2315 = vmatmul.bf16.gmra.mxu2 %v5119_v45  ;;  %v1363_v15 = vadd.f32 %v4896_v46, %v4937_v36  ;;  %v3585_v46 = vld [vmem:[%s5697_s3 + $0xc] sm:$0xf] }
 0x2b0   : > { %2326 = vmatpush.bf16.msrb.mxu3 %v1889_v54  ;;  %v1885_v60 = vpack.c.bf16 %v1817_v30, %v1815_v38  ;;  %v1811_v27 = vmax.f32 %v1383_v4, %v1683_v19  ;;  %v3504_v54 = vld [vmem:[%s5697_s3 + $0xe8] sm:$0xf]  ;;  %v1669_v26 = vmul.f32 0.01, %v1365_v40 }
 0x2b1   : > { %v5141_v35 = vor.u32 %v3615_v56, %v3504_v54  ;;  %v1667_v61 = vmul.f32 0.01, %v1363_v15  ;;  %v3589_v54 = vld [vmem:[%s5697_s3 + $0x2c] sm:$0xf]  ;;  %v3410_v56 = vld [vmem:[%s5697_s3 + $0x38] sm:$0xf0] }
 0x2b2   : > { %v2267_v58 = vpop.f32.mrf.mxu3  ;;  %v1883_v29 = vpack.c.bf16 %v1813_v11, %v1811_v27  ;;  %v1563_v30 = vpop.f32.mrf.mxu1 }
 0x2b3   : > { %v5129_v25 = vadd.f32 %v2267_v58, %v2219_v16  ;;  %v2223_v51 = vpop.f32.mrf.mxu2  ;;  %v1797_v58 = vmax.f32 %v1365_v40, %v1669_v26  ;;  %v1795_v28 = vmax.f32 %v1363_v15, %v1667_v61  ;;  %v1564_v15 = vadd.f32 %v1563_v30, %v5899_v12 }
 0x2b4   : > { %2327 = vmatpush.bf16.msrb.mxu3 %v1887_v63  ;;  %v2224_v53 = vadd.f32 %v2223_v51, %v4909_v2  ;;  %v5908_v51 = vld [vmem:[#allocation15_spill] sm:$0xff]  ;;  %v1557_v12 = vadd.f32 %v5106_v22, %v5903_v33 }
 0x2b5   : > { %v1875_v19 = vpack.c.bf16 %v1797_v58, %v1795_v28 }
 0x2b6   : > { %v1688_v22 = vmul.f32 0.01, %v1557_v12 }
 0x2b8   : > { %2328 = vmatpush.bf16.msrb.mxu3 %v1885_v60 }
 0x2ba   : > { %v5139_v42 = vpop.f32.mrf.mxu3  ;;  %v1566_v11 = vpop.f32.mrf.mxu1 }
 0x2bb   : > { %v5160_v63 = vpop.f32.mrf.mxu2 }
 0x2bc   : > { %2329 = vmatpush.bf16.msrb.mxu3 %v1883_v29 }
 0x2bf   : > { %2320 = vmatmul.bf16.gmra.mxu2 %v5141_v35 }
 0x2c0   : > { %2330 = vmatpush.bf16.msrb.mxu3 %v5035_v24  ;;  %v3394_v24 = vld [vmem:[%s5697_s3 + $0x18] sm:$0xf0] }
 0x2c1   : > { %v5162_v38 = vor.u32 %v3585_v46, %v3394_v24 }
 0x2c2   : > { %v2272_v4 = vpop.f32.mrf.mxu3  ;;  %v1568_v29 = vpop.f32.mrf.mxu1 }
 0x2c3   : > { %v5150_v16 = vadd.f32 %v2272_v4, %v2224_v53 }
 0x2c4   : > { %2331 = vmatpush.bf16.msrb.mxu3 %v4991_v44  ;;  %v5906_v44 = vld [vmem:[#allocation49_spill] sm:$0xff] }
 0x2c8   : > { %2332 = vmatpush.bf16.msrb.mxu3 %v4949_v14  ;;  %v5907_v14 = vld [vmem:[#allocation12_spill] sm:$0xff] }
 0x2cc   : > { %2333 = vmatpush.bf16.msrb.mxu3 %v1875_v19 }
 0x2cf   : > { %2334 = vmatmul.bf16.vlgmr.msrb.gmra.mxu3 %v5162_v38  ;;  %2383 = vmatmul.bf16.vlgmr.msra.gmra.mxu2 %v5907_v14 }
 0x2d0   : > { %2424 = vmatpush.bf16.msra.mxu3 %v5906_v44  ;;  %v1816_v44 = vmax.f32 %v1557_v12, %v1688_v22 }
 0x2d2   : > { %v2286_v60 = vpop.f32.mrf.mxu2 }
 0x2d3   : > { %v5169_v27 = vadd.f32 %v2286_v60, %v4962_v31  ;;  %v1569_v31 = vadd.f32 %v1568_v29, %v5901_v3  ;;  %v1694_v3 = vmul.f32 0.01, %v1564_v15  ;;  %v3597_v29 = vld [vmem:[%s5697_s3 + $0x6c] sm:$0xf] }
 0x2d4   : > { %2425 = vmatpush.bf16.msra.mxu3 %v4761_v62  ;;  %v5181_v62 = vor.u32 %v3589_v54, %v3410_v56  ;;  %v1534_v56 = vadd.f32 %v4907_v21, %v4867_v5  ;;  %v5911_v5 = vld [vmem:[#allocation27_spill] sm:$0xff] }
 0x2d5   : > { %v1698_v53 = vmul.f32 0.01, %v1569_v31 }
 0x2d8   : > { %2426 = vmatpush.bf16.msra.mxu3 %v4763_v57  ;;  %v1567_v57 = vadd.f32 %v1566_v11, %v5898_v47  ;;  %v1826_v47 = vmax.f32 %v1569_v31, %v1698_v53  ;;  %v5909_v11 = vld [vmem:[#allocation21_spill] sm:$0xff]  ;;  %v1670_v53 = vmul.f32 0.01, %v1534_v56 }
 0x2d9   : > { %v3442_v31 = vld [vmem:[%s5697_s3 + $0x78] sm:$0xf0] }
 0x2da   : > { %v5179_v40 = vpop.f32.mrf.mxu2  ;;  %v1696_v26 = vmul.f32 0.01, %v1567_v57  ;;  %v1798_v21 = vmax.f32 %v1534_v56, %v1670_v53 }
 0x2dc   : > { %2427 = vmatpush.bf16.msra.mxu3 %v4765_v8  ;;  %v1562_v8 = vadd.f32 %v1561_v50, %v5900_v0  ;;  %v1824_v58 = vmax.f32 %v1567_v57, %v1696_v26  ;;  %v1822_v50 = vmax.f32 %v1564_v15, %v1694_v3  ;;  %v5910_v57 = vld [vmem:[#allocation4_spill] sm:$0xff] }
 0x2de   : > { %v1692_v30 = vmul.f32 0.01, %v1562_v8  ;;  %v1890_v28 = vpack.c.bf16 %v1826_v47, %v1824_v58  ;;  %v3474_v58 = vld [vmem:[%s5697_s3 + $0xb8] sm:$0xf0] }
 0x2df   : > { %2339 = vmatmul.bf16.gmra.mxu3 %v5181_v62  ;;  %2388 = vmatmul.bf16.gmra.mxu2 %v5908_v51  ;;  %v1532_v51 = vadd.f32 %v5910_v57, %v4937_v36  ;;  %v5310_v57 = vpop.permute.xlu1 %1946 }
 0x2e0   : > { %2428 = vmatpush.bf16.msra.mxu3 %v4767_v18  ;;  %v1559_v18 = vadd.f32 %v5127_v10, %v5902_v13  ;;  %v3426_v13 = vld [vmem:[%s5697_s3 + $0x58] sm:$0xf0]  ;;  %v1820_v33 = vmax.f32 %v1562_v8, %v1692_v30  ;;  %v3605_v30 = vld [vmem:[%s5697_s3 + $0xac] sm:$0xf] }
 0x2e1   : > { %v1668_v8 = vmul.f32 0.01, %v1532_v51 }
 0x2e2   : > { %v2291_v4 = vpop.f32.mrf.mxu2  ;;  %v1690_v0 = vmul.f32 0.01, %v1559_v18  ;;  %v1888_v24 = vpack.c.bf16 %v1822_v50, %v1820_v33  ;;  %v5913_v50 = vld [vmem:[#allocation41_spill] sm:$0xff]  ;;  %v5914_v33 = vld [vmem:[#allocation46_spill] sm:$0xff] }
 0x2e3   : > { %v5192_v61 = vadd.f32 %v2291_v4, %v5007_v32  ;;  %v3593_v32 = vld [vmem:[%s5697_s3 + $0x4c] sm:$0xf]  ;;  %v1796_v26 = vmax.f32 %v1532_v51, %v1668_v8 }
 0x2e4   : > { %2429 = vmatpush.bf16.msra.mxu3 %v4769_v23  ;;  %v1554_v23 = vadd.f32 %v5096_v41, %v5904_v6  ;;  %v5212_v6 = vor.u32 %v3593_v32, %v3426_v13  ;;  %v1818_v46 = vmax.f32 %v1559_v18, %v1690_v0  ;;  %v5264_v0 = vor.u32 %v3605_v30, %v3474_v58  ;;  %v3609_v32 = vld [vmem:[%s5697_s3 + $0xcc] sm:$0xf]  ;;  %v3490_v13 = vld [vmem:[%s5697_s3 + $0xd8] sm:$0xf0] }
 0x2e5   : > { %v1876_v18 = vpack.c.bf16 %v1798_v21, %v1796_v26  ;;  %v5279_v22 = vor.u32 %v3609_v32, %v3490_v13  ;;  %v5918_v51 = vld [vmem:[#allocation7_spill] sm:$0xff] }
 0x2e6   : > { %v1686_v41 = vmul.f32 0.01, %v1554_v23  ;;  %v1886_v14 = vpack.c.bf16 %v1818_v46, %v1816_v44  ;;  %v3613_v46 = vld [vmem:[%s5697_s3 + $0xec] sm:$0xf]  ;;  %v2191_v53 = vadd.f32 %v5918_v51, %v5310_v57 }
 0x2e7   : > { %v5922_v32 = vld [vmem:[#allocation19_spill] sm:$0xff] }
 0x2e8   : > { %2430 = vmatpush.bf16.msra.mxu3 %v4773_v43  ;;  %v1552_v43 = vadd.f32 %v5082_v49, %v5905_v34  ;;  %v5925_v51 = vld [vmem:[#allocation43_spill] sm:$0xff] }
 0x2ea   : > { %v5210_v10 = vpop.f32.mrf.mxu2  ;;  %v1684_v19 = vmul.f32 0.01, %v1552_v43 }
 0x2ec   : > { %2431 = vmatpush.bf16.msra.mxu3 %v4775_v37  ;;  %v1814_v37 = vmax.f32 %v1554_v23, %v1686_v41  ;;  %v1812_v34 = vmax.f32 %v1552_v43, %v1684_v19 }
 0x2ee   : > { %v1884_v54 = vpack.c.bf16 %v1814_v37, %v1812_v34 }
 0x2ef   : > { %2344 = vmatmul.bf16.gmra.mxu3 %v5212_v6  ;;  %2393 = vmatmul.bf16.gmra.mxu2 %v5909_v11  ;;  %v5915_v11 = vld [vmem:[#allocation50_spill] sm:$0xff] }
 0x2f0   : > { %2522 = vmatpush.bf16.msrb.mxu3 %v1890_v28 }
 0x2f2   : > { %v2296_v49 = vpop.f32.mrf.mxu2 }
 0x2f3   : > { %v5217_v60 = vadd.f32 %v2296_v49, %v5046_v20  ;;  %v5232_v20 = vor.u32 %v3597_v29, %v3442_v31  ;;  %v5916_v49 = vld [vmem:[#allocation2_spill] sm:$0xff] }
 0x2f4   : > { %2523 = vmatpush.bf16.msrb.mxu3 %v1888_v24  ;;  %v3506_v24 = vld [vmem:[%s5697_s3 + $0xf8] sm:$0xf0] }
 0x2f5   : > { %v5294_v44 = vor.u32 %v3613_v46, %v3506_v24 }
 0x2f8   : > { %2524 = vmatpush.bf16.msrb.mxu3 %v1886_v14  ;;  %v5301_v14 = vpop.f32.mrf.mxu3 }
 0x2fa   : > { %v5229_v15 = vpop.f32.mrf.mxu2 }
 0x2fc   : > { %2525 = vmatpush.bf16.msrb.mxu3 %v1884_v54  ;;  %v5917_v54 = vld [vmem:[#allocation32_spill] sm:$0xff] }
 0x2ff   : > { %2349 = vmatmul.bf16.gmra.mxu3 %v5232_v20  ;;  %2398 = vmatmul.bf16.gmra.mxu2 %v5911_v5 }
 0x300   : > { %2526 = vmatpush.bf16.msrb.mxu3 %v5037_v59  ;;  %v3601_v59 = vld [vmem:[%s5697_s3 + $0x8c] sm:$0xf] }
 0x302   : > { %v2301_v4 = vpop.f32.mrf.mxu2 }
 0x303   : > { %v5239_v36 = vadd.f32 %v2301_v4, %v5065_v55 }
 0x304   : > { %2527 = vmatpush.bf16.msrb.mxu3 %v4993_v9  ;;  %v3458_v9 = vld [vmem:[%s5697_s3 + $0x98] sm:$0xf0] }
 0x305   : > { %v5249_v47 = vor.u32 %v3601_v59, %v3458_v9 }
 0x308   : > { %2528 = vmatpush.bf16.msrb.mxu3 %v4951_v7  ;;  %v5912_v7 = vld [vmem:[#allocation33_spill] sm:$0xff] }
 0x30a   : > { %v5247_v3 = vpop.f32.mrf.mxu2 }
 0x30c   : > { %2529 = vmatpush.bf16.msrb.mxu3 %v1876_v18 }
 0x30f   : > { %2354 = vmatmul.bf16.gmra.mxu3 %v5249_v47  ;;  %2403 = vmatmul.bf16.gmra.mxu2 %v5912_v7  ;;  %v5920_v7 = vld [vmem:[#allocation8_spill] sm:$0xff] }
 0x312   : > { %v2306_v55 = vpop.f32.mrf.mxu2 }
 0x313   : > { %v5254_v12 = vadd.f32 %v2306_v55, %v5084_v52  ;;  %v5921_v55 = vld [vmem:[#allocation23_spill] sm:$0xff] }
 0x31a   : > { %v5262_v23 = vpop.f32.mrf.mxu2 }
 0x31f   : > { %2359 = vmatmul.bf16.gmra.mxu3 %v5264_v0  ;;  %2408 = vmatmul.bf16.gmra.mxu2 %v5913_v50 }
 0x322   : > { %v2311_v28 = vpop.f32.mrf.mxu2 }
 0x323   : > { %v5269_v52 = vadd.f32 %v2311_v28, %v5102_v1 }
 0x32a   : > { %v5277_v43 = vpop.f32.mrf.mxu2 }
 0x32f   : > { %2364 = vmatmul.bf16.gmra.mxu3 %v5279_v22  ;;  %2413 = vmatmul.bf16.gmra.mxu2 %v5914_v33  ;;  %v5923_v33 = vld [vmem:[#allocation42_spill] sm:$0xff] }
 0x332   : > { %v2316_v41 = vpop.f32.mrf.mxu2 }
 0x333   : > { %v5284_v1 = vadd.f32 %v2316_v41, %v5129_v25 }
 0x33a   : > { %v5292_v19 = vpop.f32.mrf.mxu2 }
 0x33f   : > { %2369 = vmatmul.bf16.gmra.mxu3 %v5294_v44  ;;  %2418 = vmatmul.bf16.gmra.mxu2 %v5915_v11 }
 0x342   : > { %v2321_v37 = vpop.f32.mrf.mxu2 }
 0x343   : > { %v5299_v25 = vadd.f32 %v2321_v37, %v5150_v16  ;;  %v5919_v16 = vld [vmem:[#allocation35_spill] sm:$0xff] }
 0x344   : > { %v2240_v8 = vadd.f32 %v5919_v16, %v2191_v53 }
 0x346   : > { %v2289_v5 = vadd.f32 %v5179_v40, %v2240_v8  ;;  %v5325_v40 = vpop.permute.xlu2 %1956 }
 0x347   : > { %v2196_v13 = vadd.f32 %v5922_v32, %v5325_v40 }
 0x349   : > { %v2245_v41 = vadd.f32 %v5923_v33, %v2196_v13  ;;  %v5929_v13 = vld [vmem:[#allocation9_spill] sm:$0xff] }
 0x34a   : > { %v5303_v34 = vpop.f32.mrf.mxu2  ;;  %v5930_v33 = vld [vmem:[#allocation37_spill] sm:$0xff] }
 0x34b   : > { %v2294_v46 = vadd.f32 %v5210_v10, %v2245_v41  ;;  %v5926_v10 = vld [vmem:[#allocation39_spill] sm:$0xff] }
 0x34f   : > { %2432 = vmatmul.bf16.vlgmr.msra.gmra.mxu3 %v5916_v49  ;;  %2481 = vmatmul.bf16.vlgmr.msrb.gmra.mxu2 %v5917_v54 }
 0x352   : > { %v2335_v56 = vpop.f32.mrf.mxu3  ;;  %v5307_v29 = vpop.f32.mrf.mxu2 }
 0x353   : > { %v2336_v31 = vadd.f32 %v2335_v56, %v5169_v27 }
 0x355   : > { %v2571_v4 = vmul.f32 0.01, %v2336_v31 }
 0x357   : > { %v2603_v9 = vmax.f32 %v2336_v31, %v2571_v4  ;;  %v5924_v31 = vld [vmem:[#allocation3_spill] sm:$0xff] }
 0x35a   : > { %v2337_v21 = vpop.f32.mrf.mxu3  ;;  %v5316_v26 = vpop.f32.mrf.mxu2 }
 0x35b   : > { %v2338_v18 = vadd.f32 %v2337_v21, %v2289_v5  ;;  %v5927_v21 = vld [vmem:[#allocation47_spill] sm:$0xff] }
 0x35c   : > { %v2201_v4 = vadd.f32 %v5927_v21, %v5926_v10 }
 0x35d   : > { %v2573_v59 = vmul.f32 0.01, %v2338_v18 }
 0x35f   : > { %2437 = vmatmul.bf16.gmra.mxu3 %v5920_v7  ;;  %2486 = vmatmul.bf16.gmra.mxu2 %v5921_v55  ;;  %v2605_v27 = vmax.f32 %v2338_v18, %v2573_v59  ;;  %v5928_v18 = vld [vmem:[#allocation36_spill] sm:$0xff] }
 0x360   : > { %v2250_v59 = vadd.f32 %v5928_v18, %v2201_v4 }
 0x361   : > { %v5320_v30 = vpack.c.bf16 %v2605_v27, %v2603_v9 }
 0x362   : > { %v2340_v58 = vpop.f32.mrf.mxu3  ;;  %v5322_v50 = vpop.f32.mrf.mxu2  ;;  %v2299_v9 = vadd.f32 %v5229_v15, %v2250_v59  ;;  %v5931_v15 = vld [vmem:[#allocation14_spill] sm:$0xff]  ;;  %v5934_v59 = vld [vmem:[#allocation11_spill] sm:$0xff] }
 0x363   : > { %v2341_v28 = vadd.f32 %v2340_v58, %v5192_v61 }
 0x365   : > { %v2575_v37 = vmul.f32 0.01, %v2341_v28 }
 0x367   : > { %v2607_v56 = vmax.f32 %v2341_v28, %v2575_v37 }
 0x36a   : > { %v2342_v24 = vpop.f32.mrf.mxu3  ;;  %v5331_v11 = vpop.f32.mrf.mxu2 }
 0x36b   : > { %v2343_v49 = vadd.f32 %v2342_v24, %v2294_v46 }
 0x36d   : > { %v2577_v54 = vmul.f32 0.01, %v2343_v49 }
 0x36f   : > { %2442 = vmatmul.bf16.gmra.mxu3 %v5924_v31  ;;  %2491 = vmatmul.bf16.gmra.mxu2 %v5925_v51  ;;  %v2609_v61 = vmax.f32 %v2343_v49, %v2577_v54  ;;  %v5932_v49 = vld [vmem:[#allocation45_spill] sm:$0xff] }
 0x370   : > { %v2206_v54 = vadd.f32 %v5932_v49, %v5931_v15 }
 0x371   : > { %v5335_v53 = vpack.c.bf16 %v2609_v61, %v2607_v56  ;;  %v5933_v56 = vld [vmem:[#allocation51_spill] sm:$0xff] }
 0x372   : > { %v2345_v16 = vpop.f32.mrf.mxu3  ;;  %v5337_v8 = vpop.f32.mrf.mxu2  ;;  %v2255_v31 = vadd.f32 %v5933_v56, %v2206_v54 }
 0x373   : > { %v2346_v5 = vadd.f32 %v2345_v16, %v5217_v60 }
 0x374   : > { %v2304_v51 = vadd.f32 %v5247_v3, %v2255_v31  ;;  %v5936_v3 = vld [vmem:[#allocation10_spill] sm:$0xff] }
 0x375   : > { %v2579_v27 = vmul.f32 0.01, %v2346_v5 }
 0x377   : > { %v2611_v32 = vmax.f32 %v2346_v5, %v2579_v27 }
 0x37a   : > { %v2347_v7 = vpop.f32.mrf.mxu3  ;;  %v5344_v55 = vpop.f32.mrf.mxu2 }
 0x37b   : > { %v2348_v58 = vadd.f32 %v2347_v7, %v2299_v9  ;;  %v5935_v9 = vld [vmem:[#allocation52_spill] sm:$0xff] }
 0x37d   : > { %v2581_v28 = vmul.f32 0.01, %v2348_v58 }
 0x37f   : > { %2447 = vmatmul.bf16.gmra.mxu3 %v5929_v13  ;;  %2496 = vmatmul.bf16.gmra.mxu2 %v5930_v33  ;;  %v2613_v41 = vmax.f32 %v2348_v58, %v2581_v28  ;;  %v5938_v33 = vld [vmem:[#allocation54_spill] sm:$0xff] }
 0x381   : > { %v5348_v60 = vpack.c.bf16 %v2613_v41, %v2611_v32  ;;  %v5937_v32 = vld [vmem:[#allocation53_spill] sm:$0xff] }
 0x382   : > { %v2350_v46 = vpop.f32.mrf.mxu3  ;;  %v5350_v24 = vpop.f32.mrf.mxu2  ;;  %v2211_v13 = vadd.f32 %v5937_v32, %v5936_v3 }
 0x383   : > { %v2351_v37 = vadd.f32 %v2350_v46, %v5239_v36 }
 0x384   : > { %v2260_v41 = vadd.f32 %v5938_v33, %v2211_v13 }
 0x385   : > { %v2583_v5 = vmul.f32 0.01, %v2351_v37 }
 0x386   : > { %v2309_v46 = vadd.f32 %v5262_v23, %v2260_v41 }
 0x387   : > { %v2615_v18 = vmax.f32 %v2351_v37, %v2583_v5  ;;  %v5940_v5 = vld [vmem:[#allocation55_spill] sm:$0xff] }
 0x38a   : > { %v2352_v61 = vpop.f32.mrf.mxu3  ;;  %v5357_v16 = vpop.f32.mrf.mxu2 }
 0x38b   : > { %v2353_v21 = vadd.f32 %v2352_v61, %v2304_v51  ;;  %v5939_v61 = vld [vmem:[#allocation5_spill] sm:$0xff] }
 0x38d   : > { %v2585_v4 = vmul.f32 0.01, %v2353_v21 }
 0x38f   : > { %2452 = vmatmul.bf16.gmra.mxu3 %v5934_v59  ;;  %2501 = vmatmul.bf16.gmra.mxu2 %v5935_v9  ;;  %v2617_v7 = vmax.f32 %v2353_v21, %v2585_v4  ;;  %v5941_v59 = vld [vmem:[#allocation38_spill] sm:$0xff]  ;;  %v5942_v9 = vld [vmem:[#allocation56_spill] sm:$0xff] }
 0x391   : > { %v5361_v36 = vpack.c.bf16 %v2617_v7, %v2615_v18  ;;  %v2216_v7 = vadd.f32 %v5942_v9, %v5941_v59 }
 0x392   : > { %v2355_v27 = vpop.f32.mrf.mxu3  ;;  %v5363_v58 = vpop.f32.mrf.mxu2 }
 0x393   : > { %v2356_v28 = vadd.f32 %v2355_v27, %v5254_v12  ;;  %v2265_v23 = vadd.f32 %v5117_v39, %v2216_v7  ;;  %v5944_v39 = vld [vmem:[#allocation20_spill] sm:$0xff] }
 0x395   : > { %v2587_v54 = vmul.f32 0.01, %v2356_v28  ;;  %v2314_v32 = vadd.f32 %v5277_v43, %v2265_v23 }
 0x397   : > { %v2619_v51 = vmax.f32 %v2356_v28, %v2587_v54  ;;  %v5943_v54 = vld [vmem:[#allocation13_spill] sm:$0xff] }
 0x39a   : > { %v2357_v37 = vpop.f32.mrf.mxu3  ;;  %v5370_v49 = vpop.f32.mrf.mxu2 }
 0x39b   : > { %v2358_v56 = vadd.f32 %v2357_v37, %v2309_v46 }
 0x39d   : > { %v2589_v31 = vmul.f32 0.01, %v2358_v56 }
 0x39f   : > { %2457 = vmatmul.bf16.gmra.mxu3 %v5939_v61  ;;  %2506 = vmatmul.bf16.gmra.mxu2 %v5940_v5  ;;  %v2621_v21 = vmax.f32 %v2358_v56, %v2589_v31 }
 0x3a1   : > { %v2643_v12 = vpack.c.bf16 %v2621_v21, %v2619_v51 }
 0x3a2   : > { %v2360_v4 = vpop.f32.mrf.mxu3  ;;  %v5374_v18 = vpop.f32.mrf.mxu2 }
 0x3a3   : > { %v2361_v27 = vadd.f32 %v2360_v4, %v5269_v52  ;;  %v2221_v52 = vadd.f32 %v5131_v48, %v5944_v39 }
 0x3a5   : > { %v2591_v33 = vmul.f32 0.01, %v2361_v27  ;;  %v2270_v43 = vadd.f32 %v5139_v42, %v2221_v52  ;;  %v5946_v42 = vld [vmem:[#allocation18_spill] sm:$0xff] }
 0x3a7   : > { %v2623_v37 = vmax.f32 %v2361_v27, %v2591_v33  ;;  %v2319_v21 = vadd.f32 %v5292_v19, %v2270_v43 }
 0x3aa   : > { %v2362_v13 = vpop.f32.mrf.mxu3  ;;  %v5381_v28 = vpop.f32.mrf.mxu2 }
 0x3ab   : > { %v2363_v41 = vadd.f32 %v2362_v13, %v2314_v32  ;;  %v5945_v32 = vld [vmem:[#allocation6_spill] sm:$0xff] }
 0x3ad   : > { %v2593_v46 = vmul.f32 0.01, %v2363_v41 }
 0x3af   : > { %2462 = vmatmul.bf16.gmra.mxu3 %v5943_v54  ;;  %2511 = vmatmul.bf16.gmra.mxu2 %v5119_v45  ;;  %v2625_v56 = vmax.f32 %v2363_v41, %v2593_v46 }
 0x3b1   : > { %v2645_v31 = vpack.c.bf16 %v2625_v56, %v2623_v37 }
 0x3b2   : > { %v2365_v51 = vpop.f32.mrf.mxu3  ;;  %v5385_v61 = vpop.f32.mrf.mxu2 }
 0x3b3   : > { %v2366_v5 = vadd.f32 %v2365_v51, %v5284_v1  ;;  %v2226_v1 = vadd.f32 %v5160_v63, %v5946_v42 }
 0x3b5   : > { %v2595_v7 = vmul.f32 0.01, %v2366_v5  ;;  %v2275_v19 = vadd.f32 %v5301_v14, %v2226_v1 }
 0x3b7   : > { %v2627_v27 = vmax.f32 %v2366_v5, %v2595_v7  ;;  %v2324_v37 = vadd.f32 %v5303_v34, %v2275_v19  ;;  %v2387_v34 = vadd.f32 %v5316_v26, %v5310_v57  ;;  %v2392_v57 = vadd.f32 %v5331_v11, %v5325_v40 }
 0x3ba   : > { %v2367_v4 = vpop.f32.mrf.mxu3  ;;  %v5392_v9 = vpop.f32.mrf.mxu2 }
 0x3bb   : > { %v2368_v23 = vadd.f32 %v2367_v4, %v2319_v21  ;;  %v5947_v21 = vld [vmem:[#allocation24_spill] sm:$0xff] }
 0x3bc   : > { %v2385_v4 = vadd.f32 %v5307_v29, %v5947_v21 }
 0x3bd   : > { %v2597_v45 = vmul.f32 0.01, %v2368_v23 }
 0x3bf   : > { %2467 = vmatmul.bf16.gmra.mxu3 %v5945_v32  ;;  %2516 = vmatmul.bf16.gmra.mxu2 %v5141_v35  ;;  %v2629_v13 = vmax.f32 %v2368_v23, %v2597_v45 }
 0x3c1   : > { %v2647_v33 = vpack.c.bf16 %v2629_v13, %v2627_v27 }
 0x3c2   : > { %v2370_v48 = vpop.f32.mrf.mxu3  ;;  %v5396_v41 = vpop.f32.mrf.mxu2 }
 0x3c3   : > { %v2371_v46 = vadd.f32 %v2370_v48, %v5299_v25 }
 0x3c5   : > { %v2599_v51 = vmul.f32 0.01, %v2371_v46 }
 0x3c7   : > { %v2631_v43 = vmax.f32 %v2371_v46, %v2599_v51  ;;  %v2397_v46 = vadd.f32 %v5344_v55, %v5926_v10 }
 0x3ca   : > { %v2372_v54 = vpop.f32.mrf.mxu3  ;;  %v5403_v56 = vpop.f32.mrf.mxu2 }
 0x3cb   : > { %v2373_v52 = vadd.f32 %v2372_v54, %v2324_v37 }
 0x3cd   : > { %v2601_v35 = vmul.f32 0.01, %v2373_v52 }
 0x3cf   : > { %2530 = vmatmul.bf16.vlgmr.msrb.gmra.mxu3 %v5162_v38  ;;  %v2633_v5 = vmax.f32 %v2373_v52, %v2601_v35  ;;  %v5948_v38 = vld [vmem:[#allocation40_spill] sm:$0xff] }
 0x3d0   : > { %v2390_v29 = vadd.f32 %v5322_v50, %v5948_v38  ;;  %v5431_v50 = vld [vmem:[%s5699_s5] sm:$0xff] }
 0x3d1   : > { %v2649_v63 = vpack.c.bf16 %v2633_v5, %v2631_v43  ;;  %v2402_v5 = vadd.f32 %v5357_v16, %v5931_v15 }
 0x3d2   : > { %v2433_v7 = vpop.f32.mrf.mxu3  ;;  %v2482_v14 = vpop.f32.mrf.mxu2 }
 0x3d3   : > { %v2434_v23 = vadd.f32 %v2433_v7, %v2385_v4  ;;  %2722 = vmatpush.bf16.msrb.mxu0 %v2649_v63 }
 0x3d5   : > { %v5408_v25 = vadd.f32 %v2482_v14, %v2434_v23 }
 0x3d7   : > { %2723 = vmatpush.bf16.msrb.mxu0 %v2647_v33 }
 0x3da   : > { %v2435_v45 = vpop.f32.mrf.mxu3  ;;  %v5412_v27 = vpop.f32.mrf.mxu2 }
 0x3db   : > { %v5414_v32 = vadd.f32 %v2435_v45, %v2387_v34  ;;  %2724 = vmatpush.bf16.msrb.mxu0 %v2645_v31  ;;  %v2657_v45 = vld [vmem:[%s5699_s5 + $0x18] sm:$0xf] }
 0x3df   : > { %2535 = vmatmul.bf16.gmra.mxu3 %v5181_v62  ;;  %2725 = vmatpush.bf16.msrb.mxu0 %v2643_v12 }
 0x3e2   : > { %v2438_v13 = vpop.f32.mrf.mxu3  ;;  %v2487_v48 = vpop.f32.mrf.mxu2 }
 0x3e3   : > { %v2439_v1 = vadd.f32 %v2438_v13, %v2390_v29  ;;  %2726 = vmatpush.bf16.msrb.mxu0 %v5361_v36  ;;  %v2713_v29 = vunpack.c.l.b16 %v2657_v45 }
 0x3e5   : > { %v5420_v33 = vadd.f32 %v2487_v48, %v2439_v1  ;;  %v5475_v13 = vpack.c.b16 %v2713_v29, %v2713_v29 }
 0x3e7   : > { %2727 = vmatpush.bf16.msrb.mxu0 %v5348_v60  ;;  %v5949_v60 = vld [vmem:[#allocation48_spill] sm:$0xff] }
 0x3e8   : > { %v2395_v36 = vadd.f32 %v5337_v8, %v5949_v60 }
 0x3ea   : > { %v2440_v26 = vpop.f32.mrf.mxu3  ;;  %v2489_v31 = vpop.f32.mrf.mxu2 }
 0x3eb   : > { %v2441_v19 = vadd.f32 %v2440_v26, %v2392_v57  ;;  %2728 = vmatpush.bf16.msrb.mxu0 %v5335_v53  ;;  %v2415_v26 = vadd.f32 %v5385_v61, %v4881_v17  ;;  %v2485_v17 = vadd.f32 %v5412_v27, %v5414_v32 }
 0x3ed   : > { %v5426_v62 = vadd.f32 %v2489_v31, %v2441_v19 }
 0x3ef   : > { %2540 = vmatmul.bf16.gmra.mxu3 %v5212_v6  ;;  %2729 = vmatpush.bf16.msrb.mxu0 %v5320_v30  ;;  %v5447_v6 = vld [vmem:[%s5699_s5 + $0x8] sm:$0xff]  ;;  %v5950_v30 = vld [vmem:[#allocation17_spill] sm:$0xff] }
 0x3f0   : > { %v2400_v8 = vadd.f32 %v5350_v24, %v5950_v30  ;;  %v5951_v24 = vld [vmem:[#allocation34_spill] sm:$0xff] }
 0x3f1   : > { %v2405_v14 = vadd.f32 %v5363_v58, %v5951_v24 }
 0x3f2   : > { %v2443_v40 = vpop.f32.mrf.mxu3  ;;  %2730 = vmatmul.bf16.vlgmr.msrb.gmra.mxu0 %v5431_v50  ;;  %v2492_v11 = vpop.f32.mrf.mxu2 }
 0x3f3   : > { %v2444_v12 = vadd.f32 %v2443_v40, %v2395_v36 }
 0x3f5   : > { %v5438_v53 = vadd.f32 %v2492_v11, %v2444_v12 }
 0x3fa   : > { %v2445_v37 = vpop.f32.mrf.mxu3  ;;  %v2494_v54 = vpop.f32.mrf.mxu2 }
 0x3fb   : > { %v2446_v51 = vadd.f32 %v2445_v37, %v2397_v46 }
 0x3fd   : > { %v5442_v52 = vadd.f32 %v2494_v54, %v2446_v51 }
 0x3ff   : > { %2545 = vmatmul.bf16.gmra.mxu3 %v5232_v20  ;;  %v5462_v20 = vld [vmem:[%s5699_s5 + $0x10] sm:$0xff] }
 0x402   : > { %v2448_v35 = vpop.f32.mrf.mxu3  ;;  %2735 = vmatmul.bf16.gmra.mxu0 %v5447_v6  ;;  %v2497_v43 = vpop.f32.mrf.mxu2 }
 0x403   : > { %v2449_v10 = vadd.f32 %v2448_v35, %v2400_v8 }
 0x405   : > { %v5453_v55 = vadd.f32 %v2497_v43, %v2449_v10 }
 0x40a   : > { %v2450_v21 = vpop.f32.mrf.mxu3  ;;  %v2499_v4 = vpop.f32.mrf.mxu2 }
 0x40b   : > { %v2451_v63 = vadd.f32 %v2450_v21, %v2402_v5 }
 0x40d   : > { %v5457_v7 = vadd.f32 %v2499_v4, %v2451_v63 }
 0x40f   : > { %2550 = vmatmul.bf16.gmra.mxu3 %v5249_v47  ;;  %v5952_v47 = vld [vmem:[#allocation29_spill] sm:$0xff] }
 0x410   : > { %v2410_v58 = vadd.f32 %v5374_v18, %v5952_v47 }
 0x412   : > { %v2453_v23 = vpop.f32.mrf.mxu3  ;;  %2740 = vmatmul.bf16.gmra.mxu0 %v5462_v20  ;;  %v2502_v34 = vpop.f32.mrf.mxu2 }
 0x413   : > { %v2454_v15 = vadd.f32 %v2453_v23, %v2405_v14 }
 0x415   : > { %v5468_v16 = vadd.f32 %v2502_v34, %v2454_v15 }
 0x41a   : > { %v5473_v38 = vpop.f32.mrf.mxu3 }
 0x41f   : > { %2555 = vmatmul.bf16.gmra.mxu3 %v5264_v0  ;;  %v2420_v0 = vadd.f32 %v5396_v41, %v4909_v2 }
 0x422   : > { %v2458_v48 = vpop.f32.mrf.mxu3  ;;  %2745 = vmatmul.bf16.gmra.mxu0 %v5475_v13 }
 0x423   : > { %v5481_v1 = vadd.f32 %v2458_v48, %v2410_v58  ;;  %v5513_v58 = vpop.f32.mrf.mxu2 }
 0x42a   : > { %v5483_v57 = vpop.f32.mrf.mxu3 }
 0x42f   : > { %2560 = vmatmul.bf16.gmra.mxu3 %v5279_v22 }
 0x432   : > { %v2463_v31 = vpop.f32.mrf.mxu3 }
 0x433   : > { %v5488_v19 = vadd.f32 %v2463_v31, %v2415_v26 }
 0x43a   : > { %v5490_v60 = vpop.f32.mrf.mxu3 }
 0x43f   : > { %2565 = vmatmul.bf16.gmra.mxu3 %v5294_v44 }
 0x442   : > { %v2468_v18 = vpop.f32.mrf.mxu3 }
 0x443   : > { %v5495_v36 = vadd.f32 %v2468_v18, %v2420_v0 }
 0x44a   : > { %v5497_v40 = vpop.f32.mrf.mxu3 }
 0x452   : > { %v2531_v11 = vpop.f32.mrf.mxu3 }
 0x453   : > { %v2532_v22 = vadd.f32 %v2531_v11, %v5408_v25 }
 0x455   : > { %v2572_v12 = vmul.f32 0.01, %v2532_v22 }
 0x457   : > { %v2604_v54 = vmax.f32 %v2532_v22, %v2572_v12  ;;  %v5518_v22 = vpop.permute.xlu2 %2697 }
 0x45a   : > { %v2533_v61 = vpop.f32.mrf.mxu3 }
 0x45b   : > { %v2534_v46 = vadd.f32 %v2533_v61, %v2485_v17 }
 0x45d   : > { %v2574_v37 = vmul.f32 0.01, %v2534_v46 }
 0x45f   : > { %v2606_v44 = vmax.f32 %v2534_v46, %v2574_v37  ;;  %v5525_v46 = vpop.permute.xlu0 %2687 }
 0x461   : > { %v5502_v51 = vpack.c.bf16 %v2606_v44, %v2604_v54  ;;  %v5531_v54 = vpop.permute.xlu1 %2692 }
 0x462   : > { %v2536_v2 = vpop.f32.mrf.mxu3 }
 0x463   : > { %v2537_v41 = vadd.f32 %v2536_v2, %v5420_v33 }
 0x465   : > { %v2576_v8 = vmul.f32 0.01, %v2537_v41 }
 0x467   : > { %v2608_v25 = vmax.f32 %v2537_v41, %v2576_v8  ;;  %v5538_v8 = vpop.permute.xlu0 %2682 }
 0x46a   : > { %v2538_v30 = vpop.f32.mrf.mxu3 }
 0x46b   : > { %v2539_v35 = vadd.f32 %v2538_v30, %v5426_v62 }
 0x46d   : > { %v2578_v43 = vmul.f32 0.01, %v2539_v35 }
 0x46f   : > { %v2610_v10 = vmax.f32 %v2539_v35, %v2578_v43  ;;  %v2731_v5 = vpop.f32.mrf.mxu0 }
 0x471   : > { %v5506_v27 = vpack.c.bf16 %v2610_v10, %v2608_v25 }
 0x472   : > { %v2541_v32 = vpop.f32.mrf.mxu3 }
 0x473   : > { %v2542_v21 = vadd.f32 %v2541_v32, %v5438_v53 }
 0x475   : > { %v2580_v24 = vmul.f32 0.01, %v2542_v21 }
 0x477   : > { %v2733_v4 = vpop.f32.mrf.mxu0  ;;  %v2612_v33 = vmax.f32 %v2542_v21, %v2580_v24 }
 0x47a   : > { %v2543_v63 = vpop.f32.mrf.mxu3 }
 0x47b   : > { %v2544_v14 = vadd.f32 %v2543_v63, %v5442_v52 }
 0x47d   : > { %v2582_v23 = vmul.f32 0.01, %v2544_v14 }
 0x47f   : > { %v2614_v34 = vmax.f32 %v2544_v14, %v2582_v23  ;;  %v2736_v15 = vpop.f32.mrf.mxu0 }
 0x481   : > { %v5510_v45 = vpack.c.bf16 %v2614_v34, %v2612_v33 }
 0x482   : > { %v2546_v62 = vpop.f32.mrf.mxu3 }
 0x483   : > { %v2547_v29 = vadd.f32 %v2546_v62, %v5453_v55  ;;  %v5523_v55 = vpop.f32.mrf.mxu2 }
 0x485   : > { %v2584_v26 = vmul.f32 0.01, %v2547_v29 }
 0x487   : > { %v2738_v47 = vpop.f32.mrf.mxu0  ;;  %v2616_v0 = vmax.f32 %v2547_v29, %v2584_v26  ;;  %v5547_v29 = vpop.permute.xlu1 %2667 }
 0x488   : > { %v2739_v25 = vadd.f32 %v2738_v47, %v5538_v8  ;;  %v2732_v47 = vadd.f32 %v2731_v5, %v5547_v29  ;;  %v5554_v5 = vld [vmem:[%s5701_s7] sm:$0xff] }
 0x48a   : > { %v2548_v48 = vpop.f32.mrf.mxu3  ;;  %v2784_v33 = vmul.f32 0.01, %v2739_v25 }
 0x48b   : > { %v2549_v53 = vadd.f32 %v2548_v48, %v5457_v7  ;;  %v5529_v7 = vpop.permute.xlu2 %2677  ;;  %v5533_v44 = vpop.f32.mrf.mxu2 }
 0x48c   : > { %v2737_v21 = vadd.f32 %v2736_v15, %v5529_v7 }
 0x48d   : > { %v2586_v31 = vmul.f32 0.01, %v2549_v53 }
 0x48f   : > { %v2618_v18 = vmax.f32 %v2549_v53, %v2586_v31  ;;  %v2741_v52 = vpop.f32.mrf.mxu0  ;;  %v2782_v53 = vmul.f32 0.01, %v2737_v21 }
 0x491   : > { %v5516_v11 = vpack.c.bf16 %v2618_v18, %v2616_v0  ;;  %v2798_v18 = vmax.f32 %v2739_v25, %v2784_v33  ;;  %v2412_v33 = vadd.f32 %v5381_v28, %v5941_v59 }
 0x492   : > { %v2551_v17 = vpop.f32.mrf.mxu3 }
 0x493   : > { %v5521_v61 = vadd.f32 %v2551_v17, %v5468_v16  ;;  %v2742_v16 = vadd.f32 %v2741_v52, %v5525_v46  ;;  %v5544_v24 = vpop.permute.xlu2 %2672  ;;  %v2512_v48 = vpop.f32.mrf.mxu2  ;;  %v2778_v17 = vmul.f32 0.01, %v2732_v47 }
 0x494   : > { %v2734_v23 = vadd.f32 %v2733_v4, %v5544_v24 }
 0x495   : > { %v2786_v63 = vmul.f32 0.01, %v2742_v16 }
 0x496   : > { %v2780_v0 = vmul.f32 0.01, %v2734_v23 }
 0x497   : > { %v2743_v12 = vpop.f32.mrf.mxu0  ;;  %v2800_v31 = vmax.f32 %v2742_v16, %v2786_v63  ;;  %v2422_v63 = vadd.f32 %v5403_v56, %v5946_v42  ;;  %v2407_v42 = vadd.f32 %v5370_v49, %v5936_v3  ;;  %v2513_v56 = vadd.f32 %v2512_v48, %v5488_v19 }
 0x498   : > { %v2744_v2 = vadd.f32 %v2743_v12, %v5531_v54  ;;  %v2796_v12 = vmax.f32 %v2737_v21, %v2782_v53  ;;  %v2794_v4 = vmax.f32 %v2734_v23, %v2780_v0  ;;  %v5566_v23 = vld [vmem:[%s5701_s7 + $0x8] sm:$0xff]  ;;  %v2508_v0 = vadd.f32 %v5523_v55, %v5481_v1 }
 0x499   : > { %v2456_v59 = vadd.f32 %v5473_v38, %v2407_v42 }
 0x49a   : > { %v5527_v37 = vpop.f32.mrf.mxu3  ;;  %v2788_v10 = vmul.f32 0.01, %v2744_v2 }
 0x49c   : > { %v2802_v34 = vmax.f32 %v2744_v2, %v2788_v10  ;;  %v2808_v2 = vpack.c.bf16 %v2798_v18, %v2796_v12 }
 0x49e   : > { %v2810_v52 = vpack.c.bf16 %v2802_v34, %v2800_v31 }
 0x49f   : > { %v2746_v41 = vpop.f32.mrf.mxu0 }
 0x4a0   : > { %v2747_v30 = vadd.f32 %v2746_v41, %v5518_v22  ;;  %v2792_v41 = vmax.f32 %v2732_v47, %v2778_v17 }
 0x4a2   : > { %v2790_v35 = vmul.f32 0.01, %v2747_v30  ;;  %v5540_v43 = vpop.f32.mrf.mxu3  ;;  %v2806_v10 = vpack.c.bf16 %v2794_v4, %v2792_v41 }
 0x4a3   : > { %v2557_v19 = vadd.f32 %v5540_v43, %v2508_v0 }
 0x4a4   : > { %v2804_v32 = vmax.f32 %v2747_v30, %v2790_v35  ;;  %v2514_v30 = vpop.f32.mrf.mxu2 }
 0x4a5   : > { %v2592_v41 = vmul.f32 0.01, %v2557_v19 }
 0x4a6   : > { %v2812_v14 = vpack.c.bf16 %v2804_v32, %v2804_v32  ;;  %v2417_v32 = vadd.f32 %v5392_v9, %v5944_v39  ;;  %v2461_v39 = vadd.f32 %v5483_v57, %v2412_v33 }
 0x4a7   : > { %v2748_v62 = vpop.f32.mrf.mxu0 }
 0x4a8   : > { %v2861_v26 = vsel %vm2859_vm2, %v2812_v14, 0  ;;  %v2466_v14 = vadd.f32 %v5490_v60, %v2417_v32  ;;  %v2471_v62 = vadd.f32 %v5497_v40, %v2422_v63  ;;  %v5595_v32 = vpop.permute.xlu0 %2834 }
 0x4a9   : > { %2870 = vmatpush.bf16.msra.mxu2 %v2861_v26 }
 0x4aa   : > { %v2558_v15 = vpop.f32.mrf.mxu3  ;;  %v2515_v9 = vadd.f32 %v2514_v30, %v2466_v14 }
 0x4ac   : > { %v2517_v25 = vpop.f32.mrf.mxu2 }
 0x4ad   : > { %2871 = vmatpush.bf16.msra.mxu2 %v2810_v52  ;;  %v2518_v34 = vadd.f32 %v2517_v25, %v5495_v36  ;;  %v2510_v36 = vadd.f32 %v5533_v44, %v2461_v39  ;;  %v2505_v52 = vadd.f32 %v5513_v58, %v2456_v59 }
 0x4af   : > { %v2559_v18 = vadd.f32 %v2558_v15, %v2510_v36  ;;  %v2554_v38 = vadd.f32 %v5527_v37, %v2505_v52  ;;  %v2588_v15 = vmul.f32 0.01, %v5521_v61 }
 0x4b1   : > { %2872 = vmatpush.bf16.msra.mxu2 %v2808_v2  ;;  %v2594_v4 = vmul.f32 0.01, %v2559_v18 }
 0x4b2   : > { %v2561_v35 = vpop.f32.mrf.mxu3 }
 0x4b3   : > { %v2562_v40 = vadd.f32 %v2561_v35, %v2513_v56  ;;  %v2590_v35 = vmul.f32 0.01, %v2554_v38  ;;  %v2626_v1 = vmax.f32 %v2559_v18, %v2594_v4  ;;  %v5610_v56 = vld [vmem:[%s5703_s9] sm:$0xff] }
 0x4b4   : > { %v2519_v26 = vpop.f32.mrf.mxu2 }
 0x4b5   : > { %2873 = vmatpush.bf16.msra.mxu2 %v2806_v10  ;;  %v2520_v60 = vadd.f32 %v2519_v26, %v2471_v62  ;;  %v2596_v48 = vmul.f32 0.01, %v2562_v40  ;;  %v2624_v10 = vmax.f32 %v2557_v19, %v2592_v41  ;;  %v2622_v58 = vmax.f32 %v2554_v38, %v2590_v35 }
 0x4b7   : > { %v2628_v30 = vmax.f32 %v2562_v40, %v2596_v48  ;;  %v2646_v43 = vpack.c.bf16 %v2626_v1, %v2624_v10 }
 0x4b8   : > { %3530 = vmatmul.msk.bf16.vlgmr.msra.gmra.mxu2 %vm2852_vm3, %v5554_v5 }
 0x4ba   : > { %v2563_v16 = vpop.f32.mrf.mxu3 }
 0x4bb   : > { %v2564_v53 = vadd.f32 %v2563_v16, %v2515_v9  ;;  %v2620_v16 = vmax.f32 %v5521_v61, %v2588_v15 }
 0x4bd   : > { %v2598_v3 = vmul.f32 0.01, %v2564_v53  ;;  %v2644_v25 = vpack.c.bf16 %v2622_v58, %v2620_v16 }
 0x4bf   : > { %v2630_v44 = vmax.f32 %v2564_v53, %v2598_v3 }
 0x4c1   : > { %v2648_v55 = vpack.c.bf16 %v2630_v44, %v2628_v30 }
 0x4c2   : > { %v2566_v21 = vpop.f32.mrf.mxu3 }
 0x4c3   : > { %v2567_v47 = vadd.f32 %v2566_v21, %v2518_v34 }
 0x4c5   : > { %v2600_v31 = vmul.f32 0.01, %v2567_v47 }
 0x4c7   : > { %v2632_v17 = vmax.f32 %v2567_v47, %v2600_v31 }
 0x4c8   : > { %3531 = vmatmul.msk.bf16.gmra.mxu2 %vm2852_vm3, %v5566_v23 }
 0x4ca   : > { %v2568_v28 = vpop.f32.mrf.mxu3 }
 0x4cb   : > { %v2569_v57 = vadd.f32 %v2568_v28, %v2520_v60  ;;  %v2926_v60 = vld [vmem:[%s5703_s9 + $0x8] sm:$0x3] }
 0x4cc   : > { %v2950_v53 = vunpack.c.l.b16 %v2926_v60 }
 0x4cd   : > { %v2602_v49 = vmul.f32 0.01, %v2569_v57 }
 0x4ce   : > { %v5617_v28 = vpack.c.b16 %v2950_v53, %v2950_v53 }
 0x4cf   : > { %v2634_v12 = vmax.f32 %v2569_v57, %v2602_v49 }
 0x4d1   : > { %v2650_v2 = vpack.c.bf16 %v2634_v12, %v2632_v17 }
 0x4d3   : > { %2750 = vmatpush.bf16.msrb.mxu1 %v2650_v2 }
 0x4d7   : > { %2751 = vmatpush.bf16.msrb.mxu1 %v2648_v55 }
 0x4db   : > { %2752 = vmatpush.bf16.msrb.mxu1 %v2646_v43 }
 0x4df   : > { %2753 = vmatpush.bf16.msrb.mxu1 %v2644_v25 }
 0x4e3   : > { %2754 = vmatpush.bf16.msrb.mxu1 %v5516_v11 }
 0x4e7   : > { %2755 = vmatpush.bf16.msrb.mxu1 %v5510_v45  ;;  %v5598_v45 = vpop.permute.xlu0 %2829 }
 0x4eb   : > { %2756 = vmatpush.bf16.msrb.mxu1 %v5506_v27  ;;  %v5600_v27 = vpop.permute.xlu1 %2839 }
 0x4ef   : > { %2757 = vmatpush.bf16.msrb.mxu1 %v5502_v51 }
 0x4f2   : > { %2758 = vmatmul.bf16.vlgmr.msrb.gmra.mxu1 %v5431_v50  ;;  %v5603_v50 = vpop.permute.xlu2 %2824 }
 0x502   : > { %2763 = vmatmul.bf16.gmra.mxu1 %v5447_v6 }
 0x512   : > { %2768 = vmatmul.bf16.gmra.mxu1 %v5462_v20 }
 0x522   : > { %2773 = vmatmul.bf16.gmra.mxu1 %v5475_v13 }
 0x53b   : > { %v2875_v61 = vpop.f32.mrf.mxu2 }
 0x53c   : > { %v2876_v20 = vadd.f32 %v2875_v61, %v5603_v50  ;;  %v5633_v61 = vpop.permute.xlu0 %2937 }
 0x53e   : > { %v2904_v34 = vmul.f32 0.01, %v2876_v20 }
 0x540   : > { %v2912_v47 = vmax.f32 %v2876_v20, %v2904_v34 }
 0x543   : > { %v2877_v37 = vpop.f32.mrf.mxu2 }
 0x544   : > { %v2878_v51 = vadd.f32 %v2877_v37, %v5598_v45  ;;  %v5635_v37 = vpop.permute.xlu1 %2942 }
 0x546   : > { %v2906_v14 = vmul.f32 0.01, %v2878_v51 }
 0x548   : > { %v2914_v39 = vmax.f32 %v2878_v51, %v2906_v14  ;;  %v5638_v51 = vpop.permute.xlu2 %2932 }
 0x54a   : > { %v2920_v42 = vpack.c.bf16 %v2914_v39, %v2912_v47 }
 0x54b   : > { %v2880_v21 = vpop.f32.mrf.mxu2 }
 0x54c   : > { %v2881_v11 = vadd.f32 %v2880_v21, %v5595_v32 }
 0x54e   : > { %v2908_v63 = vmul.f32 0.01, %v2881_v11 }
 0x550   : > { %v2916_v62 = vmax.f32 %v2881_v11, %v2908_v63 }
 0x553   : > { %v2882_v6 = vpop.f32.mrf.mxu2 }
 0x554   : > { %v2883_v13 = vadd.f32 %v2882_v6, %v5600_v27 }
 0x556   : > { %v2910_v33 = vmul.f32 0.01, %v2883_v13 }
 0x558   : > { %v2918_v26 = vmax.f32 %v2883_v13, %v2910_v33 }
 0x55a   : > { %v2922_v9 = vpack.c.bf16 %v2918_v26, %v2916_v62 }
 0x55c   : > { %2966 = vmatpush.bf16.msrb.mxu2 %v2922_v9 }
 0x560   : > { %2967 = vmatpush.bf16.msrb.mxu2 %v2920_v42  ;;  %v5649_v42 = vld [vmem:[%s5705_s11] sm:$0xff] }
 0x563   : > { %3538 = vmatmul.msk.bf16.vlgmr.msrb.gmra.mxu2 %vm2953_vm4, %v5610_v56 }
 0x56f   : > { %v2759_v59 = vpop.f32.mrf.mxu1 }
 0x573   : > { %3539 = vmatmul.msk.bf16.gmra.mxu2 %vm2953_vm4, %v5617_v28 }
 0x577   : > { %v2761_v36 = vpop.f32.mrf.mxu1 }
 0x578   : > { %v2762_v2 = vadd.f32 %v2761_v36, %v5544_v24 }
 0x57a   : > { %v2781_v55 = vmul.f32 0.01, %v2762_v2 }
 0x57f   : > { %v2764_v40 = vpop.f32.mrf.mxu1 }
 0x580   : > { %v2765_v38 = vadd.f32 %v2764_v40, %v5529_v7  ;;  %v2795_v7 = vmax.f32 %v2762_v2, %v2781_v55 }
 0x582   : > { %v2783_v1 = vmul.f32 0.01, %v2765_v38 }
 0x584   : > { %v2797_v58 = vmax.f32 %v2765_v38, %v2783_v1 }
 0x587   : > { %v2766_v31 = vpop.f32.mrf.mxu1 }
 0x588   : > { %v2767_v48 = vadd.f32 %v2766_v31, %v5538_v8 }
 0x58a   : > { %v2785_v41 = vmul.f32 0.01, %v2767_v48 }
 0x58c   : > { %v2799_v8 = vmax.f32 %v2767_v48, %v2785_v41 }
 0x58e   : > { %v2809_v43 = vpack.c.bf16 %v2799_v8, %v2797_v58 }
 0x58f   : > { %v2769_v57 = vpop.f32.mrf.mxu1 }
 0x590   : > { %v2770_v52 = vadd.f32 %v2769_v57, %v5525_v46 }
 0x592   : > { %v2787_v4 = vmul.f32 0.01, %v2770_v52 }
 0x594   : > { %v2801_v46 = vmax.f32 %v2770_v52, %v2787_v4 }
 0x597   : > { %v2771_v0 = vpop.f32.mrf.mxu1 }
 0x598   : > { %v2772_v18 = vadd.f32 %v2771_v0, %v5531_v54 }
 0x59a   : > { %v2789_v17 = vmul.f32 0.01, %v2772_v18 }
 0x59c   : > { %v2803_v30 = vmax.f32 %v2772_v18, %v2789_v17 }
 0x59e   : > { %v2811_v15 = vpack.c.bf16 %v2803_v30, %v2801_v46 }
 0x59f   : > { %v2774_v3 = vpop.f32.mrf.mxu1 }
 0x5a0   : > { %v2775_v49 = vadd.f32 %v2774_v3, %v5518_v22  ;;  %v2760_v22 = vadd.f32 %v2759_v59, %v5547_v29 }
 0x5a2   : > { %v2791_v19 = vmul.f32 0.01, %v2775_v49  ;;  %v2779_v10 = vmul.f32 0.01, %v2760_v22 }
 0x5a4   : > { %v2805_v12 = vmax.f32 %v2775_v49, %v2791_v19  ;;  %v2793_v16 = vmax.f32 %v2760_v22, %v2779_v10 }
 0x5a6   : > { %v2813_v44 = vpack.c.bf16 %v2805_v12, %v2805_v12  ;;  %v2807_v24 = vpack.c.bf16 %v2795_v7, %v2793_v16 }
 0x5a7   : > { %v2776_v35 = vpop.f32.mrf.mxu1 }
 0x5a8   : > { %v2864_v54 = vsel %vm2859_vm2, %v2813_v44, 0 }
 0x5a9   : > { %2889 = vmatpush.bf16.msra.mxu3 %v2864_v54 }
 0x5ad   : > { %2890 = vmatpush.bf16.msra.mxu3 %v2811_v15 }
 0x5b1   : > { %2891 = vmatpush.bf16.msra.mxu3 %v2809_v43 }
 0x5b5   : > { %2892 = vmatpush.bf16.msra.mxu3 %v2807_v24 }
 0x5b8   : > { %3532 = vmatmul.msk.bf16.vlgmr.msra.gmra.mxu3 %vm2852_vm3, %v5554_v5 }
 0x5c8   : > { %3533 = vmatmul.msk.bf16.gmra.mxu3 %vm2852_vm3, %v5566_v23  ;;  %v3014_v23 = vld [vmem:[%s5705_s11 + $0x8] sm:$0x7] }
 0x5c9   : > { %v3038_v39 = vunpack.c.l.b16 %v3014_v23 }
 0x5cb   : > { %v5651_v60 = vpack.c.b16 %v3038_v39, %v3038_v39 }
 0x5e6   : > { %v2969_v29 = vpop.f32.mrf.mxu2 }
 0x5e7   : > { %v2970_v20 = vadd.f32 %v2969_v29, %v5638_v51 }
 0x5e9   : > { %v2996_v14 = vmul.f32 0.01, %v2970_v20 }
 0x5eb   : > { %v3002_v9 = vmax.f32 %v2970_v20, %v2996_v14 }
 0x5ee   : > { %v2971_v25 = vpop.f32.mrf.mxu2 }
 0x5ef   : > { %v2972_v21 = vadd.f32 %v2971_v25, %v5633_v61 }
 0x5f1   : > { %v2998_v5 = vmul.f32 0.01, %v2972_v21 }
 0x5f3   : > { %v3004_v34 = vmax.f32 %v2972_v21, %v2998_v5 }
 0x5f5   : > { %v3008_v47 = vpack.c.bf16 %v3004_v34, %v3002_v9 }
 0x5f6   : > { %v2974_v11 = vpop.f32.mrf.mxu2 }
 0x5f7   : > { %v2975_v6 = vadd.f32 %v2974_v11, %v5635_v37 }
 0x5f9   : > { %v3000_v63 = vmul.f32 0.01, %v2975_v6 }
 0x5fb   : > { %v3006_v13 = vmax.f32 %v2975_v6, %v3000_v63 }
 0x5fd   : > { %v3010_v33 = vpack.c.bf16 %v3006_v13, %v3006_v13 }
 0x5fe   : > { %v2976_v62 = vpop.f32.mrf.mxu2 }
 0x5ff   : > { %v3049_v26 = vsel %vm1226_vm0, %v3010_v33, 0 }
 0x600   : > { %3060 = vmatpush.bf16.msra.mxu0 %v3049_v26  ;;  %3623 = vmatpush.bf16.msra.mxu2 %v3049_v26 }
 0x604   : > { %3061 = vmatpush.bf16.msra.mxu0 %v3008_v47  ;;  %3624 = vmatpush.bf16.msra.mxu2 %v3008_v47 }
 0x607   : > { %3546 = vmatmul.msk.bf16.vlgmr.msra.gmra.mxu0 %vm3041_vm5, %v5649_v42  ;;  %3547 = vmatmul.msk.bf16.vlgmr.msra.gmra.mxu2 %vm3041_vm5, %v5651_v60 }
 0x63b   : > { %v2894_v53 = vpop.f32.mrf.mxu3 }
 0x63c   : > { %v2895_v0 = vadd.f32 %v2894_v53, %v5603_v50  ;;  %v3031_v50 = vpop.permute.xlu0 %3030 }
 0x63e   : > { %v2905_v19 = vmul.f32 0.01, %v2895_v0 }
 0x640   : > { %v2913_v4 = vmax.f32 %v2895_v0, %v2905_v19 }
 0x643   : > { %v2896_v59 = vpop.f32.mrf.mxu3 }
 0x644   : > { %v2897_v31 = vadd.f32 %v2896_v59, %v5598_v45 }
 0x646   : > { %v2907_v49 = vmul.f32 0.01, %v2897_v31 }
 0x648   : > { %v2915_v12 = vmax.f32 %v2897_v31, %v2907_v49 }
 0x64a   : > { %v2921_v44 = vpack.c.bf16 %v2915_v12, %v2913_v4 }
 0x64b   : > { %v2899_v36 = vpop.f32.mrf.mxu3 }
 0x64c   : > { %v2900_v40 = vadd.f32 %v2899_v36, %v5595_v32  ;;  %v3021_v32 = vpop.permute.xlu1 %3020 }
 0x64e   : > { %v2909_v18 = vmul.f32 0.01, %v2900_v40 }
 0x650   : > { %v2917_v48 = vmax.f32 %v2900_v40, %v2909_v18 }
 0x653   : > { %v2901_v57 = vpop.f32.mrf.mxu3 }
 0x654   : > { %v2902_v3 = vadd.f32 %v2901_v57, %v5600_v27 }
 0x656   : > { %v2911_v52 = vmul.f32 0.01, %v2902_v3 }
 0x658   : > { %v2919_v17 = vmax.f32 %v2902_v3, %v2911_v52 }
 0x65a   : > { %v2923_v38 = vpack.c.bf16 %v2919_v17, %v2917_v48 }
 0x65c   : > { %2984 = vmatpush.bf16.msrb.mxu3 %v2923_v38 }
 0x660   : > { %2985 = vmatpush.bf16.msrb.mxu3 %v2921_v44 }
 0x663   : > { %3540 = vmatmul.msk.bf16.vlgmr.msrb.gmra.mxu3 %vm2953_vm4, %v5610_v56  ;;  %v3026_v56 = vpop.permute.xlu2 %3025 }
 0x673   : > { %3541 = vmatmul.msk.bf16.gmra.mxu3 %vm2953_vm4, %v5617_v28 }
 0x684   : > { %v3063_v45 = vpop.f32.mrf.mxu0 }
 0x685   : > { %v3064_v27 = vadd.f32 %v3063_v45, %v3021_v32 }
 0x687   : > { %3090 = vst [vmem:[%s5669_s22] sm:$0xff] %v3064_v27 }
 0x68a   : > { %v3068_v2 = vpop.f32.mrf.mxu2 }
 0x68b   : > { %v3069_v41 = vadd.f32 %v3068_v2, %v3031_v50 }
 0x68c   : > { %v3065_v30 = vpop.f32.mrf.mxu0 }
 0x68d   : > { %3094 = vst [vmem:[%s5669_s22 + $0x20] sm:$0x1f] %v3069_v41  ;;  %v3066_v28 = vadd.f32 %v3065_v30, %v3026_v56 }
 0x68f   : > { %3092 = vst [vmem:[%s5669_s22 + $0x10] sm:$0xff] %v3066_v28 }
 0x692   : > { %v3070_v35 = vpop.f32.mrf.mxu2 }
 0x6e6   : > { %v2987_v54 = vpop.f32.mrf.mxu3 }
 0x6e7   : > { %v2988_v8 = vadd.f32 %v2987_v54, %v5638_v51 }
 0x6e9   : > { %v2997_v7 = vmul.f32 0.01, %v2988_v8 }
 0x6eb   : > { %v3003_v25 = vmax.f32 %v2988_v8, %v2997_v7 }
 0x6ee   : > { %v2989_v22 = vpop.f32.mrf.mxu3 }
 0x6ef   : > { %v2990_v1 = vadd.f32 %v2989_v22, %v5633_v61 }
 0x6f1   : > { %v2999_v10 = vmul.f32 0.01, %v2990_v1 }
 0x6f3   : > { %v3005_v16 = vmax.f32 %v2990_v1, %v2999_v10 }
 0x6f5   : > { %v3009_v61 = vpack.c.bf16 %v3005_v16, %v3003_v25 }
 0x6f6   : > { %v2992_v46 = vpop.f32.mrf.mxu3 }
 0x6f7   : > { %v2993_v55 = vadd.f32 %v2992_v46, %v5635_v37 }
 0x6f9   : > { %v3001_v15 = vmul.f32 0.01, %v2993_v55 }
 0x6fb   : > { %v3007_v58 = vmax.f32 %v2993_v55, %v3001_v15 }
 0x6fd   : > { %v3011_v43 = vpack.c.bf16 %v3007_v58, %v3007_v58 }
 0x6fe   : > { %v2994_v24 = vpop.f32.mrf.mxu3 }
 0x6ff   : > { %v3052_v29 = vsel %vm1226_vm0, %v3011_v43, 0 }
 0x700   : > { %3078 = vmatpush.bf16.msra.mxu1 %v3052_v29  ;;  %3625 = vmatpush.bf16.msra.mxu3 %v3052_v29 }
 0x704   : > { %3079 = vmatpush.bf16.msra.mxu1 %v3009_v61  ;;  %3626 = vmatpush.bf16.msra.mxu3 %v3009_v61 }
 0x707   : > { %3548 = vmatmul.msk.bf16.vlgmr.msra.gmra.mxu1 %vm3041_vm5, %v5649_v42  ;;  %3549 = vmatmul.msk.bf16.vlgmr.msra.gmra.mxu3 %vm3041_vm5, %v5651_v60 }
 0x784   : > { %v3081_v37 = vpop.f32.mrf.mxu1 }
 0x785   : > { %v3082_v21 = vadd.f32 %v3081_v37, %v3021_v32 }
 0x787   : > { %3091 = vst [vmem:[%s5669_s22 + $0x8] sm:$0xff] %v3082_v21 }
 0x78a   : > { %v3086_v11 = vpop.f32.mrf.mxu3 }
 0x78b   : > { %v3087_v51 = vadd.f32 %v3086_v11, %v3031_v50 }
 0x78c   : > { %v3083_v6 = vpop.f32.mrf.mxu1 }
 0x78d   : > { %3095 = vst [vmem:[%s5669_s22 + $0x28] sm:$0x1f] %v3087_v51  ;;  %v3084_v20 = vadd.f32 %v3083_v6, %v3026_v56 }
 0x78f   : > { %3093 = vst [vmem:[%s5669_s22 + $0x18] sm:$0xff] %v3084_v20 }
 0x792   : > { %v3088_v63 = vpop.f32.mrf.mxu3 }
 0x793 PF: > { %s23_s27 = sadd.s32 1, %s3679_s27   ;;  %s5953_s25 = smov %s3675_s26 }
 0x794   : > { %p20_p5 = scmp.ge.s32.totalorder %s23_s27, 4   ;;  %s5954_s26 = smov %s5956_s28 }
 0x796   :  { %22 = sbr.rel (!%p20_p5) target bundleno = 2 (0x2), region = 102 }

</bundles_post_ra>
